<compile_context>
chip_gen: v5e
topology: v5e:2x2
jax: 0.10.0
libtpu: 0.0.40
codegen_flags: <defaults>
</compile_context>

<pallas_src>
import functools

import jax
import jax.numpy as jnp
from jax import lax
from jax.experimental import pallas as pl
from jax.experimental.pallas import tpu as pltpu
import numpy as np


# XLU-roll is the fast path; flipped to a jnp.roll fallback in __main__ only if
# the roll lowering is rejected on this build (correctness identical).
_SHIFT_IMPL = {"use_xlu_roll": True}


def _shift_w(a, shift):
    """Cyclic shift along axis 1 (the W / sublane axis); caller masks the wrap."""
    if _SHIFT_IMPL["use_xlu_roll"]:
        return pltpu.roll(a, shift=shift, axis=1)
    return jnp.roll(a, shift, axis=1)


def _blurpool_conv_kernel(xc_ref, xt_ref, xb_ref, w_ref, b_ref, o_ref, *,
                          h_total, fuse_taps, compute_dtype):
    # xc_ref : (1, TH, W, C)    center rows   [r0, r0+TH)
    # xt_ref : (1, 2,  W, C)    top halo rows [r0-2, r0)        (clamped at first strip)
    # xb_ref : (1, 2,  W, C)    bottom halo   [r0+TH, r0+TH+2)  (clamped at last strip)
    # w_ref  : (3, 3*C, Opad)   if fuse_taps else (9, C, Opad)
    # b_ref  : (1, Opad)        conv bias (fp32, zero-padded to Opad)
    # o_ref  : (1, TH, W, Opad) output strip
    _, TH, W, C = xc_ref.shape
    Opad = o_ref.shape[3]
    r0 = pl.program_id(1) * TH
    f32 = jnp.float32

    # Assemble the halo'd input strip (global rows r0-2 .. r0+TH+1), fp32 blur math.
    xs = jnp.concatenate(
        [xt_ref[0].astype(f32), xc_ref[0].astype(f32), xb_ref[0].astype(f32)],
        axis=0)                                                    # (TH+4, W, C)

    # Zero rows outside the image (blur zero-padding; also clears clamped halo rows).
    row = r0 - 2 + lax.broadcasted_iota(jnp.int32, (TH + 4, 1, 1), 0)
    xs = jnp.where((row >= 0) & (row < h_total), xs, 0.0)

    # Column border masks (shared by blur and conv column shifts).
    col = lax.broadcasted_iota(jnp.int32, (1, W, 1), 1)
    not_first_col = col >= 1
    not_last_col = col <= W - 2

    # Separable 3x3 blur: horizontal [1,2,1] via XLU rolls + border masks, then
    # vertical [1,2,1] via cheap leading-axis slices.  All fp32.
    xl = jnp.where(not_first_col, _shift_w(xs, 1), 0.0)        # xs[:, x-1]
    xr = jnp.where(not_last_col, _shift_w(xs, W - 1), 0.0)     # xs[:, x+1]
    bh = xl + 2.0 * xs + xr
    blur = (bh[0:TH + 2] + 2.0 * bh[1:TH + 3] + bh[2:TH + 4]) * (1.0 / 16.0)
    # blur rows correspond to blurred-map rows r0-1 .. r0+TH.

    # The wrapped conv zero-pads the *blurred* map: zero rows outside the image.
    brow = r0 - 1 + lax.broadcasted_iota(jnp.int32, (TH + 2, 1, 1), 0)
    blur = jnp.where((brow >= 0) & (brow < h_total), blur, 0.0)

    # Column-shifted variants of the blurred strip (conv taps dx = 0 / 1 / 2).
    bl = jnp.where(not_first_col, _shift_w(blur, 1), 0.0)      # blur[:, x-1]
    br = jnp.where(not_last_col, _shift_w(blur, W - 1), 0.0)   # blur[:, x+1]

    # Cast MXU operands once (blur math stays fp32; no-op when compute is fp32).
    cvars = tuple(v.astype(compute_dtype) for v in (bl, blur, br))

    acc = jnp.zeros((TH * W, Opad), jnp.float32)
    if fuse_taps:
        # C < 128: fuse the three column taps so K = 3*C; one small lane concat.
        wide = jnp.concatenate(cvars, axis=-1)                 # (TH+2, W, 3C)
        for dy in range(3):
            acc += jnp.dot(wide[dy:dy + TH].reshape(TH * W, 3 * C), w_ref[dy],
                           preferred_element_type=jnp.float32)
    else:
        # C >= 128: nine accumulated per-tap matmuls, zero extra copies.
        for dy in range(3):
            for dx in range(3):
                acc += jnp.dot(cvars[dx][dy:dy + TH].reshape(TH * W, C),
                               w_ref[dy * 3 + dx],
                               preferred_element_type=jnp.float32)

    out = acc.reshape(TH, W, Opad) + b_ref[...]
    o_ref[0] = out.astype(o_ref.dtype)


def _round_up(x, m):
    return (x + m - 1) // m * m


def _vmem_capacity_bytes():
    try:
        cap = int(pltpu.get_tpu_info().vmem_capacity_bytes)
        if cap >= 32 * 1024 * 1024:
            return cap
    except Exception:
        pass
    return 64 * 1024 * 1024          # v7x per-TC floor (the smallest generation)


def _vmem_bytes_estimate(TH, W, C, Opad, cd_b, fuse_taps):
    """Conservative per-grid-step VMEM working set, incl. pipeline double buffers."""
    blocks = 2 * (TH * W * C + 2 * (2 * W * C)) * cd_b     # center + two 2-row halos
    blocks += 2 * TH * W * Opad * cd_b                     # output block
    weights = 2 * 9 * C * Opad * cd_b + 2 * Opad * 4       # resident weight + bias
    tmp = 2 * (TH + 4) * W * C * 4                         # xs + horizontal-blur slab (fp32)
    tmp += 3 * (TH + 2) * W * C * 4                        # blur + two shifted variants (fp32)
    tmp += (3 * (TH + 2) * W * C * cd_b) if fuse_taps else (TH * W * C * cd_b)
    tmp += TH * W * Opad * 4                               # fp32 accumulator
    return blocks + weights + tmp


def _auto_tile_h(N, H, W, C, Opad, cd_b, fuse_taps, vmem_limit):
    """Largest even divisor of H whose working set fits; >=2 strips when N == 1."""
    budget = int(vmem_limit * 0.85)
    cands = [th for th in range(2, H + 1, 2) if H % th == 0]
    if N == 1:
        two_plus = [th for th in cands if H // th >= 2]    # keep both v7x TCs busy
        if two_plus:
            cands = two_plus
    best = cands[0]
    for th in cands:
        if _vmem_bytes_estimate(th, W, C, Opad, cd_b, fuse_taps) <= budget:
            best = max(best, th)
    return best


def blurpool_conv2d_nhwc(x_nhwc, conv_w_oihw, conv_b, *, tile_h=None,
                         compute_dtype=jnp.float32, fuse_taps=None):
    """BlurPoolConv2d.forward on NHWC input: (N,H,W,C) -> (N,H,W,O).

    Prefer this entry point in NHWC graphs; compute_dtype=bf16 is recommended on
    v5e/v6e/v7x (fp32 blur + fp32 accumulation are kept either way).
    """
    N, H, W, C = x_nhwc.shape
    O, Ci, kh, kw = conv_w_oihw.shape
    assert (Ci, kh, kw) == (C, 3, 3), "wrapped conv assumed 3x3, stride 1, padding 1"
    assert H % 2 == 0, "even H assumed (halo blocks are 2 rows tall)"
    assert W % 8 == 0, "W must be a multiple of 8 (sublane-aligned strips)"
    # TODO(synk): odd H, W % 8 != 0, and W tiling for extremely wide images are not handled.

    compute_dtype = jnp.dtype(compute_dtype)
    cd_b = compute_dtype.itemsize
    if fuse_taps is None:
        fuse_taps = C < 128                     # per-tap K would starve the MXU
    Opad = _round_up(O, 128)                    # lane-dense output stores
    out_dtype = compute_dtype                   # bf16 output when compute is bf16

    vmem_cap = _vmem_capacity_bytes()
    vmem_limit = min(vmem_cap * 3 // 4, 100 * 1024 * 1024)   # 48 MiB / ~96 MiB

    if tile_h is None:
        tile_h = _auto_tile_h(N, H, W, C, Opad, cd_b, fuse_taps, vmem_limit)
    assert H % tile_h == 0 and tile_h % 2 == 0, "tile_h must be an even divisor of H"
    TH = tile_h
    n_strips = H // TH
    hb = TH // 2                                # halo block (height 2) stride in blocks

    # Layout plumbing only — no pre-padding pass over the activation in HBM.
    x_in = x_nhwc.astype(compute_dtype)
    w_hwio = jnp.transpose(conv_w_oihw, (2, 3, 1, 0)).astype(compute_dtype)   # (3,3,C,O)
    bias = conv_b.astype(jnp.float32).reshape(1, O)
    if Opad != O:
        w_hwio = jnp.pad(w_hwio, ((0, 0), (0, 0), (0, 0), (0, Opad - O)))
        bias = jnp.pad(bias, ((0, 0), (0, Opad - O)))
    w_mat = w_hwio.reshape(3, 3 * C, Opad) if fuse_taps else w_hwio.reshape(9, C, Opad)

    in_specs = [
        # center strip
        pl.BlockSpec((1, TH, W, C), lambda n, h: (n, h, 0, 0)),
        # 2-row top halo (clamped into range at the first strip; masked in-kernel)
        pl.BlockSpec((1, 2, W, C),
                     lambda n, h: (n, jnp.maximum(h * hb - 1, 0), 0, 0)),
        # 2-row bottom halo (clamped at the last strip; masked in-kernel)
        pl.BlockSpec((1, 2, W, C),
                     lambda n, h: (n, jnp.minimum((h + 1) * hb, H // 2 - 1), 0, 0)),
        # weights / bias: constant block index -> resident, fetched once
        pl.BlockSpec(w_mat.shape, lambda n, h: (0, 0, 0)),
        pl.BlockSpec((1, Opad), lambda n, h: (0, 0)),
    ]
    out_spec = pl.BlockSpec((1, TH, W, Opad), lambda n, h: (n, h, 0, 0))

    kernel = functools.partial(_blurpool_conv_kernel, h_total=H,
                               fuse_taps=fuse_taps, compute_dtype=compute_dtype)
    out = pl.pallas_call(
        kernel,
        out_shape=jax.ShapeDtypeStruct((N, H, W, Opad), out_dtype),
        grid_spec=pltpu.PrefetchScalarGridSpec(
            num_scalar_prefetch=0,
            grid=(N, n_strips),
            in_specs=in_specs,
            out_specs=out_spec,
        ),
        compiler_params=pltpu.CompilerParams(
            dimension_semantics=("parallel", "parallel"),
            vmem_limit_bytes=int(vmem_limit),
        ),
    )(x_in, x_in, x_in, w_mat, bias)

    return out[..., :O]


def blurpool_conv2d(x_nchw, conv_w_oihw, conv_b, **kwargs):
    """NCHW facade matching the PyTorch module: (N,C,H,W) -> (N,O,H,W).

    NOTE: each transpose is a full HBM pass; NHWC end-to-end graphs should call
    blurpool_conv2d_nhwc directly.
    """
    x_nhwc = jnp.transpose(x_nchw, (0, 2, 3, 1))
    out = blurpool_conv2d_nhwc(x_nhwc, conv_w_oihw, conv_b, **kwargs)
    return jnp.transpose(out, (0, 3, 1, 2)).astype(x_nchw.dtype)


def _reference(x, w, b, blur_filt):
    # Pure-JAX reference of the PyTorch forward (NCHW semantics).
    blurred = lax.conv_general_dilated(
        x, blur_filt, window_strides=(1, 1), padding=((1, 1), (1, 1)),
        feature_group_count=x.shape[1],
        dimension_numbers=('NCHW', 'OIHW', 'NCHW'))
    out = lax.conv_general_dilated(
        blurred, w, (1, 1), ((1, 1), (1, 1)),
        dimension_numbers=('NCHW', 'OIHW', 'NCHW'))
    return out + b[None, :, None, None]


if __name__ == "__main__":
    key = jax.random.PRNGKey(0)
    kx, kw_, kb = jax.random.split(key, 3)
    N, C, H, W, O = 2, 4, 16, 16, 8

    x = jax.random.normal(kx, (N, C, H, W), jnp.float32)
    conv_w = jax.random.normal(kw_, (O, C, 3, 3), jnp.float32) * 0.1
    conv_b = jax.random.normal(kb, (O,), jnp.float32) * 0.1

    # Deterministic blur filter buffer: [[1,2,1],[2,4,2],[1,2,1]]/16 per channel.
    blur_filt = jnp.tile(
        jnp.array([[[[1., 2., 1.], [2., 4., 2.], [1., 2., 1.]]]], jnp.float32) / 16.0,
        (C, 1, 1, 1))
    ref = np.asarray(_reference(x, conv_w, conv_b, blur_filt))

    # Probe the XLU-roll lowering once; fall back to jnp.roll shifts if rejected.
    try:
        jax.block_until_ready(blurpool_conv2d(x, conv_w, conv_b, tile_h=8))
    except Exception:
        _SHIFT_IMPL["use_xlu_roll"] = False

    # Multi-strip grid, fused-K path (C < 128); exercises halo BlockSpecs.
    out = jax.block_until_ready(blurpool_conv2d(x, conv_w, conv_b, tile_h=8))
    np.testing.assert_allclose(np.asarray(out), ref, atol=1e-4, rtol=1e-4)

    # Auto-sized strip height (generation-aware VMEM budget).
    out = jax.block_until_ready(blurpool_conv2d(x, conv_w, conv_b))
    np.testing.assert_allclose(np.asarray(out), ref, atol=1e-4, rtol=1e-4)

    # Per-tap matmul path (the C >= 128 code path, forced here for coverage).
    out = jax.block_until_ready(
        blurpool_conv2d(x, conv_w, conv_b, tile_h=8, fuse_taps=False))
    np.testing.assert_allclose(np.asarray(out), ref, atol=1e-4, rtol=1e-4)

    # bf16 I/O + bf16 MXU operands, fp32 blur + fp32 accumulation.
    out = jax.block_until_ready(
        blurpool_conv2d(x, conv_w, conv_b, tile_h=8, compute_dtype=jnp.bfloat16))
    np.testing.assert_allclose(np.asarray(out), ref, atol=2e-2, rtol=2e-2)

    print("KERNEL_OK")
</pallas_src>

<mosaic_0001>
module attributes {stable_mosaic.version = 11 : i64} {
  func.func @_blurpool_conv_kernel(%arg0: i32, %arg1: i32, %arg2: memref<1x8x16x4xf32, #tpu.memory_space<vmem>>, %arg3: memref<1x2x16x4xf32, #tpu.memory_space<vmem>>, %arg4: memref<1x2x16x4xf32, #tpu.memory_space<vmem>>, %arg5: memref<3x12x128xf32, #tpu.memory_space<vmem>>, %arg6: memref<1x128xf32, #tpu.memory_space<vmem>>, %arg7: memref<1x8x16x128xf32, #tpu.memory_space<vmem>>) attributes {dimension_semantics = [#tpu.dimension_semantics<parallel>, #tpu.dimension_semantics<parallel>], iteration_bounds = array<i64: 2, 2>, scalar_prefetch = 0 : i64, scratch_operands = 0 : i64, tpu.core_type = #tpu.core_type<tc>, window_params = [{transform_indices = @transform_0, window_bounds = array<i64: 1, 8, 16, 4>}, {transform_indices = @transform_1, window_bounds = array<i64: 1, 2, 16, 4>}, {transform_indices = @transform_2, window_bounds = array<i64: 1, 2, 16, 4>}, {pipeline_mode = #tpu.pipeline_mode<synchronous>, transform_indices = @transform_3, window_bounds = array<i64: 3, 12, 128>}, {pipeline_mode = #tpu.pipeline_mode<synchronous>, transform_indices = @transform_4, window_bounds = array<i64: 1, 128>}, {transform_indices = @transform_5, window_bounds = array<i64: 1, 8, 16, 128>}]} {
    %c8_i32 = arith.constant 8 : i32
    %0 = arith.muli %arg1, %c8_i32 : i32
    %c0 = arith.constant 0 : index
    %c0_0 = arith.constant 0 : index
    %c0_1 = arith.constant 0 : index
    %c0_2 = arith.constant 0 : index
    %1 = vector.load %arg3[%c0, %c0_0, %c0_1, %c0_2] : memref<1x2x16x4xf32, #tpu.memory_space<vmem>>, vector<1x2x16x4xf32>
    %2 = vector.shape_cast %1 : vector<1x2x16x4xf32> to vector<2x16x4xf32>
    %c0_3 = arith.constant 0 : index
    %c0_4 = arith.constant 0 : index
    %c0_5 = arith.constant 0 : index
    %c0_6 = arith.constant 0 : index
    %3 = vector.load %arg2[%c0_3, %c0_4, %c0_5, %c0_6] : memref<1x8x16x4xf32, #tpu.memory_space<vmem>>, vector<1x8x16x4xf32>
    %4 = vector.shape_cast %3 : vector<1x8x16x4xf32> to vector<8x16x4xf32>
    %c0_7 = arith.constant 0 : index
    %c0_8 = arith.constant 0 : index
    %c0_9 = arith.constant 0 : index
    %c0_10 = arith.constant 0 : index
    %5 = vector.load %arg4[%c0_7, %c0_8, %c0_9, %c0_10] : memref<1x2x16x4xf32, #tpu.memory_space<vmem>>, vector<1x2x16x4xf32>
    %6 = vector.shape_cast %5 : vector<1x2x16x4xf32> to vector<2x16x4xf32>
    %7 = tpu.concatenate %2, %4, %6 in 0 : vector<2x16x4xf32>, vector<8x16x4xf32>, vector<2x16x4xf32> -> vector<12x16x4xf32>
    %c2_i32 = arith.constant 2 : i32
    %8 = arith.subi %0, %c2_i32 : i32
    %9 = tpu.iota {dimensions = array<i32: 0>} : vector<12x1x1xi32>
    %10 = vector.broadcast %8 : i32 to vector<12x1x1xi32>
    %11 = arith.addi %10, %9 : vector<12x1x1xi32>
    %c0_i32 = arith.constant 0 : i32
    %12 = vector.broadcast %c0_i32 : i32 to vector<12x1x1xi32>
    %13 = arith.cmpi sge, %11, %12 : vector<12x1x1xi32>
    %c16_i32 = arith.constant 16 : i32
    %14 = vector.broadcast %c16_i32 : i32 to vector<12x1x1xi32>
    %15 = arith.cmpi slt, %11, %14 : vector<12x1x1xi32>
    %16 = arith.andi %13, %15 : vector<12x1x1xi1>
    %cst = arith.constant 0.000000e+00 : f32
    %17 = vector.shape_cast %16 : vector<12x1x1xi1> to vector<12x1x1xi1>
    %18 = vector.broadcast %17 : vector<12x1x1xi1> to vector<12x16x4xi1>
    %19 = vector.broadcast %cst : f32 to vector<12x16x4xf32>
    %20 = arith.select %18, %7, %19 : vector<12x16x4xi1>, vector<12x16x4xf32>
    %21 = tpu.iota {dimensions = array<i32: 1>} : vector<1x16x1xi32>
    %c1_i32 = arith.constant 1 : i32
    %22 = vector.broadcast %c1_i32 : i32 to vector<1x16x1xi32>
    %23 = arith.cmpi sge, %21, %22 : vector<1x16x1xi32>
    %c14_i32 = arith.constant 14 : i32
    %24 = vector.broadcast %c14_i32 : i32 to vector<1x16x1xi32>
    %25 = arith.cmpi sle, %21, %24 : vector<1x16x1xi32>
    %c1_i32_11 = arith.constant 1 : i32
    %26 = tpu.dynamic_rotate %20 by %c1_i32_11 dim 1 : vector<12x16x4xf32>, i32 -> vector<12x16x4xf32>
    %cst_12 = arith.constant 0.000000e+00 : f32
    %27 = vector.shape_cast %23 : vector<1x16x1xi1> to vector<1x16x1xi1>
    %28 = vector.broadcast %27 : vector<1x16x1xi1> to vector<12x16x4xi1>
    %29 = vector.broadcast %cst_12 : f32 to vector<12x16x4xf32>
    %30 = arith.select %28, %26, %29 : vector<12x16x4xi1>, vector<12x16x4xf32>
    %c15_i32 = arith.constant 15 : i32
    %31 = tpu.dynamic_rotate %20 by %c15_i32 dim 1 : vector<12x16x4xf32>, i32 -> vector<12x16x4xf32>
    %cst_13 = arith.constant 0.000000e+00 : f32
    %32 = vector.shape_cast %25 : vector<1x16x1xi1> to vector<1x16x1xi1>
    %33 = vector.broadcast %32 : vector<1x16x1xi1> to vector<12x16x4xi1>
    %34 = vector.broadcast %cst_13 : f32 to vector<12x16x4xf32>
    %35 = arith.select %33, %31, %34 : vector<12x16x4xi1>, vector<12x16x4xf32>
    %cst_14 = arith.constant 2.000000e+00 : f32
    %36 = vector.broadcast %cst_14 : f32 to vector<12x16x4xf32>
    %37 = arith.mulf %36, %20 : vector<12x16x4xf32>
    %38 = arith.addf %30, %37 : vector<12x16x4xf32>
    %39 = arith.addf %38, %35 : vector<12x16x4xf32>
    %40 = vector.extract_strided_slice %39 {offsets = [0, 0, 0], sizes = [10, 16, 4], strides = [1, 1, 1]} : vector<12x16x4xf32> to vector<10x16x4xf32>
    %41 = vector.extract_strided_slice %39 {offsets = [1, 0, 0], sizes = [10, 16, 4], strides = [1, 1, 1]} : vector<12x16x4xf32> to vector<10x16x4xf32>
    %cst_15 = arith.constant 2.000000e+00 : f32
    %42 = vector.broadcast %cst_15 : f32 to vector<10x16x4xf32>
    %43 = arith.mulf %42, %41 : vector<10x16x4xf32>
    %44 = arith.addf %40, %43 : vector<10x16x4xf32>
    %45 = vector.extract_strided_slice %39 {offsets = [2, 0, 0], sizes = [10, 16, 4], strides = [1, 1, 1]} : vector<12x16x4xf32> to vector<10x16x4xf32>
    %46 = arith.addf %44, %45 : vector<10x16x4xf32>
    %cst_16 = arith.constant 6.250000e-02 : f32
    %47 = vector.broadcast %cst_16 : f32 to vector<10x16x4xf32>
    %48 = arith.mulf %46, %47 : vector<10x16x4xf32>
    %c1_i32_17 = arith.constant 1 : i32
    %49 = arith.subi %0, %c1_i32_17 : i32
    %50 = tpu.iota {dimensions = array<i32: 0>} : vector<10x1x1xi32>
    %51 = vector.broadcast %49 : i32 to vector<10x1x1xi32>
    %52 = arith.addi %51, %50 : vector<10x1x1xi32>
    %c0_i32_18 = arith.constant 0 : i32
    %53 = vector.broadcast %c0_i32_18 : i32 to vector<10x1x1xi32>
    %54 = arith.cmpi sge, %52, %53 : vector<10x1x1xi32>
    %c16_i32_19 = arith.constant 16 : i32
    %55 = vector.broadcast %c16_i32_19 : i32 to vector<10x1x1xi32>
    %56 = arith.cmpi slt, %52, %55 : vector<10x1x1xi32>
    %57 = arith.andi %54, %56 : vector<10x1x1xi1>
    %cst_20 = arith.constant 0.000000e+00 : f32
    %58 = vector.shape_cast %57 : vector<10x1x1xi1> to vector<10x1x1xi1>
    %59 = vector.broadcast %58 : vector<10x1x1xi1> to vector<10x16x4xi1>
    %60 = vector.broadcast %cst_20 : f32 to vector<10x16x4xf32>
    %61 = arith.select %59, %48, %60 : vector<10x16x4xi1>, vector<10x16x4xf32>
    %c1_i32_21 = arith.constant 1 : i32
    %62 = tpu.dynamic_rotate %61 by %c1_i32_21 dim 1 : vector<10x16x4xf32>, i32 -> vector<10x16x4xf32>
    %cst_22 = arith.constant 0.000000e+00 : f32
    %63 = vector.shape_cast %23 : vector<1x16x1xi1> to vector<1x16x1xi1>
    %64 = vector.broadcast %63 : vector<1x16x1xi1> to vector<10x16x4xi1>
    %65 = vector.broadcast %cst_22 : f32 to vector<10x16x4xf32>
    %66 = arith.select %64, %62, %65 : vector<10x16x4xi1>, vector<10x16x4xf32>
    %c15_i32_23 = arith.constant 15 : i32
    %67 = tpu.dynamic_rotate %61 by %c15_i32_23 dim 1 : vector<10x16x4xf32>, i32 -> vector<10x16x4xf32>
    %cst_24 = arith.constant 0.000000e+00 : f32
    %68 = vector.shape_cast %25 : vector<1x16x1xi1> to vector<1x16x1xi1>
    %69 = vector.broadcast %68 : vector<1x16x1xi1> to vector<10x16x4xi1>
    %70 = vector.broadcast %cst_24 : f32 to vector<10x16x4xf32>
    %71 = arith.select %69, %67, %70 : vector<10x16x4xi1>, vector<10x16x4xf32>
    %cst_25 = arith.constant 0.000000e+00 : f32
    %72 = vector.broadcast %cst_25 : f32 to vector<128x128xf32>
    %73 = tpu.concatenate %66, %61, %71 in 2 : vector<10x16x4xf32>, vector<10x16x4xf32>, vector<10x16x4xf32> -> vector<10x16x12xf32>
    %74 = vector.extract_strided_slice %73 {offsets = [0, 0, 0], sizes = [8, 16, 12], strides = [1, 1, 1]} : vector<10x16x12xf32> to vector<8x16x12xf32>
    %75 = vector.shape_cast %74 : vector<8x16x12xf32> to vector<128x12xf32>
    %c0_26 = arith.constant 0 : index
    %c0_27 = arith.constant 0 : index
    %c0_28 = arith.constant 0 : index
    %76 = vector.load %arg5[%c0_26, %c0_27, %c0_28] : memref<3x12x128xf32, #tpu.memory_space<vmem>>, vector<1x12x128xf32>
    %77 = vector.shape_cast %76 : vector<1x12x128xf32> to vector<12x128xf32>
    %cst_29 = arith.constant dense<0.000000e+00> : vector<128x128xf32>
    %78 = tpu.matmul %75, %77, %cst_29 {dimension_numbers = #tpu.dot_dimension_numbers<[1], [0], [0], [1], [0, 0, 1, 1], [], []>} : vector<128x12xf32>, vector<12x128xf32>, vector<128x128xf32> -> vector<128x128xf32>
    %79 = arith.addf %72, %78 : vector<128x128xf32>
    %80 = vector.extract_strided_slice %73 {offsets = [1, 0, 0], sizes = [8, 16, 12], strides = [1, 1, 1]} : vector<10x16x12xf32> to vector<8x16x12xf32>
    %81 = vector.shape_cast %80 : vector<8x16x12xf32> to vector<128x12xf32>
    %c1 = arith.constant 1 : index
    %c0_30 = arith.constant 0 : index
    %c0_31 = arith.constant 0 : index
    %82 = vector.load %arg5[%c1, %c0_30, %c0_31] : memref<3x12x128xf32, #tpu.memory_space<vmem>>, vector<1x12x128xf32>
    %83 = vector.shape_cast %82 : vector<1x12x128xf32> to vector<12x128xf32>
    %cst_32 = arith.constant dense<0.000000e+00> : vector<128x128xf32>
    %84 = tpu.matmul %81, %83, %cst_32 {dimension_numbers = #tpu.dot_dimension_numbers<[1], [0], [0], [1], [0, 0, 1, 1], [], []>} : vector<128x12xf32>, vector<12x128xf32>, vector<128x128xf32> -> vector<128x128xf32>
    %85 = arith.addf %79, %84 : vector<128x128xf32>
    %86 = vector.extract_strided_slice %73 {offsets = [2, 0, 0], sizes = [8, 16, 12], strides = [1, 1, 1]} : vector<10x16x12xf32> to vector<8x16x12xf32>
    %87 = vector.shape_cast %86 : vector<8x16x12xf32> to vector<128x12xf32>
    %c2 = arith.constant 2 : index
    %c0_33 = arith.constant 0 : index
    %c0_34 = arith.constant 0 : index
    %88 = vector.load %arg5[%c2, %c0_33, %c0_34] : memref<3x12x128xf32, #tpu.memory_space<vmem>>, vector<1x12x128xf32>
    %89 = vector.shape_cast %88 : vector<1x12x128xf32> to vector<12x128xf32>
    %cst_35 = arith.constant dense<0.000000e+00> : vector<128x128xf32>
    %90 = tpu.matmul %87, %89, %cst_35 {dimension_numbers = #tpu.dot_dimension_numbers<[1], [0], [0], [1], [0, 0, 1, 1], [], []>} : vector<128x12xf32>, vector<12x128xf32>, vector<128x128xf32> -> vector<128x128xf32>
    %91 = arith.addf %85, %90 : vector<128x128xf32>
    %92 = vector.shape_cast %91 : vector<128x128xf32> to vector<8x16x128xf32>
    %c0_36 = arith.constant 0 : index
    %c0_37 = arith.constant 0 : index
    %93 = vector.load %arg6[%c0_36, %c0_37] : memref<1x128xf32, #tpu.memory_space<vmem>>, vector<1x128xf32>
    %94 = vector.shape_cast %93 : vector<1x128xf32> to vector<1x1x128xf32>
    %95 = vector.broadcast %94 : vector<1x1x128xf32> to vector<8x16x128xf32>
    %96 = arith.addf %92, %95 : vector<8x16x128xf32>
    %c0_38 = arith.constant 0 : index
    %c0_39 = arith.constant 0 : index
    %c0_40 = arith.constant 0 : index
    %c0_41 = arith.constant 0 : index
    %97 = vector.load %arg7[%c0_38, %c0_39, %c0_40, %c0_41] : memref<1x8x16x128xf32, #tpu.memory_space<vmem>>, vector<1x8x16x128xf32>
    %98 = vector.shape_cast %97 : vector<1x8x16x128xf32> to vector<8x16x128xf32>
    %99 = vector.shape_cast %96 : vector<8x16x128xf32> to vector<1x8x16x128xf32>
    tpu.vector_store %arg7[%c0_38, %c0_39, %c0_40, %c0_41], %99 {strides = array<i32>} : memref<1x8x16x128xf32, #tpu.memory_space<vmem>>, vector<1x8x16x128xf32>,
    return
  }
  func.func @transform_0(%arg0: i32, %arg1: i32) -> (i32, i32, i32, i32) {
    %c0_i32 = arith.constant 0 : i32
    %c0_i32_0 = arith.constant 0 : i32
    %c0_i32_1 = arith.constant 0 : i32
    return %arg0, %arg1, %c0_i32, %c0_i32_0 : i32, i32, i32, i32
  }
  func.func @transform_1(%arg0: i32, %arg1: i32) -> (i32, i32, i32, i32) {
    %c4_i32 = arith.constant 4 : i32
    %0 = arith.muli %arg1, %c4_i32 : i32
    %c1_i32 = arith.constant 1 : i32
    %1 = arith.subi %0, %c1_i32 : i32
    %c0_i32 = arith.constant 0 : i32
    %2 = arith.maxsi %1, %c0_i32 : i32
    %c0_i32_0 = arith.constant 0 : i32
    %c0_i32_1 = arith.constant 0 : i32
    %c0_i32_2 = arith.constant 0 : i32
    return %arg0, %2, %c0_i32_0, %c0_i32_1 : i32, i32, i32, i32
  }
  func.func @transform_2(%arg0: i32, %arg1: i32) -> (i32, i32, i32, i32) {
    %c1_i32 = arith.constant 1 : i32
    %0 = arith.addi %arg1, %c1_i32 : i32
    %c4_i32 = arith.constant 4 : i32
    %1 = arith.muli %0, %c4_i32 : i32
    %c7_i32 = arith.constant 7 : i32
    %2 = arith.minsi %1, %c7_i32 : i32
    %c0_i32 = arith.constant 0 : i32
    %c0_i32_0 = arith.constant 0 : i32
    %c0_i32_1 = arith.constant 0 : i32
    return %arg0, %2, %c0_i32, %c0_i32_0 : i32, i32, i32, i32
  }
  func.func @transform_3(%arg0: i32, %arg1: i32) -> (i32, i32, i32) {
    %c0_i32 = arith.constant 0 : i32
    %c0_i32_0 = arith.constant 0 : i32
    %c0_i32_1 = arith.constant 0 : i32
    %c0_i32_2 = arith.constant 0 : i32
    return %c0_i32, %c0_i32_0, %c0_i32_1 : i32, i32, i32
  }
  func.func @transform_4(%arg0: i32, %arg1: i32) -> (i32, i32) {
    %c0_i32 = arith.constant 0 : i32
    %c0_i32_0 = arith.constant 0 : i32
    %c0_i32_1 = arith.constant 0 : i32
    return %c0_i32, %c0_i32_0 : i32, i32
  }
  func.func @transform_5(%arg0: i32, %arg1: i32) -> (i32, i32, i32, i32) {
    %c0_i32 = arith.constant 0 : i32
    %c0_i32_0 = arith.constant 0 : i32
    %c0_i32_1 = arith.constant 0 : i32
    return %arg0, %arg1, %c0_i32, %c0_i32_0 : i32, i32, i32, i32
  }
}

module attributes {stable_mosaic.version = 11 : i64} {
  func.func @_blurpool_conv_kernel(%arg0: i32, %arg1: i32, %arg2: memref<1x8x16x4xf32, #tpu.memory_space<vmem>>, %arg3: memref<1x2x16x4xf32, #tpu.memory_space<vmem>>, %arg4: memref<1x2x16x4xf32, #tpu.memory_space<vmem>>, %arg5: memref<3x12x128xf32, #tpu.memory_space<vmem>>, %arg6: memref<1x128xf32, #tpu.memory_space<vmem>>, %arg7: memref<1x8x16x128xf32, #tpu.memory_space<vmem>>) attributes {dimension_semantics = [#tpu.dimension_semantics<parallel>, #tpu.dimension_semantics<parallel>], iteration_bounds = array<i64: 2, 2>, scalar_prefetch = 0 : i64, scratch_operands = 0 : i64, tpu.core_type = #tpu.core_type<tc>, window_params = [{transform_indices = @transform_0, window_bounds = array<i64: 1, 8, 16, 4>}, {transform_indices = @transform_1, window_bounds = array<i64: 1, 2, 16, 4>}, {transform_indices = @transform_2, window_bounds = array<i64: 1, 2, 16, 4>}, {pipeline_mode = #tpu.pipeline_mode<synchronous>, transform_indices = @transform_3, window_bounds = array<i64: 3, 12, 128>}, {pipeline_mode = #tpu.pipeline_mode<synchronous>, transform_indices = @transform_4, window_bounds = array<i64: 1, 128>}, {transform_indices = @transform_5, window_bounds = array<i64: 1, 8, 16, 128>}]} {
    %c8_i32 = arith.constant 8 : i32
    %0 = arith.muli %arg1, %c8_i32 : i32
    %c0 = arith.constant 0 : index
    %c0_0 = arith.constant 0 : index
    %c0_1 = arith.constant 0 : index
    %c0_2 = arith.constant 0 : index
    %1 = vector.load %arg3[%c0, %c0_0, %c0_1, %c0_2] : memref<1x2x16x4xf32, #tpu.memory_space<vmem>>, vector<1x2x16x4xf32>
    %2 = vector.shape_cast %1 : vector<1x2x16x4xf32> to vector<2x16x4xf32>
    %c0_3 = arith.constant 0 : index
    %c0_4 = arith.constant 0 : index
    %c0_5 = arith.constant 0 : index
    %c0_6 = arith.constant 0 : index
    %3 = vector.load %arg2[%c0_3, %c0_4, %c0_5, %c0_6] : memref<1x8x16x4xf32, #tpu.memory_space<vmem>>, vector<1x8x16x4xf32>
    %4 = vector.shape_cast %3 : vector<1x8x16x4xf32> to vector<8x16x4xf32>
    %c0_7 = arith.constant 0 : index
    %c0_8 = arith.constant 0 : index
    %c0_9 = arith.constant 0 : index
    %c0_10 = arith.constant 0 : index
    %5 = vector.load %arg4[%c0_7, %c0_8, %c0_9, %c0_10] : memref<1x2x16x4xf32, #tpu.memory_space<vmem>>, vector<1x2x16x4xf32>
    %6 = vector.shape_cast %5 : vector<1x2x16x4xf32> to vector<2x16x4xf32>
    %7 = tpu.concatenate %2, %4, %6 in 0 : vector<2x16x4xf32>, vector<8x16x4xf32>, vector<2x16x4xf32> -> vector<12x16x4xf32>
    %c2_i32 = arith.constant 2 : i32
    %8 = arith.subi %0, %c2_i32 : i32
    %9 = tpu.iota {dimensions = array<i32: 0>} : vector<12x1x1xi32>
    %10 = vector.broadcast %8 : i32 to vector<12x1x1xi32>
    %11 = arith.addi %10, %9 : vector<12x1x1xi32>
    %c0_i32 = arith.constant 0 : i32
    %12 = vector.broadcast %c0_i32 : i32 to vector<12x1x1xi32>
    %13 = arith.cmpi sge, %11, %12 : vector<12x1x1xi32>
    %c16_i32 = arith.constant 16 : i32
    %14 = vector.broadcast %c16_i32 : i32 to vector<12x1x1xi32>
    %15 = arith.cmpi slt, %11, %14 : vector<12x1x1xi32>
    %16 = arith.andi %13, %15 : vector<12x1x1xi1>
    %cst = arith.constant 0.000000e+00 : f32
    %17 = vector.shape_cast %16 : vector<12x1x1xi1> to vector<12x1x1xi1>
    %18 = vector.broadcast %17 : vector<12x1x1xi1> to vector<12x16x4xi1>
    %19 = vector.broadcast %cst : f32 to vector<12x16x4xf32>
    %20 = arith.select %18, %7, %19 : vector<12x16x4xi1>, vector<12x16x4xf32>
    %21 = tpu.iota {dimensions = array<i32: 1>} : vector<1x16x1xi32>
    %c1_i32 = arith.constant 1 : i32
    %22 = vector.broadcast %c1_i32 : i32 to vector<1x16x1xi32>
    %23 = arith.cmpi sge, %21, %22 : vector<1x16x1xi32>
    %c14_i32 = arith.constant 14 : i32
    %24 = vector.broadcast %c14_i32 : i32 to vector<1x16x1xi32>
    %25 = arith.cmpi sle, %21, %24 : vector<1x16x1xi32>
    %26 = vector.extract_strided_slice %20 {offsets = [0, 15, 0], sizes = [12, 1, 4], strides = [1, 1, 1]} : vector<12x16x4xf32> to vector<12x1x4xf32>
    %27 = vector.extract_strided_slice %20 {offsets = [0, 0, 0], sizes = [12, 15, 4], strides = [1, 1, 1]} : vector<12x16x4xf32> to vector<12x15x4xf32>
    %28 = tpu.concatenate %26, %27 in 1 : vector<12x1x4xf32>, vector<12x15x4xf32> -> vector<12x16x4xf32>
    %cst_11 = arith.constant 0.000000e+00 : f32
    %29 = vector.shape_cast %23 : vector<1x16x1xi1> to vector<1x16x1xi1>
    %30 = vector.broadcast %29 : vector<1x16x1xi1> to vector<12x16x4xi1>
    %31 = vector.broadcast %cst_11 : f32 to vector<12x16x4xf32>
    %32 = arith.select %30, %28, %31 : vector<12x16x4xi1>, vector<12x16x4xf32>
    %33 = vector.extract_strided_slice %20 {offsets = [0, 1, 0], sizes = [12, 15, 4], strides = [1, 1, 1]} : vector<12x16x4xf32> to vector<12x15x4xf32>
    %34 = vector.extract_strided_slice %20 {offsets = [0, 0, 0], sizes = [12, 1, 4], strides = [1, 1, 1]} : vector<12x16x4xf32> to vector<12x1x4xf32>
    %35 = tpu.concatenate %33, %34 in 1 : vector<12x15x4xf32>, vector<12x1x4xf32> -> vector<12x16x4xf32>
    %cst_12 = arith.constant 0.000000e+00 : f32
    %36 = vector.shape_cast %25 : vector<1x16x1xi1> to vector<1x16x1xi1>
    %37 = vector.broadcast %36 : vector<1x16x1xi1> to vector<12x16x4xi1>
    %38 = vector.broadcast %cst_12 : f32 to vector<12x16x4xf32>
    %39 = arith.select %37, %35, %38 : vector<12x16x4xi1>, vector<12x16x4xf32>
    %cst_13 = arith.constant 2.000000e+00 : f32
    %40 = vector.broadcast %cst_13 : f32 to vector<12x16x4xf32>
    %41 = arith.mulf %40, %20 : vector<12x16x4xf32>
    %42 = arith.addf %32, %41 : vector<12x16x4xf32>
    %43 = arith.addf %42, %39 : vector<12x16x4xf32>
    %44 = vector.extract_strided_slice %43 {offsets = [0, 0, 0], sizes = [10, 16, 4], strides = [1, 1, 1]} : vector<12x16x4xf32> to vector<10x16x4xf32>
    %45 = vector.extract_strided_slice %43 {offsets = [1, 0, 0], sizes = [10, 16, 4], strides = [1, 1, 1]} : vector<12x16x4xf32> to vector<10x16x4xf32>
    %cst_14 = arith.constant 2.000000e+00 : f32
    %46 = vector.broadcast %cst_14 : f32 to vector<10x16x4xf32>
    %47 = arith.mulf %46, %45 : vector<10x16x4xf32>
    %48 = arith.addf %44, %47 : vector<10x16x4xf32>
    %49 = vector.extract_strided_slice %43 {offsets = [2, 0, 0], sizes = [10, 16, 4], strides = [1, 1, 1]} : vector<12x16x4xf32> to vector<10x16x4xf32>
    %50 = arith.addf %48, %49 : vector<10x16x4xf32>
    %cst_15 = arith.constant 6.250000e-02 : f32
    %51 = vector.broadcast %cst_15 : f32 to vector<10x16x4xf32>
    %52 = arith.mulf %50, %51 : vector<10x16x4xf32>
    %c1_i32_16 = arith.constant 1 : i32
    %53 = arith.subi %0, %c1_i32_16 : i32
    %54 = tpu.iota {dimensions = array<i32: 0>} : vector<10x1x1xi32>
    %55 = vector.broadcast %53 : i32 to vector<10x1x1xi32>
    %56 = arith.addi %55, %54 : vector<10x1x1xi32>
    %c0_i32_17 = arith.constant 0 : i32
    %57 = vector.broadcast %c0_i32_17 : i32 to vector<10x1x1xi32>
    %58 = arith.cmpi sge, %56, %57 : vector<10x1x1xi32>
    %c16_i32_18 = arith.constant 16 : i32
    %59 = vector.broadcast %c16_i32_18 : i32 to vector<10x1x1xi32>
    %60 = arith.cmpi slt, %56, %59 : vector<10x1x1xi32>
    %61 = arith.andi %58, %60 : vector<10x1x1xi1>
    %cst_19 = arith.constant 0.000000e+00 : f32
    %62 = vector.shape_cast %61 : vector<10x1x1xi1> to vector<10x1x1xi1>
    %63 = vector.broadcast %62 : vector<10x1x1xi1> to vector<10x16x4xi1>
    %64 = vector.broadcast %cst_19 : f32 to vector<10x16x4xf32>
    %65 = arith.select %63, %52, %64 : vector<10x16x4xi1>, vector<10x16x4xf32>
    %66 = vector.extract_strided_slice %65 {offsets = [0, 15, 0], sizes = [10, 1, 4], strides = [1, 1, 1]} : vector<10x16x4xf32> to vector<10x1x4xf32>
    %67 = vector.extract_strided_slice %65 {offsets = [0, 0, 0], sizes = [10, 15, 4], strides = [1, 1, 1]} : vector<10x16x4xf32> to vector<10x15x4xf32>
    %68 = tpu.concatenate %66, %67 in 1 : vector<10x1x4xf32>, vector<10x15x4xf32> -> vector<10x16x4xf32>
    %cst_20 = arith.constant 0.000000e+00 : f32
    %69 = vector.shape_cast %23 : vector<1x16x1xi1> to vector<1x16x1xi1>
    %70 = vector.broadcast %69 : vector<1x16x1xi1> to vector<10x16x4xi1>
    %71 = vector.broadcast %cst_20 : f32 to vector<10x16x4xf32>
    %72 = arith.select %70, %68, %71 : vector<10x16x4xi1>, vector<10x16x4xf32>
    %73 = vector.extract_strided_slice %65 {offsets = [0, 1, 0], sizes = [10, 15, 4], strides = [1, 1, 1]} : vector<10x16x4xf32> to vector<10x15x4xf32>
    %74 = vector.extract_strided_slice %65 {offsets = [0, 0, 0], sizes = [10, 1, 4], strides = [1, 1, 1]} : vector<10x16x4xf32> to vector<10x1x4xf32>
    %75 = tpu.concatenate %73, %74 in 1 : vector<10x15x4xf32>, vector<10x1x4xf32> -> vector<10x16x4xf32>
    %cst_21 = arith.constant 0.000000e+00 : f32
    %76 = vector.shape_cast %25 : vector<1x16x1xi1> to vector<1x16x1xi1>
    %77 = vector.broadcast %76 : vector<1x16x1xi1> to vector<10x16x4xi1>
    %78 = vector.broadcast %cst_21 : f32 to vector<10x16x4xf32>
    %79 = arith.select %77, %75, %78 : vector<10x16x4xi1>, vector<10x16x4xf32>
    %cst_22 = arith.constant 0.000000e+00 : f32
    %80 = vector.broadcast %cst_22 : f32 to vector<128x128xf32>
    %81 = tpu.concatenate %72, %65, %79 in 2 : vector<10x16x4xf32>, vector<10x16x4xf32>, vector<10x16x4xf32> -> vector<10x16x12xf32>
    %82 = vector.extract_strided_slice %81 {offsets = [0, 0, 0], sizes = [8, 16, 12], strides = [1, 1, 1]} : vector<10x16x12xf32> to vector<8x16x12xf32>
    %83 = vector.shape_cast %82 : vector<8x16x12xf32> to vector<128x12xf32>
    %c0_23 = arith.constant 0 : index
    %c0_24 = arith.constant 0 : index
    %c0_25 = arith.constant 0 : index
    %84 = vector.load %arg5[%c0_23, %c0_24, %c0_25] : memref<3x12x128xf32, #tpu.memory_space<vmem>>, vector<1x12x128xf32>
    %85 = vector.shape_cast %84 : vector<1x12x128xf32> to vector<12x128xf32>
    %cst_26 = arith.constant dense<0.000000e+00> : vector<128x128xf32>
    %86 = tpu.matmul %83, %85, %cst_26 {dimension_numbers = #tpu.dot_dimension_numbers<[1], [0], [0], [1], [0, 0, 1, 1], [], []>} : vector<128x12xf32>, vector<12x128xf32>, vector<128x128xf32> -> vector<128x128xf32>
    %87 = arith.addf %80, %86 : vector<128x128xf32>
    %88 = vector.extract_strided_slice %81 {offsets = [1, 0, 0], sizes = [8, 16, 12], strides = [1, 1, 1]} : vector<10x16x12xf32> to vector<8x16x12xf32>
    %89 = vector.shape_cast %88 : vector<8x16x12xf32> to vector<128x12xf32>
    %c1 = arith.constant 1 : index
    %c0_27 = arith.constant 0 : index
    %c0_28 = arith.constant 0 : index
    %90 = vector.load %arg5[%c1, %c0_27, %c0_28] : memref<3x12x128xf32, #tpu.memory_space<vmem>>, vector<1x12x128xf32>
    %91 = vector.shape_cast %90 : vector<1x12x128xf32> to vector<12x128xf32>
    %cst_29 = arith.constant dense<0.000000e+00> : vector<128x128xf32>
    %92 = tpu.matmul %89, %91, %cst_29 {dimension_numbers = #tpu.dot_dimension_numbers<[1], [0], [0], [1], [0, 0, 1, 1], [], []>} : vector<128x12xf32>, vector<12x128xf32>, vector<128x128xf32> -> vector<128x128xf32>
    %93 = arith.addf %87, %92 : vector<128x128xf32>
    %94 = vector.extract_strided_slice %81 {offsets = [2, 0, 0], sizes = [8, 16, 12], strides = [1, 1, 1]} : vector<10x16x12xf32> to vector<8x16x12xf32>
    %95 = vector.shape_cast %94 : vector<8x16x12xf32> to vector<128x12xf32>
    %c2 = arith.constant 2 : index
    %c0_30 = arith.constant 0 : index
    %c0_31 = arith.constant 0 : index
    %96 = vector.load %arg5[%c2, %c0_30, %c0_31] : memref<3x12x128xf32, #tpu.memory_space<vmem>>, vector<1x12x128xf32>
    %97 = vector.shape_cast %96 : vector<1x12x128xf32> to vector<12x128xf32>
    %cst_32 = arith.constant dense<0.000000e+00> : vector<128x128xf32>
    %98 = tpu.matmul %95, %97, %cst_32 {dimension_numbers = #tpu.dot_dimension_numbers<[1], [0], [0], [1], [0, 0, 1, 1], [], []>} : vector<128x12xf32>, vector<12x128xf32>, vector<128x128xf32> -> vector<128x128xf32>
    %99 = arith.addf %93, %98 : vector<128x128xf32>
    %100 = vector.shape_cast %99 : vector<128x128xf32> to vector<8x16x128xf32>
    %c0_33 = arith.constant 0 : index
    %c0_34 = arith.constant 0 : index
    %101 = vector.load %arg6[%c0_33, %c0_34] : memref<1x128xf32, #tpu.memory_space<vmem>>, vector<1x128xf32>
    %102 = vector.shape_cast %101 : vector<1x128xf32> to vector<1x1x128xf32>
    %103 = vector.broadcast %102 : vector<1x1x128xf32> to vector<8x16x128xf32>
    %104 = arith.addf %100, %103 : vector<8x16x128xf32>
    %c0_35 = arith.constant 0 : index
    %c0_36 = arith.constant 0 : index
    %c0_37 = arith.constant 0 : index
    %c0_38 = arith.constant 0 : index
    %105 = vector.load %arg7[%c0_35, %c0_36, %c0_37, %c0_38] : memref<1x8x16x128xf32, #tpu.memory_space<vmem>>, vector<1x8x16x128xf32>
    %106 = vector.shape_cast %105 : vector<1x8x16x128xf32> to vector<8x16x128xf32>
    %107 = vector.shape_cast %104 : vector<8x16x128xf32> to vector<1x8x16x128xf32>
    tpu.vector_store %arg7[%c0_35, %c0_36, %c0_37, %c0_38], %107 {strides = array<i32>} : memref<1x8x16x128xf32, #tpu.memory_space<vmem>>, vector<1x8x16x128xf32>,
    return
  }
  func.func @transform_0(%arg0: i32, %arg1: i32) -> (i32, i32, i32, i32) {
    %c0_i32 = arith.constant 0 : i32
    %c0_i32_0 = arith.constant 0 : i32
    %c0_i32_1 = arith.constant 0 : i32
    return %arg0, %arg1, %c0_i32, %c0_i32_0 : i32, i32, i32, i32
  }
  func.func @transform_1(%arg0: i32, %arg1: i32) -> (i32, i32, i32, i32) {
    %c4_i32 = arith.constant 4 : i32
    %0 = arith.muli %arg1, %c4_i32 : i32
    %c1_i32 = arith.constant 1 : i32
    %1 = arith.subi %0, %c1_i32 : i32
    %c0_i32 = arith.constant 0 : i32
    %2 = arith.maxsi %1, %c0_i32 : i32
    %c0_i32_0 = arith.constant 0 : i32
    %c0_i32_1 = arith.constant 0 : i32
    %c0_i32_2 = arith.constant 0 : i32
    return %arg0, %2, %c0_i32_0, %c0_i32_1 : i32, i32, i32, i32
  }
  func.func @transform_2(%arg0: i32, %arg1: i32) -> (i32, i32, i32, i32) {
    %c1_i32 = arith.constant 1 : i32
    %0 = arith.addi %arg1, %c1_i32 : i32
    %c4_i32 = arith.constant 4 : i32
    %1 = arith.muli %0, %c4_i32 : i32
    %c7_i32 = arith.constant 7 : i32
    %2 = arith.minsi %1, %c7_i32 : i32
    %c0_i32 = arith.constant 0 : i32
    %c0_i32_0 = arith.constant 0 : i32
    %c0_i32_1 = arith.constant 0 : i32
    return %arg0, %2, %c0_i32, %c0_i32_0 : i32, i32, i32, i32
  }
  func.func @transform_3(%arg0: i32, %arg1: i32) -> (i32, i32, i32) {
    %c0_i32 = arith.constant 0 : i32
    %c0_i32_0 = arith.constant 0 : i32
    %c0_i32_1 = arith.constant 0 : i32
    %c0_i32_2 = arith.constant 0 : i32
    return %c0_i32, %c0_i32_0, %c0_i32_1 : i32, i32, i32
  }
  func.func @transform_4(%arg0: i32, %arg1: i32) -> (i32, i32) {
    %c0_i32 = arith.constant 0 : i32
    %c0_i32_0 = arith.constant 0 : i32
    %c0_i32_1 = arith.constant 0 : i32
    return %c0_i32, %c0_i32_0 : i32, i32
  }
  func.func @transform_5(%arg0: i32, %arg1: i32) -> (i32, i32, i32, i32) {
    %c0_i32 = arith.constant 0 : i32
    %c0_i32_0 = arith.constant 0 : i32
    %c0_i32_1 = arith.constant 0 : i32
    return %arg0, %arg1, %c0_i32, %c0_i32_0 : i32, i32, i32, i32
  }
}

</mosaic_0001>

<bundles_post_ra>
// kernel: tpu_custom_call.1
= control target key start
LH: loop header
LB: loop body
LE: loop exit
PB: predicated region body
PF: predicated region fallthrough
CT: control target
= control target key end

     0   :  { %10 = vsyncpa [#allocation3], 0  ;;  %s3106_s0 = inlined_call_operand.vmem [shape: f32[2,16,16,4], index: 0, kind: input, shape index: {}]   ;;  %s3107_s1 = inlined_call_operand.vmem [shape: f32[2,16,16,4], index: 1, kind: input, shape index: {}]   ;;  %s3108_s2 = inlined_call_operand.vmem [shape: f32[2,16,16,4], index: 2, kind: input, shape index: {}]   ;;  %s3109_s3 = inlined_call_operand.vmem [shape: f32[3,12,128], index: 3, kind: input, shape index: {}]   ;;  %s3110_s4 = inlined_call_operand.vmem [shape: f32[1,128], index: 4, kind: input, shape index: {}]   ;;  %s3111_s5 = inlined_call_operand.hbm [shape: f32[2,16,16,128], index: 5, kind: output, shape index: {}]  }
   0x1   :  { %12 = vsyncpa [#allocation3 + $0x1], 0  ;;  %s2010_s18 = smov 0   ;;  %s2012_s19 = smov 0  }
   0x2   :  { %s2014_s20 = smov 0   ;;  %s2016_s21 = smov 0  }
   0x3   :  { %s2018_s22 = smov 0   ;;  %s2020_s23 = smov 0  }
   0x4   :  { %s2022_s24 = smov 0   ;;  %s2024_s25 = smov 0  }
   0x5 LB: > { %s1701_s26 = sadd.s32 4294967295, %s1975_s25   ;;  %s1702_s27 = sadd.s32 4294967294, %s1975_s25   ;;  %s1975_s25 = sphi %s2024_s25, %s18_s25   ;;  %s1971_s24 = sphi %s2022_s24, %s3140_s24   ;;  %s1967_s23 = sphi %s2020_s23, %s3139_s23   ;;  %s1963_s22 = sphi %s2018_s22, %s3138_s22   ;;  %s1959_s21 = sphi %s2016_s21, %s3137_s21   ;;  %s1955_s20 = sphi %s2014_s20, %s3136_s20   ;;  %s1951_s19 = sphi %s2012_s19, %s3135_s19   ;;  %s1947_s18 = sphi %s2010_s18, %s3134_s18  }
   0x6   : > { %s27_s28 = sadd.s32 1, %s1967_s23  ;;  %s30_s29 = sadd.s32 1, %s1971_s24 }
   0x7   : > { %p28_p0 = scmp.ge.s32.totalorder %s27_s28, 2  ;;  %p191_p1 = scmp.ne.s32.totalorder %s1955_s20, %s1951_s19 }
   0x8   : > { %p192_p2 = scmp.eq.s32.totalorder %s1701_s26, 3  ;;  %p197_p5 = scmp.ne.s32.totalorder %s1951_s19, %s1947_s18 }
   0x9   : > { %s3142_s28 = smov (%p28_p0, %s27_s28), 0  ;;  %s3144_s29 = smov (!%p28_p0, %s30_s29), %s1971_s24 }
   0xa   : > { %s177_s30 = ssub.s32 %s1967_s23, %s3142_s28  ;;  %p2061_p3 = por %p192_p2, %p191_p1 }
   0xb   : > { %p32_p4 = scmp.ge.s32.totalorder %s3144_s29, 2  ;;  %p198_p6 = scmp.eq.s32.totalorder %s1702_s27, 3 }
   0xc   : > { %p1711_p7 = scmp.ge.s32.totalorder %s1975_s25, 1  ;;  %p280_p9 = scmp.lt.s32.totalorder %s1975_s25, 5 }
   0xd   : > { %s3146_s29 = smov (%p32_p4, %s3144_s29), 0  ;;  %p2070_p8 = por %p198_p6, %p197_p5 }
   0xe   : > { %s176_s8 = ssub.s32 %s1971_s24, %s3146_s29  ;;  %s181_s9 = sadd.s32 1, %s1955_s20 }
   0xf   : > { %s178_s10 = sor.u32 %s177_s30, %s176_s8  ;;  %p281_p10 = pnand %p1711_p7, %p280_p9 }
  0x10   : > { %p179_p11 = scmp.eq.s32.totalorder %s178_s10, 0  ;;  %s1713_s12 = sshll.u32 (!%p281_p10), %s1959_s21, 3 }
  0x11   : > { %284 = sbr.rel (%p281_p10) target bundleno = 458 (0x1ca), region = 40  ;;  %p342_p12 = scmp.lt.s32.totalorder (!%p281_p10), %s1963_s22, 1 }
  0x12   : > { %s2079_s11 = scalar_select %p179_p11, %s1955_s20, %s181_s9  }
  0x13   : > { %p344_p13 = scmp.lt.s32.totalorder (!%p281_p10), %s1713_s12, 15  ;;  %s1729_s13 = sadd.s32 (!%p281_p10), 4294967294, %s1713_s12 }
  0x14   : > { %s1730_s17 = sadd.s32 (!%p281_p10), 4294967295, %s1713_s12  ;;  %s1789_s8 = sshll.u32 (!%p281_p10), %s1963_s22, 5 }
  0x16   : > { %v513_v0 = vlaneseq  ;;  %s343_s14 = scalar_select %p342_p12, %s1963_s22, 1  ;;  %v2084_v1 = vstv %s1729_s13  ;;  %v2101_v8 = vstv %s1730_s17 }
  0x17   : > { %s345_s15 = scalar_select %p344_p13, %s1713_s12, 15  ;;  %v424_v3 = vadd.s32 7, %v2084_v1  ;;  %v425_v4 = vadd.s32 8, %v2084_v1  ;;  %v426_v5 = vadd.s32 9, %v2084_v1  ;;  %v2104_v9 = vadd.s32 2, %v2084_v1 }
  0x18   : > { %v2086_v2 = vshrl.u32 %v513_v0, 7  ;;  %s2091_s16 = sshll.u32 %s343_s14, 5  ;;  %v2123_v12 = vadd.s32 3, %v2084_v1  ;;  %s1717_s12 = sshll.u32 %s1959_s21, 2  ;;  %v2131_v16 = vadd.s32 7, %v2101_v8  ;;  %v2134_v17 = vadd.s32 4, %v2084_v1 }
  0x19   : > { %s1714_s26 = sshll.u32 %s345_s15, 1  ;;  %vm436_vm0 = vcmp.ge.s32.totalorder %v424_v3, 0  ;;  %vm437_vm1 = vcmp.ge.s32.totalorder %v425_v4, 0  ;;  %vm438_vm2 = vcmp.ge.s32.totalorder %v426_v5, 0  ;;  %vm448_vm3 = vcmp.lt.s32.totalorder %v424_v3, 16  ;;  %s1718_s13 = sadd.s32 4294967295, %s1717_s12 }
  0x1a   : > { %v2094_v6 = vadd.s32 8, %v2086_v2  ;;  %s348_s27 = sadd.s32 %s2091_s16, %s1714_s26  ;;  %vm449_vm4 = vcmp.lt.s32.totalorder %v425_v4, 16  ;;  %vm450_vm5 = vcmp.lt.s32.totalorder %v426_v5, 16  ;;  %vm2097_vm6 = vmand %vm436_vm0, %vm448_vm3  ;;  %vm516_vm9 = vcmp.ge.s32.totalorder %v2086_v2, 1  ;;  %p354_p0 = scmp.gt.s32.totalorder %s1718_s13, 0 }
  0x1b   : > { %s1716_s30 = sshll.u32 %s348_s27, 3  ;;  %vm2106_vm7 = vmand %vm437_vm1, %vm449_vm4  ;;  %vm544_vm10 = vcmp.lt.s32.totalorder %v2086_v2, 1  ;;  %vm621_vm11 = vcmp.lt.s32.totalorder %v2086_v2, 7  ;;  %vm431_vm13 = vcmp.ge.s32.totalorder %v2104_v9, 0  ;;  %vm443_vm14 = vcmp.lt.s32.totalorder %v2104_v9, 16  ;;  %s1977_s26 = smov 4  }
  0x1c   : > { %s2113_s10 = scalar_lea.vmem %s3106_s0, %s1716_s30  ;;  %vm2115_vm8 = vmand %vm438_vm2, %vm450_vm5  ;;  %vm519_vm12 = vcmp.le.s32.totalorder %v2094_v6, 14  ;;  %vm432_vm15 = vcmp.ge.s32.totalorder %v2123_v12, 0  ;;  %s3148_s13 = smov (!%p354_p0, %s1718_s13), 0  ;;  %vm433_vm1 = vcmp.ge.s32.totalorder %v2134_v17, 0  ;;  %vm444_vm2 = vcmp.lt.s32.totalorder %v2123_v12, 16 }
  0x1d   : > { %v406_v13 = vld [vmem:[%s2113_s10 + $0x50] sm:$0xff]  ;;  %v407_v14 = vld [vmem:[%s2113_s10 + $0x58] sm:$0xff]  ;;  %v408_v15 = vld [vmem:[%s2113_s10 + $0x60] sm:$0xff]  ;;  %s1719_s14 = sshll.u32 %s3148_s13, 1  ;;  %vm445_vm4 = vcmp.lt.s32.totalorder %v2134_v17, 16 }
  0x1e   : > { %v409_v18 = vld [vmem:[%s2113_s10 + $0x68] sm:$0xff]  ;;  %v410_v19 = vld [vmem:[%s2113_s10 + $0x70] sm:$0xff]  ;;  %v411_v20 = vld [vmem:[%s2113_s10 + $0x78] sm:$0xff]  ;;  %v503_v21 = vsel %vm2097_vm6, %v406_v13, 0.0  ;;  %v504_v22 = vsel %vm2097_vm6, %v407_v14, 0.0  ;;  %v505_v23 = vsel %vm2106_vm7, %v408_v15, 0.0 }
  0x1f   : > { %v506_v24 = vsel %vm2106_vm7, %v409_v18, 0.0  ;;  %v507_v25 = vsel %vm2115_vm8, %v410_v19, 0.0  ;;  %v508_v26 = vsel %vm2115_vm8, %v411_v20, 0.0  ;;  %v527_v27 = vrot.slane %v503_v21, 7  ;;  %v396_v7 = vld [vmem:[%s2113_s10] sm:$0xff]  ;;  %v397_v10 = vld [vmem:[%s2113_s10 + $0x8] sm:$0xff]  ;;  %vm2201_vm0 = vmand %vm431_vm13, %vm443_vm14 }
  0x20   : > { %v528_v28 = vrot.slane %v505_v23, 7  ;;  %v529_v29 = vrot.slane %v507_v25, 7  ;;  %v539_v30 = vrot.slane %v504_v22, 7  ;;  %v540_v31 = vrot.slane %v506_v24, 7  ;;  %v398_v15 = vld [vmem:[%s2113_s10 + $0x10] sm:$0xff]  ;;  %v399_v18 = vld [vmem:[%s2113_s10 + $0x18] sm:$0xff]  ;;  %vm456_vm3 = vmand %vm432_vm15, %vm444_vm2 }
  0x21   : > { %v541_v32 = vrot.slane %v508_v26, 7  ;;  %v604_v33 = vrot.slane %v503_v21, 1  ;;  %v605_v34 = vrot.slane %v505_v23, 1  ;;  %v606_v35 = vrot.slane %v507_v25, 1  ;;  %p2225_p1 = scmp.lt.s32.totalorder %s1719_s14, 15  ;;  %vm457_vm5 = vmand %vm433_vm1, %vm445_vm4 }
  0x22   : > { %v552_v36 = vsel %vm544_vm10, %v527_v27, %v539_v30  ;;  %v553_v37 = vsel %vm544_vm10, %v528_v28, %v540_v31  ;;  %v564_v38 = vsel %vm544_vm10, %v539_v30, %v527_v27  ;;  %v565_v39 = vsel %vm544_vm10, %v540_v31, %v528_v28 }
  0x23   : > { %v554_v40 = vsel %vm544_vm10, %v529_v29, %v541_v32  ;;  %v566_v41 = vsel %vm544_vm10, %v541_v32, %v529_v29  ;;  %v587_v42 = vsel %vm516_vm9, %v564_v38, 0.0  ;;  %v589_v43 = vsel %vm516_vm9, %v565_v39, 0.0  ;;  %s3150_s14 = smov (!%p2225_p1, %s1719_s14), 15 }
  0x24   : > { %v591_v44 = vsel %vm516_vm9, %v566_v41, 0.0  ;;  %v616_v45 = vrot.slane %v504_v22, 1  ;;  %v617_v46 = vrot.slane %v506_v24, 1  ;;  %v618_v47 = vrot.slane %v508_v26, 1  ;;  %s1720_s17 = sshll.u32 %s3150_s14, 1  ;;  %s2314_s14 = sadd.s32 4, %s1717_s12 }
  0x25   : > { %v688_v48 = vmul.f32 2.0, %v503_v21  ;;  %v689_v49 = vmul.f32 2.0, %v504_v22  ;;  %v690_v50 = vmul.f32 2.0, %v505_v23  ;;  %v691_v51 = vmul.f32 2.0, %v506_v24  ;;  %v400_v22 = vld [vmem:[%s2113_s10 + $0x20] sm:$0xff]  ;;  %v401_v23 = vld [vmem:[%s2113_s10 + $0x28] sm:$0xff]  ;;  %s363_s27 = sadd.s32 %s1720_s17, %s2091_s16 }
  0x26   : > { %v629_v52 = vsel %vm621_vm11, %v604_v33, %v616_v45  ;;  %v630_v53 = vsel %vm621_vm11, %v605_v34, %v617_v46  ;;  %v631_v54 = vsel %vm621_vm11, %v606_v35, %v618_v47  ;;  %v641_v55 = vsel %vm621_vm11, %v616_v45, %v604_v33  ;;  %s1722_s30 = sshll.u32 %s363_s27, 3  ;;  %p373_p2 = scmp.lt.s32.totalorder %s2314_s14, 7 }
  0x27   : > { %v642_v56 = vsel %vm621_vm11, %v617_v46, %v605_v34  ;;  %v643_v57 = vsel %vm621_vm11, %v618_v47, %v606_v35  ;;  %v665_v58 = vsel %vm519_vm12, %v641_v55, 0.0  ;;  %v692_v59 = vmul.f32 2.0, %v507_v25  ;;  %s2310_s13 = scalar_lea.vmem %s3107_s1, %s1722_s30  ;;  %s1978_s17 = smov 8  }
  0x28   : > { %v667_v60 = vsel %vm519_vm12, %v642_v56, 0.0  ;;  %v669_v61 = vsel %vm519_vm12, %v643_v57, 0.0  ;;  %v693_v62 = vmul.f32 2.0, %v508_v26  ;;  %v712_v63 = vadd.f32 %v688_v48, %v587_v42  ;;  %s3152_s14 = smov (!%p373_p2, %s2314_s14), 7 }
  0x29   : > { %v713_v0 = vadd.f32 %v689_v49, %v552_v36  ;;  %v714_v3 = vadd.f32 %v690_v50, %v589_v43  ;;  %v715_v4 = vadd.f32 %v691_v51, %v553_v37  ;;  %v716_v5 = vadd.f32 %v692_v59, %v591_v44  ;;  %s1724_s12 = sshll.u32 %s3152_s14, 1  ;;  %s338_s14 = sand.u32 1, %s1951_s19  }
  0x2a   : > { %v717_v13 = vadd.f32 %v693_v62, %v554_v40  ;;  %v2205_v14 = vadd.f32 %v712_v63, %v629_v52  ;;  %v493_v25 = vsel %vm2201_vm0, %v396_v7, 0.0  ;;  %v494_v26 = vsel %vm2201_vm0, %v397_v10, 0.0  ;;  %p2400_p4 = scmp.lt.s32.totalorder %s1724_s12, 15  ;;  %s1556_s15 = scalar_lea.sflag [#allocation3], %s338_s14 }
  0x2b   : > { %v2211_v19 = vadd.f32 %v713_v0, %v665_v58  ;;  %v2213_v20 = vadd.f32 %v714_v3, %v630_v53  ;;  %v2215_v21 = vadd.f32 %v715_v4, %v667_v60  ;;  %v2217_v9 = vadd.f32 %v716_v5, %v631_v54 }
  0x2c   : > { %v2229_v24 = vadd.f32 %v717_v13, %v669_v61  ;;  %v495_v28 = vsel %vm456_vm3, %v398_v15, 0.0  ;;  %v496_v29 = vsel %vm456_vm3, %v399_v18, 0.0  ;;  %vm844_vm6 = vcmp.ge.s32.totalorder %v2131_v16, 0  ;;  %s3154_s12 = smov (!%p2400_p4, %s1724_s12), 15 }
  0x2d   : > { %v760_v12 = vmul.f32 2.0, %v2213_v20  ;;  %v761_v27 = vmul.f32 2.0, %v2215_v21  ;;  %vm854_vm7 = vcmp.lt.s32.totalorder %v2131_v16, 16  ;;  %v497_v30 = vsel %vm457_vm5, %v400_v22, 0.0  ;;  %s1725_s27 = sshll.u32 %s3154_s12, 1  ;;  %s1712_s12 = sshll.u32 %s338_s14, 7 }
  0x2e   : > { %v498_v31 = vsel %vm457_vm5, %v401_v23, 0.0  ;;  %v522_v34 = vrot.slane %v493_v25, 7  ;;  %v523_v35 = vrot.slane %v495_v28, 7  ;;  %v524_v17 = vrot.slane %v497_v30, 7  ;;  %vm2254_vm8 = vmand %vm844_vm6, %vm854_vm7  ;;  %s2470_s30 = sadd.s32 %s1725_s27, %s2091_s16 }
  0x2f   : > { %v780_v32 = vadd.f32 %v760_v12, %v2205_v14  ;;  %v781_v33 = vadd.f32 %v761_v27, %v2211_v19  ;;  %v534_v36 = vrot.slane %v494_v26, 7  ;;  %v535_v37 = vrot.slane %v496_v29, 7  ;;  %s1727_s16 = sshll.u32 %s2470_s30, 3  ;;  %s3017_s30 = scalar_lea.vmem [#allocation2], %s1712_s12 }
  0x30   : > { %v536_v38 = vrot.slane %v498_v31, 7  ;;  %v599_v42 = vrot.slane %v493_v25, 1  ;;  %v600_v48 = vrot.slane %v495_v28, 1  ;;  %v601_v16 = vrot.slane %v497_v30, 1 }
  0x31   : > { %v800_v39 = vadd.f32 %v780_v32, %v2217_v9  ;;  %v801_v40 = vadd.f32 %v781_v33, %v2229_v24  ;;  %v559_v45 = vsel %vm544_vm10, %v534_v36, %v522_v34  ;;  %v560_v46 = vsel %vm544_vm10, %v535_v37, %v523_v35 }
  0x32   : > { %v561_v47 = vsel %vm544_vm10, %v536_v38, %v524_v17  ;;  %v611_v49 = vrot.slane %v494_v26, 1  ;;  %v547_v51 = vsel %vm544_vm10, %v522_v34, %v534_v36  ;;  %v612_v52 = vrot.slane %v496_v29, 1 }
  0x33   : > { %v820_v43 = vmul.f32 0.0625, %v800_v39  ;;  %v821_v44 = vmul.f32 0.0625, %v801_v40  ;;  %v613_v53 = vrot.slane %v498_v31, 1  ;;  %v548_v54 = vsel %vm544_vm10, %v523_v35, %v535_v37  ;;  %v395_v39 = vld [vmem:[%s2310_s13 + $0x18] sm:$0xff] }
  0x34   : > { %v549_v55 = vsel %vm544_vm10, %v524_v17, %v536_v38  ;;  %v577_v56 = vsel %vm516_vm9, %v559_v45, 0.0  ;;  %v579_v57 = vsel %vm516_vm9, %v560_v46, 0.0  ;;  %v581_v59 = vsel %vm516_vm9, %v561_v47, 0.0  ;;  %v394_v38 = vld [vmem:[%s2310_s13 + $0x10] sm:$0xff] }
  0x35   : > { %v2267_v50 = vsel %vm2254_vm8, %v821_v44, 0.0  ;;  %v2284_v58 = vsel %vm2254_vm8, %v820_v43, 0.0  ;;  %v624_v60 = vsel %vm621_vm11, %v599_v42, %v611_v49  ;;  %v636_v61 = vsel %vm621_vm11, %v611_v49, %v599_v42 }
  0x36   : > { %1077 = vrot.lane.b32.xlu0 %v2267_v50, %s1977_s26  ;;  %v625_v62 = vsel %vm621_vm11, %v600_v48, %v612_v52  ;;  %v626_v63 = vsel %vm621_vm11, %v601_v16, %v613_v53  ;;  %v637_v0 = vsel %vm621_vm11, %v612_v52, %v600_v48  ;;  %v678_v3 = vmul.f32 2.0, %v493_v25  ;;  %v392_v48 = vld [vmem:[%s2310_s13] sm:$0xff] }
  0x37   : > { %v638_v4 = vsel %vm621_vm11, %v613_v53, %v601_v16  ;;  %v655_v5 = vsel %vm519_vm12, %v636_v61, 0.0  ;;  %v679_v7 = vmul.f32 2.0, %v494_v26  ;;  %v680_v10 = vmul.f32 2.0, %v495_v28 }
  0x38   : > { %v681_v11 = vmul.f32 2.0, %v496_v29  ;;  %v682_v13 = vmul.f32 2.0, %v497_v30  ;;  %v683_v15 = vmul.f32 2.0, %v498_v31  ;;  %v702_v18 = vadd.f32 %v678_v3, %v577_v56 }
  0x39   : > { %v657_v22 = vsel %vm519_vm12, %v637_v0, 0.0  ;;  %v703_v23 = vadd.f32 %v679_v7, %v547_v51  ;;  %v704_v12 = vadd.f32 %v680_v10, %v579_v57  ;;  %v829_v25 = vadd.s32 2, %v2101_v8 }
  0x3a   : > { %v659_v27 = vsel %vm519_vm12, %v638_v4, 0.0  ;;  %v705_v32 = vadd.f32 %v681_v11, %v548_v54  ;;  %v706_v33 = vadd.f32 %v682_v13, %v581_v59  ;;  %v707_v26 = vadd.f32 %v683_v15, %v549_v55 }
  0x3b   : > { %v974_v28 = vrot.slane %v2284_v58, 1  ;;  %v2317_v29 = vadd.f32 %v702_v18, %v624_v60  ;;  %v2319_v30 = vadd.f32 %v704_v12, %v625_v62  ;;  %v2321_v31 = vadd.f32 %v703_v23, %v655_v5 }
  0x3c   : > { %v2323_v34 = vadd.f32 %v705_v32, %v657_v22  ;;  %vm839_vm13 = vcmp.ge.s32.totalorder %v829_v25, 0  ;;  %v418_v35 = vadd.s32 1, %v2084_v1  ;;  %v2326_v17 = vadd.f32 %v706_v33, %v626_v63  ;;  %v393_v63 = vld [vmem:[%s2310_s13 + $0x8] sm:$0xff]  ;;  %s2507_s13 = scalar_lea.vmem %s3108_s2, %s1727_s16  ;;  %s1799_s16 = sshll.u32 %s1959_s21, 4 }
  0x3d   : > { %v2328_v36 = vadd.f32 %v707_v26, %v659_v27  ;;  %v750_v37 = vmul.f32 2.0, %v2319_v30  ;;  %v2335_v40 = vadd.s32 1, %v2101_v8  ;;  %vm429_vm0 = vcmp.ge.s32.totalorder %v2084_v1, 0 }
  0x3e   : > { %v751_v41 = vmul.f32 2.0, %v2323_v34  ;;  %vm430_vm14 = vcmp.ge.s32.totalorder %v418_v35, 0  ;;  %vm442_vm15 = vcmp.lt.s32.totalorder %v418_v35, 16  ;;  %vm849_vm1 = vcmp.lt.s32.totalorder %v829_v25, 16 }
  0x3f   : > { %v770_v42 = vadd.f32 %v750_v37, %v2317_v29  ;;  %vm454_vm2 = vmand %vm430_vm14, %vm442_vm15  ;;  %v749_v43 = vmul.f32 2.0, %v2321_v31  ;;  %vm441_vm3 = vcmp.lt.s32.totalorder %v2084_v1, 16  ;;  %v748_v47 = vmul.f32 2.0, %v2317_v29 }
  0x40   : > { %v771_v44 = vadd.f32 %v751_v41, %v2321_v31  ;;  %v491_v45 = vsel %vm454_vm2, %v394_v38, 0.0  ;;  %v492_v46 = vsel %vm454_vm2, %v395_v39, 0.0  ;;  %vm838_vm4 = vcmp.ge.s32.totalorder %v2335_v40, 0  ;;  %vm2354_vm5 = vmand %vm429_vm0, %vm441_vm3 }
  0x41   : > { %v790_v16 = vadd.f32 %v770_v42, %v2326_v17  ;;  %v521_v49 = vrot.slane %v491_v45, 7  ;;  %v533_v51 = vrot.slane %v492_v46, 7  ;;  %v598_v52 = vrot.slane %v491_v45, 1  ;;  %vm2361_vm6 = vmand %vm839_vm13, %vm849_vm1 }
  0x42   : > { %v791_v54 = vadd.f32 %v771_v44, %v2328_v36  ;;  %v610_v56 = vrot.slane %v492_v46, 1  ;;  %v677_v57 = vmul.f32 2.0, %v492_v46  ;;  %v676_v59 = vmul.f32 2.0, %v491_v45 }
  0x43   : > { %v810_v60 = vmul.f32 0.0625, %v790_v16  ;;  %v546_v61 = vsel %vm544_vm10, %v521_v49, %v533_v51  ;;  %v558_v62 = vsel %vm544_vm10, %v533_v51, %v521_v49  ;;  %v489_v0 = vsel %vm2354_vm5, %v392_v48, 0.0 }
  0x44   : > { %v811_v3 = vmul.f32 0.0625, %v791_v54  ;;  %v635_v4 = vsel %vm621_vm11, %v610_v56, %v598_v52  ;;  %v701_v5 = vadd.f32 %v677_v57, %v546_v61  ;;  %v575_v7 = vsel %vm516_vm9, %v558_v62, 0.0 }
  0x45   : > { %v2378_v10 = vsel %vm2361_vm6, %v810_v60, 0.0  ;;  %v653_v11 = vsel %vm519_vm12, %v635_v4, 0.0  ;;  %v623_v13 = vsel %vm621_vm11, %v598_v52, %v610_v56  ;;  %v700_v15 = vadd.f32 %v676_v59, %v575_v7  ;;  %v403_v4 = vld [vmem:[%s2113_s10 + $0x38] sm:$0xff] }
  0x46   : > { %v2387_v18 = vsel %vm2361_vm6, %v811_v3, 0.0  ;;  %v969_v22 = vrot.slane %v2378_v10, 1  ;;  %1055 = vrot.lane.b32.xlu0 %v2378_v10, %s1977_s26  ;;  %v725_v23 = vadd.f32 %v701_v5, %v653_v11  ;;  %v490_v12 = vsel %vm2354_vm5, %v393_v63, 0.0  ;;  %v402_v3 = vld [vmem:[%s2113_s10 + $0x30] sm:$0xff] }
  0x47   : > { %v979_v25 = vrot.slane %v2387_v18, 1  ;;  %1057 = vrot.lane.b32.xlu2 %v2387_v18, %s1977_s26  ;;  %v724_v27 = vadd.f32 %v700_v15, %v623_v13  ;;  %v520_v32 = vrot.slane %v489_v0, 7  ;;  %v532_v33 = vrot.slane %v490_v12, 7 }
  0x48   : > { %vm848_vm7 = vcmp.lt.s32.totalorder %v2335_v40, 16  ;;  %v597_v26 = vrot.slane %v489_v0, 1  ;;  %v609_v35 = vrot.slane %v490_v12, 1  ;;  %v674_v37 = vmul.f32 2.0, %v489_v0 }
  0x49   : > { %v989_v38 = vsel %vm621_vm11, %v969_v22, %v979_v25  ;;  %v769_v39 = vadd.f32 %v749_v43, %v725_v23  ;;  %v768_v41 = vadd.f32 %v748_v47, %v724_v27  ;;  %v557_v42 = vsel %vm544_vm10, %v532_v33, %v520_v32  ;;  %vm2427_vm8 = vmand %vm838_vm4, %vm848_vm7 }
  0x4a   : > { %1135 = vrot.lane.b32.xlu1 %v989_v38, %s1978_s17  ;;  %v545_v44 = vsel %vm544_vm10, %v520_v32, %v532_v33  ;;  %v573_v45 = vsel %vm516_vm9, %v557_v42, 0.0  ;;  %v622_v46 = vsel %vm621_vm11, %v597_v26, %v609_v35  ;;  %v634_v43 = vsel %vm621_vm11, %v609_v35, %v597_v26 }
  0x4b   : > { %v984_v47 = vrot.slane %v2267_v50, 1  ;;  %v788_v48 = vadd.f32 %v768_v41, %v2319_v30  ;;  %v675_v16 = vmul.f32 2.0, %v490_v12  ;;  %v698_v49 = vadd.f32 %v674_v37, %v573_v45 }
  0x4c   : > { %v651_v52 = vsel %vm519_vm12, %v634_v43, 0.0  ;;  %v746_v53 = vmul.f32 2.0, %v724_v27  ;;  %v747_v57 = vmul.f32 2.0, %v725_v23  ;;  %v789_v40 = vadd.f32 %v769_v39, %v2323_v34 }
  0x4d   : > { %v808_v54 = vmul.f32 0.0625, %v788_v48  ;;  %v699_v55 = vadd.f32 %v675_v16, %v545_v44  ;;  %v722_v56 = vadd.f32 %v698_v49, %v622_v46  ;;  %v422_v59 = vadd.s32 5, %v2084_v1 }
  0x4e   : > { %1075 = vrot.lane.b32.xlu0 %v2284_v58, %s1977_s26  ;;  %v994_v60 = vsel %vm621_vm11, %v974_v28, %v984_v47  ;;  %v1004_v63 = vsel %vm621_vm11, %v984_v47, %v974_v28  ;;  %vm837_vm13 = vcmp.ge.s32.totalorder %v2101_v8, 0  ;;  %vm847_vm14 = vcmp.lt.s32.totalorder %v2101_v8, 16 }
  0x4f   : > { %v2449_v61 = vsel %vm2427_vm8, %v808_v54, 0.0  ;;  %v723_v62 = vadd.f32 %v699_v55, %v651_v52  ;;  %v766_v0 = vadd.f32 %v746_v53, %v722_v56  ;;  %vm434_vm15 = vcmp.ge.s32.totalorder %v422_v59, 0  ;;  %vm857_vm2 = vmand %vm837_vm13, %vm847_vm14 }
  0x50   : > { %1051 = vrot.lane.b32.xlu2 %v2449_v61, %s1977_s26  ;;  %vm446_vm0 = vcmp.lt.s32.totalorder %v422_v59, 16  ;;  %v809_v7 = vmul.f32 0.0625, %v789_v40  ;;  %v1022_v11 = vsel %vm519_vm12, %v1004_v63, 0.0  ;;  %v752_v13 = vmul.f32 2.0, %v2326_v17  ;;  %v412_v63 = vld [vmem:[%s2507_s13] sm:$0xff] }
  0x51   : > { %v767_v5 = vadd.f32 %v747_v57, %v723_v62  ;;  %v786_v28 = vadd.f32 %v766_v0, %v2317_v29  ;;  %vm458_vm1 = vmand %vm434_vm15, %vm446_vm0  ;;  %v753_v27 = vmul.f32 2.0, %v2328_v36  ;;  %v968_v55 = vrot.slane %v2449_v61, 1  ;;  %v413_v0 = vld [vmem:[%s2507_s13 + $0x8] sm:$0xff] }
  0x52   : > { %1155 = vrot.lane.b32.xlu1 %v994_v60, %s1978_s17  ;;  %v499_v23 = vsel %vm458_vm1, %v402_v3, 0.0  ;;  %v500_v12 = vsel %vm458_vm1, %v403_v4, 0.0  ;;  %v2485_v44 = vsel %vm2427_vm8, %v809_v7, 0.0  ;;  %v772_v43 = vadd.f32 %v752_v13, %v2319_v30 }
  0x53   : > { %v787_v15 = vadd.f32 %v767_v5, %v2321_v31  ;;  %v806_v32 = vmul.f32 0.0625, %v786_v28  ;;  %v525_v29 = vrot.slane %v499_v23, 7  ;;  %v537_v33 = vrot.slane %v500_v12, 7 }
  0x54   : > { %v602_v26 = vrot.slane %v499_v23, 1  ;;  %v614_v37 = vrot.slane %v500_v12, 1  ;;  %v684_v38 = vmul.f32 2.0, %v499_v23  ;;  %v685_v31 = vmul.f32 2.0, %v500_v12 }
  0x55   : > { %v807_v35 = vmul.f32 0.0625, %v787_v15  ;;  %v2476_v39 = vsel %vm857_vm2, %v806_v32, 0.0  ;;  %v550_v41 = vsel %vm544_vm10, %v525_v29, %v537_v33  ;;  %v562_v42 = vsel %vm544_vm10, %v537_v33, %v525_v29 }
  0x56   : > { %v583_v46 = vsel %vm516_vm9, %v562_v42, 0.0  ;;  %v967_v47 = vrot.slane %v2476_v39, 1  ;;  %v627_v16 = vsel %vm621_vm11, %v602_v26, %v614_v37  ;;  %v639_v49 = vsel %vm621_vm11, %v614_v37, %v602_v26 }
  0x57   : > { %v2487_v45 = vsel %vm857_vm2, %v807_v35, 0.0  ;;  %v661_v51 = vsel %vm519_vm12, %v639_v49, 0.0  ;;  %v708_v52 = vadd.f32 %v684_v38, %v583_v46  ;;  %v709_v30 = vadd.f32 %v685_v31, %v550_v41 }
  0x58   : > { %1049 = vrot.lane.b32.xlu0 %v2487_v45, %s1977_s26  ;;  %v977_v48 = vrot.slane %v2487_v45, 1  ;;  %1157 = vrot.lane.b32.xlu2 %v1022_v11, %s1978_s17  ;;  %v773_v53 = vadd.f32 %v753_v27, %v2323_v34  ;;  %v978_v54 = vrot.slane %v2485_v44, 1  ;;  %v830_v56 = vadd.s32 3, %v2101_v8 }
  0x59   : > { %v427_v57 = vadd.s32 10, %v2084_v1  ;;  %v999_v34 = vsel %vm621_vm11, %v979_v25, %v969_v22  ;;  %v2521_v40 = vadd.f32 %v708_v52, %v627_v16  ;;  %v2523_v59 = vadd.f32 %v709_v30, %v661_v51 }
  0x5a   : > { %1053 = vrot.lane.b32.xlu1 %v2485_v44, %s1977_s26  ;;  %v987_v60 = vsel %vm621_vm11, %v967_v47, %v977_v48  ;;  %v998_v62 = vsel %vm621_vm11, %v978_v54, %v968_v55  ;;  %vm840_vm5 = vcmp.ge.s32.totalorder %v830_v56, 0  ;;  %vm850_vm6 = vcmp.lt.s32.totalorder %v830_v56, 16  ;;  %v404_v56 = vld [vmem:[%s2113_s10 + $0x40] sm:$0xff] }
  0x5b   : > { %vm439_vm3 = vcmp.ge.s32.totalorder %v427_v57, 0  ;;  %vm451_vm4 = vcmp.lt.s32.totalorder %v427_v57, 16  ;;  %v792_v3 = vadd.f32 %v772_v43, %v2521_v40  ;;  %v793_v4 = vadd.f32 %v773_v53, %v2523_v59  ;;  %vm2540_vm8 = vmand %vm840_vm5, %vm850_vm6  ;;  %v405_v57 = vld [vmem:[%s2113_s10 + $0x48] sm:$0xff]  ;;  %s1571_s10 = sshll.u32 %s3017_s30, 4  ;;  %s1572_s10 = int_to_ptr.vmem [resolvable:$true] %s1571_s10 }
  0x5c   : > { %v763_v22 = vmul.f32 2.0, %v2229_v24  ;;  %v1012_v25 = vsel %vm519_vm12, %v999_v34, 0.0  ;;  %vm463_vm7 = vmand %vm439_vm3, %vm451_vm4  ;;  %v762_v5 = vmul.f32 2.0, %v2217_v9  ;;  %v1010_v7 = vsel %vm519_vm12, %v998_v62, 0.0 }
  0x5d   : > { %v812_v28 = vmul.f32 0.0625, %v792_v3  ;;  %v509_v11 = vsel %vm463_vm7, %v412_v63, 0.0  ;;  %v510_v13 = vsel %vm463_vm7, %v413_v0, 0.0  ;;  %v813_v29 = vmul.f32 0.0625, %v793_v4 }
  0x5e   : > { %v530_v23 = vrot.slane %v509_v11, 7  ;;  %v542_v12 = vrot.slane %v510_v13, 7  ;;  %v607_v27 = vrot.slane %v509_v11, 1  ;;  %v619_v32 = vrot.slane %v510_v13, 1 }
  0x5f   : > { %v694_v33 = vmul.f32 2.0, %v509_v11  ;;  %v695_v26 = vmul.f32 2.0, %v510_v13  ;;  %v423_v35 = vadd.s32 6, %v2084_v1  ;;  %v782_v37 = vadd.f32 %v762_v5, %v2213_v20 }
  0x60   : > { %1127 = vrot.lane.b32.xlu0 %v987_v60, %s1978_s17  ;;  %1047 = vrot.lane.b32.xlu2 %v2476_v39, %s1977_s26  ;;  %v783_v38 = vadd.f32 %v763_v22, %v2215_v21  ;;  %v835_v31 = vadd.s32 8, %v2101_v8  ;;  %v997_v41 = vsel %vm621_vm11, %v977_v48, %v967_v47  ;;  %v2555_v42 = vsel %vm2540_vm8, %v812_v28, 0.0 }
  0x61   : > { %v555_v46 = vsel %vm544_vm10, %v530_v23, %v542_v12  ;;  %v567_v43 = vsel %vm544_vm10, %v542_v12, %v530_v23  ;;  %v644_v16 = vsel %vm621_vm11, %v619_v32, %v607_v27  ;;  %v632_v51 = vsel %vm621_vm11, %v607_v27, %v619_v32 }
  0x62   : > { %1137 = vrot.lane.b32.xlu1 %v1012_v25, %s1978_s17  ;;  %v593_v49 = vsel %vm516_vm9, %v567_v43, 0.0  ;;  %v671_v47 = vsel %vm519_vm12, %v644_v16, 0.0  ;;  %v719_v48 = vadd.f32 %v695_v26, %v555_v46  ;;  %v2571_v52 = vsel %vm2540_vm8, %v813_v29, 0.0 }
  0x63   : > { %v718_v30 = vadd.f32 %v694_v33, %v593_v49  ;;  %v1008_v53 = vsel %vm519_vm12, %v997_v41, 0.0  ;;  %vm435_vm13 = vcmp.ge.s32.totalorder %v423_v35, 0  ;;  %v988_v34 = vsel %vm621_vm11, %v968_v55, %v978_v54 }
  0x64   : > { %v2579_v60 = vadd.f32 %v719_v48, %v671_v47  ;;  %vm447_vm14 = vcmp.lt.s32.totalorder %v423_v35, 16  ;;  %v970_v62 = vrot.slane %v2555_v42, 1  ;;  %vm845_vm15 = vcmp.ge.s32.totalorder %v835_v31, 0 }
  0x65   : > { %v2582_v63 = vadd.f32 %v718_v30, %v632_v51  ;;  %vm855_vm0 = vcmp.lt.s32.totalorder %v835_v31, 16  ;;  %vm459_vm1 = vmand %vm435_vm13, %vm447_vm14  ;;  %v980_v0 = vrot.slane %v2571_v52, 1  ;;  %v754_v12 = vmul.f32 2.0, %v2521_v40 }
  0x66   : > { %v803_v3 = vadd.f32 %v783_v38, %v2579_v60  ;;  %v501_v4 = vsel %vm459_vm1, %v404_v56, 0.0  ;;  %v502_v54 = vsel %vm459_vm1, %v405_v57, 0.0  ;;  %vm865_vm2 = vmand %vm845_vm15, %vm855_vm0  ;;  %v759_v41 = vmul.f32 2.0, %v2211_v19 }
  0x67   : > { %v802_v55 = vadd.f32 %v782_v37, %v2582_v63  ;;  %v526_v22 = vrot.slane %v501_v4, 7  ;;  %v538_v25 = vrot.slane %v502_v54, 7  ;;  %v603_v5 = vrot.slane %v501_v4, 1 }
  0x68   : > { %1133 = vrot.lane.b32.xlu0 %v1010_v7, %s1978_s17  ;;  %1129 = vrot.lane.b32.xlu2 %v1008_v53, %s1978_s17  ;;  %v615_v28 = vrot.slane %v502_v54, 1  ;;  %v686_v11 = vmul.f32 2.0, %v501_v4  ;;  %v823_v15 = vmul.f32 0.0625, %v803_v3  ;;  %v990_v32 = vsel %vm621_vm11, %v970_v62, %v980_v0 }
  0x69   : > { %v822_v13 = vmul.f32 0.0625, %v802_v55  ;;  %v563_v7 = vsel %vm544_vm10, %v538_v25, %v526_v22  ;;  %v551_v26 = vsel %vm544_vm10, %v526_v22, %v538_v25  ;;  %v687_v35 = vmul.f32 2.0, %v502_v54 }
  0x6a   : > { %1131 = vrot.lane.b32.xlu1 %v988_v34, %s1978_s17  ;;  %v585_v23 = vsel %vm516_vm9, %v563_v7, 0.0  ;;  %v640_v27 = vsel %vm621_vm11, %v615_v28, %v603_v5  ;;  %v628_v29 = vsel %vm621_vm11, %v603_v5, %v615_v28  ;;  %v758_v37 = vmul.f32 2.0, %v2205_v14 }
  0x6b   : > { %v710_v33 = vadd.f32 %v686_v11, %v585_v23  ;;  %v2610_v38 = vsel %vm865_vm2, %v822_v13, 0.0  ;;  %v663_v31 = vsel %vm519_vm12, %v640_v27, 0.0  ;;  %v2616_v46 = vsel %vm865_vm2, %v823_v15, 0.0 }
  0x6c   : > { %v711_v16 = vadd.f32 %v687_v35, %v551_v26  ;;  %v755_v49 = vmul.f32 2.0, %v2523_v59  ;;  %v774_v51 = vadd.f32 %v754_v12, %v2326_v17  ;;  %v975_v30 = vrot.slane %v2610_v38, 1 }
  0x6d   : > { %v734_v43 = vadd.f32 %v710_v33, %v628_v29  ;;  %v985_v53 = vrot.slane %v2616_v46, 1  ;;  %v831_v56 = vadd.s32 4, %v2101_v8  ;;  %v833_v34 = vadd.s32 6, %v2101_v8 }
  0x6e   : > { %v735_v47 = vadd.f32 %v711_v16, %v663_v31  ;;  %v775_v3 = vadd.f32 %v755_v49, %v2328_v36  ;;  %v1000_v5 = vsel %vm621_vm11, %v980_v0, %v970_v62  ;;  %v909_v26 = vrot.slane %v2378_v10, 7 }
  0x6f   : > { %v778_v48 = vadd.f32 %v758_v37, %v734_v43  ;;  %v794_v4 = vadd.f32 %v774_v51, %v734_v43  ;;  %v995_v55 = vsel %vm621_vm11, %v975_v30, %v985_v53  ;;  %vm841_vm3 = vcmp.ge.s32.totalorder %v831_v56, 0 }
  0x70   : > { %1139 = vrot.lane.b32.xlu0 %v990_v32, %s1978_s17  ;;  %1079 = vrot.lane.b32.xlu2 %v2610_v38, %s1977_s26  ;;  %v779_v57 = vadd.f32 %v759_v41, %v735_v47  ;;  %vm851_vm4 = vcmp.lt.s32.totalorder %v831_v56, 16  ;;  %vm843_vm5 = vcmp.ge.s32.totalorder %v833_v34, 0  ;;  %vm853_vm6 = vcmp.lt.s32.totalorder %v833_v34, 16 }
  0x71   : > { %v798_v54 = vadd.f32 %v778_v48, %v2213_v20  ;;  %v795_v22 = vadd.f32 %v775_v3, %v735_v47  ;;  %v814_v36 = vmul.f32 0.0625, %v794_v4  ;;  %vm861_vm7 = vmand %vm841_vm3, %vm851_vm4  ;;  %v1005_v25 = vsel %vm621_vm11, %v985_v53, %v975_v30 }
  0x72   : > { %1059 = vrot.lane.b32.xlu1 %v2555_v42, %s1977_s26  ;;  %v799_v17 = vadd.f32 %v779_v57, %v2215_v21  ;;  %vm863_vm8 = vmand %vm843_vm5, %vm853_vm6  ;;  %v1024_v13 = vsel %vm519_vm12, %v1005_v25, 0.0  ;;  %v756_v7 = vmul.f32 2.0, %v734_v43  ;;  %v757_v12 = vmul.f32 2.0, %v735_v47 }
  0x73   : > { %v818_v20 = vmul.f32 0.0625, %v798_v54  ;;  %v815_v28 = vmul.f32 0.0625, %v795_v22  ;;  %v2646_v11 = vsel %vm861_vm7, %v814_v36, 0.0  ;;  %v1014_v27 = vsel %vm519_vm12, %v1000_v5, 0.0 }
  0x74   : > { %v819_v21 = vmul.f32 0.0625, %v799_v17  ;;  %v776_v29 = vadd.f32 %v756_v7, %v2521_v40  ;;  %v777_v33 = vadd.f32 %v757_v12, %v2523_v59  ;;  %v919_v35 = vrot.slane %v2387_v18, 7  ;;  %v414_v17 = vld [vmem:[%s2507_s13 + $0x10] sm:$0xff] }
  0x75   : > { %v2650_v15 = vsel %vm863_vm8, %v818_v20, 0.0  ;;  %v2658_v32 = vsel %vm861_vm7, %v815_v28, 0.0  ;;  %v971_v37 = vrot.slane %v2646_v11, 1  ;;  %v832_v41 = vadd.s32 5, %v2101_v8 }
  0x76   : > { %v2652_v23 = vsel %vm863_vm8, %v819_v21, 0.0  ;;  %v973_v62 = vrot.slane %v2650_v15, 1  ;;  %v981_v31 = vrot.slane %v2658_v32, 1  ;;  %v2677_v43 = vsel %vm544_vm10, %v909_v26, %v919_v35 }
  0x77   : > { %v983_v0 = vrot.slane %v2652_v23, 1  ;;  %v918_v16 = vrot.slane %v2485_v44, 7  ;;  %v908_v49 = vrot.slane %v2449_v61, 7  ;;  %v796_v51 = vadd.f32 %v776_v29, %v2205_v14  ;;  %v1229_v61 = vld [vmem:[%s3109_s3] sm:$0xff] }
  0x78   : > { %1081 = vrot.lane.b32.xlu0 %v2616_v46, %s1977_s26  ;;  %1061 = vrot.lane.b32.xlu2 %v2571_v52, %s1977_s26  ;;  %v991_v59 = vsel %vm621_vm11, %v971_v37, %v981_v31  ;;  %v797_v47 = vadd.f32 %v777_v33, %v2211_v19  ;;  %v914_v48 = vrot.slane %v2284_v58, 7  ;;  %v924_v30 = vrot.slane %v2267_v50, 7 }
  0x79   : > { %v993_v40 = vsel %vm621_vm11, %v973_v62, %v983_v0  ;;  %vm842_vm13 = vcmp.ge.s32.totalorder %v832_v41, 0  ;;  %vm852_vm14 = vcmp.lt.s32.totalorder %v832_v41, 16  ;;  %v1001_v14 = vsel %vm621_vm11, %v981_v31, %v971_v37 }
  0x7a   : > { %1159 = vrot.lane.b32.xlu1 %v995_v55, %s1978_s17  ;;  %v816_v53 = vmul.f32 0.0625, %v796_v51  ;;  %v817_v19 = vmul.f32 0.0625, %v797_v47  ;;  %v2701_v56 = vsel %vm544_vm10, %v918_v16, %v908_v49  ;;  %vm862_vm15 = vmand %vm842_vm13, %vm852_vm14  ;;  %v2709_v57 = vsel %vm544_vm10, %v914_v48, %v924_v30  ;;  %v415_v55 = vld [vmem:[%s2507_s13 + $0x18] sm:$0xff] }
  0x7b   : > { %v1016_v34 = vsel %vm519_vm12, %v1001_v14, 0.0  ;;  %v428_v3 = vadd.s32 11, %v2084_v1  ;;  %v1003_v5 = vsel %vm621_vm11, %v983_v0, %v973_v62  ;;  %v764_v0 = vmul.f32 2.0, %v2582_v63 }
  0x7c   : > { %v2714_v4 = vsel %vm862_vm15, %v816_v53, 0.0  ;;  %v2716_v54 = vsel %vm862_vm15, %v817_v19, 0.0  ;;  %v765_v41 = vmul.f32 2.0, %v2579_v60  ;;  %vm1283_vm3 = vcmask 1043456  }
  0x7d   : > { %vm440_vm0 = vcmp.ge.s32.totalorder %v428_v3, 0  ;;  %vm452_vm1 = vcmp.lt.s32.totalorder %v428_v3, 16  ;;  %v972_v22 = vrot.slane %v2714_v4, 1  ;;  %v982_v36 = vrot.slane %v2716_v54, 1 }
  0x7e   : > { %vm464_vm2 = vmand %vm440_vm0, %vm452_vm1  ;;  %v784_v63 = vadd.f32 %v764_v0, %v2217_v9  ;;  %v785_v60 = vadd.f32 %v765_v41, %v2229_v24  ;;  %v939_v9 = vsel %vm544_vm10, %v919_v35, %v909_v26  ;;  %v2820_v6 = vsel %vm544_vm10, %v908_v49, %v918_v16 }
  0x7f   : > { %v511_v20 = vsel %vm464_vm2, %v414_v17, 0.0  ;;  %v512_v1 = vsel %vm464_vm2, %v415_v55, 0.0  ;;  %v1002_v17 = vsel %vm621_vm11, %v982_v36, %v972_v22  ;;  %v2759_v55 = vld [vmem:[%s3109_s3 + $0x28] sm:$0xf]  ;;  %v951_v44 = vsel %vm516_vm9, %v939_v9, 0.0 }
  0x80   : > { %1063 = vrot.lane.b32.xlu0 %v2646_v11, %s1977_s26  ;;  %1161 = vrot.lane.b32.xlu2 %v1024_v13, %s1978_s17  ;;  %v531_v21 = vrot.slane %v511_v20, 7  ;;  %v543_v25 = vrot.slane %v512_v1, 7  ;;  %v608_v13 = vrot.slane %v511_v20, 1  ;;  %v620_v7 = vrot.slane %v512_v1, 1 }
  0x81   : > { %v696_v12 = vmul.f32 2.0, %v511_v20  ;;  %v697_v37 = vmul.f32 2.0, %v512_v1  ;;  %1769 = vmatpush.msk.msra.mxu2 %vm1283_vm3, %v2759_v55  ;;  %v1732_v20 = vld [vmem:[%s3109_s3 + $0x18] sm:$0xf]  ;;  %v944_v1 = vsel %vm544_vm10, %v924_v30, %v914_v48  ;;  %v907_v48 = vrot.slane %v2476_v39, 7 }
  0x82   : > { %1141 = vrot.lane.b32.xlu1 %v1014_v27, %s1978_s17  ;;  %v568_v28 = vsel %vm544_vm10, %v543_v25, %v531_v21  ;;  %v992_v27 = vsel %vm621_vm11, %v972_v22, %v982_v36  ;;  %v556_v29 = vsel %vm544_vm10, %v531_v21, %v543_v25  ;;  %v645_v31 = vsel %vm621_vm11, %v620_v7, %v608_v13  ;;  %v1731_v21 = vld [vmem:[%s3109_s3 + $0x10] sm:$0xff] }
  0x83   : > { %v595_v33 = vsel %vm516_vm9, %v568_v28, 0.0  ;;  %v673_v51 = vsel %vm519_vm12, %v645_v31, 0.0  ;;  %v721_v47 = vadd.f32 %v697_v37, %v556_v29  ;;  %v1018_v22 = vsel %vm519_vm12, %v1002_v17, 0.0  ;;  %1800 = vmatpush.msk.msra.mxu3 %vm1283_vm3, %v1732_v20  ;;  %1733 = vmatpush.msk.msra.mxu0 %vm1283_vm3, %v1732_v20 }
  0x84   : > { %v720_v62 = vadd.f32 %v696_v12, %v595_v33  ;;  %v917_v30 = vrot.slane %v2487_v45, 7  ;;  %v910_v49 = vrot.slane %v2555_v42, 7  ;;  %v920_v12 = vrot.slane %v2571_v52, 7 }
  0x85   : > { %v745_v53 = vadd.f32 %v721_v47, %v673_v51  ;;  %1801 = vmatpush.msra.mxu3 %v1731_v21  ;;  %1302 = vmatpush.msra.mxu0 %v1731_v21  ;;  %vm1208_vm7 = vcmask 64512   ;;  %v961_v42 = vsel %vm516_vm9, %v944_v1, 0.0  ;;  %v913_v17 = vrot.slane %v2650_v15, 7 }
  0x86   : > { %v937_v28 = vsel %vm544_vm10, %v917_v30, %v907_v48  ;;  %v927_v39 = vsel %vm544_vm10, %v907_v48, %v917_v30  ;;  %v940_v31 = vsel %vm544_vm10, %v920_v12, %v910_v49 }
  0x87   : > { %v805_v3 = vadd.f32 %v785_v60, %v745_v53 }
  0x88   : > { %1151 = vrot.lane.b32.xlu0 %v993_v40, %s1978_s17  ;;  %1143 = vrot.lane.b32.xlu2 %v991_v59, %s1978_s17  ;;  %v1020_v40 = vsel %vm519_vm12, %v1003_v5, 0.0  ;;  %v633_v59 = vsel %vm621_vm11, %v608_v13, %v620_v7  ;;  %v1230_v7 = vld [vmem:[%s3109_s3 + $0x8] sm:$0xf] }
  0x89   : > { %v744_v14 = vadd.f32 %v720_v62, %v633_v59  ;;  %v825_v36 = vmul.f32 0.0625, %v805_v3  ;;  %1750 = vmatpush.msk.msra.mxu1 %vm1283_vm3, %v1230_v7  ;;  %1802 = vmatpush.msk.msrb.mxu3 %vm1283_vm3, %v1230_v7  ;;  %v930_v59 = vsel %vm544_vm10, %v910_v49, %v920_v12 }
  0x8a   : > { %1071 = vrot.lane.b32.xlu1 %v2650_v15, %s1977_s26 }
  0x8b   : > { %v804_v19 = vadd.f32 %v784_v63, %v744_v14  ;;  %1376 = vmatpush.msra.mxu1 %v1229_v61  ;;  %1803 = vmatpush.msrb.mxu3 %v1229_v61  ;;  %v947_v63 = vsel %vm516_vm9, %v937_v28, 0.0 }
  0x8d   : > { %v824_v24 = vmul.f32 0.0625, %v804_v19 }
  0x90   : > { %1145 = vrot.lane.b32.xlu0 %v1016_v34, %s1978_s17  ;;  %1073 = vrot.lane.b32.xlu2 %v2652_v23, %s1977_s26  ;;  %v836_v34 = vadd.s32 9, %v2101_v8  ;;  %v2770_v8 = vld [vmem:[%s3109_s3 + $0x20] sm:$0xff] }
  0x91   : > { %1453 = vmatpush.msra.mxu2 %v2770_v8 }
  0x92   : > { %1065 = vrot.lane.b32.xlu1 %v2658_v32, %s1977_s26  ;;  %vm846_vm4 = vcmp.ge.s32.totalorder %v836_v34, 0  ;;  %vm856_vm5 = vcmp.lt.s32.totalorder %v836_v34, 16  ;;  %v911_v34 = vrot.slane %v2646_v11, 7 }
  0x93   : > { %vm866_vm6 = vmand %vm846_vm4, %vm856_vm5 }
  0x94   : > { %v2778_v10 = vsel %vm866_vm6, %v824_v24, 0.0  ;;  %v2780_v18 = vsel %vm866_vm6, %v825_v36, 0.0 }
  0x95   : > { %v976_v26 = vrot.slane %v2778_v10, 1  ;;  %v986_v35 = vrot.slane %v2780_v18, 1 }
  0x97   : > { %v1006_v25 = vsel %vm621_vm11, %v986_v35, %v976_v26  ;;  %v996_v50 = vsel %vm621_vm11, %v976_v26, %v986_v35  ;;  %vm1187_vm11 = vcmask 31744  }
  0x98   : > { %1147 = vrot.lane.b32.xlu0 %v992_v27, %s1978_s17  ;;  %1067 = vrot.lane.b32.xlu2 %v2714_v4, %s1977_s26  ;;  %v1026_v5 = vsel %vm519_vm12, %v1006_v25, 0.0  ;;  %vm1234_vm12 = vcmask 97280   ;;  %v915_v25 = vrot.slane %v2610_v38, 7 }
  0x9a   : > { %1153 = vrot.lane.b32.xlu1 %v1020_v40, %s1978_s17 }
  0xa0   : > { %1149 = vrot.lane.b32.xlu2 %v1018_v22, %s1978_s17  ;;  %1083 = vrot.lane.b32.xlu0 %v2778_v10, %s1977_s26 }
  0xa1   : > { %v1058_v58 = vpop.permute.xlu2 %1057 }
  0xa2   : > { %1069 = vrot.lane.b32.xlu1 %v2716_v54, %s1977_s26  ;;  %v1193_v24 = vsel %vm1187_vm11, %v2677_v43, %v1058_v58  ;;  %v949_v43 = vsel %vm516_vm9, %v2701_v56, 0.0 }
  0xa8   : > { %1085 = vrot.lane.b32.xlu2 %v2780_v18, %s1977_s26  ;;  %1165 = vrot.lane.b32.xlu0 %v1026_v5, %s1978_s17  ;;  %v1078_v13 = vpop.permute.xlu0 %1077  ;;  %v925_v5 = vrot.slane %v2616_v46, 7  ;;  %s1568_s26 = sadd.s32 %s1799_s16, %s1789_s8 }
  0xa9   : > { %v1203_v51 = vsel %vm1187_vm11, %v2709_v57, %v1078_v13  ;;  %v923_v57 = vrot.slane %v2652_v23, 7  ;;  %s1790_s9 = sshll.u32 %s1568_s26, 3 }
  0xaa   : > { %1163 = vrot.lane.b32.xlu1 %v996_v50, %s1978_s17  ;;  %v1052_v45 = vpop.permute.xlu2 %1051  ;;  %v953_v50 = vsel %vm516_vm9, %v940_v31, 0.0  ;;  %v945_v30 = vsel %vm544_vm10, %v925_v5, %v915_v25  ;;  %v935_v49 = vsel %vm544_vm10, %v915_v25, %v925_v5  ;;  %s1570_s13 = scalar_lea.hbm %s3111_s5, %s1790_s9  ;;  %s1901_s9 = scalar_lea.hbm %s3111_s5, 512 }
  0xab   : > { %v943_v23 = vsel %vm544_vm10, %v923_v57, %v913_v17  ;;  %v1190_v35 = vsel %vm1187_vm11, %v949_v43, %v1052_v45  ;;  %v933_v13 = vsel %vm544_vm10, %v913_v17, %v923_v57  ;;  %s1573_s12 = sshll.u32 %s1570_s13, 4  ;;  %s1574_s12 = int_to_ptr.hbm [resolvable:$true] %s1573_s12 }
  0xac   : > { %s1895_s27 = sshra.s32 %s1574_s12, 4  ;;  %s1896_s27 = int_to_ptr.hbm [resolvable:$true] %s1895_s27 }
  0xad   : > { %s1897_s16 = scalar_lea.hbm %s1896_s27, 128  ;;  %p1902_p9 = scmp.lt.s32.totalorder %s1896_s27, %s3111_s5 }
  0xae   : > { %p1898_p5 = scmp.ne.s32.totalorder %s1896_s27, %s1897_s16  ;;  %p1903_p10 = scmp.lt.s32.totalorder %s1901_s9, %s1897_s16 }
  0xb0   : > { %p1899_p6 = pnand %p1898_p5, %p2061_p3  ;;  %p1904_p11 = por %p1903_p10, %p1902_p9 }
  0xb2   : > { %v1158_v33 = vpop.permute.xlu2 %1157  ;;  %p1900_p7 = pneg %p1899_p6 }
  0xb3   : > { %v2864_v60 = vsel %vm1208_vm7, %v1203_v51, %v1158_v33 }
  0xb4   : > { %p1905_p12 = pnand %p1904_p11, %p1900_p7 }
  0xb8   : > { %v1056_v16 = vpop.permute.xlu0 %1055 }
  0xb9   : > { %v1192_v27 = vsel %vm1187_vm11, %v951_v44, %v1056_v16 }
  0xba   : > { %v1048_v41 = vpop.permute.xlu2 %1047 }
  0xbb   : > { %v1188_v19 = vsel %vm1187_vm11, %v947_v63, %v1048_v41  ;;  %v959_v41 = vsel %vm516_vm9, %v943_v23, 0.0 }
  0xbc   : > { %v1136_v29 = vpop.permute.xlu1 %1135 }
  0xbd   : > { %v2840_v37 = vsel %vm1208_vm7, %v1192_v27, %v1136_v29 }
  0xbe   : > { %1770 = vmatmul.msk.f32.vlgmr.msra.gmra.mxu2 %vm1234_vm12, %v2840_v37 }
  0xc0   : > { %v1076_v62 = vpop.permute.xlu0 %1075 }
  0xc1   : > { %v1202_v52 = vsel %vm1187_vm11, %v961_v42, %v1076_v62 }
  0xc2   : > { %v1130_v53 = vpop.permute.xlu2 %1129 }
  0xc4   : > { %v1156_v0 = vpop.permute.xlu1 %1155 }
  0xc5   : > { %v2850_v40 = vsel %vm1208_vm7, %v1202_v52, %v1156_v0 }
  0xc6   : > { %1746 = vmatmul.msk.f32.vlgmr.msra.gmra.mxu3 %vm1234_vm12, %v2850_v40 }
  0xc7   : > { %1804 = vmatpush.msk.msra.mxu3 %vm1283_vm3, %v2759_v55  ;;  %v921_v55 = vrot.slane %v2658_v32, 7 }
  0xc9   : > { %1805 = vmatpush.msra.mxu3 %v2770_v8  ;;  %v941_v15 = vsel %vm544_vm10, %v921_v55, %v911_v34  ;;  %v931_v21 = vsel %vm544_vm10, %v911_v34, %v921_v55 }
  0xca   : > { %v1050_v47 = vpop.permute.xlu0 %1049  ;;  %v1080_v11 = vpop.permute.xlu2 %1079  ;;  %v955_v52 = vsel %vm516_vm9, %v941_v15, 0.0 }
  0xcb   : > { %v1189_v32 = vsel %vm1187_vm11, %v927_v39, %v1050_v47 }
  0xcc   : > { %v1054_v14 = vpop.permute.xlu1 %1053  ;;  %v1210_v26 = vsel %vm1208_vm7, %v1189_v32, %v1130_v53  ;;  %v912_v53 = vrot.slane %v2714_v4, 7 }
  0xcd   : > { %v1191_v48 = vsel %vm1187_vm11, %v2820_v6, %v1054_v14  ;;  %v963_v6 = vsel %vm516_vm9, %v945_v30, 0.0 }
  0xce   : > { %1747 = vmatmul.msk.f32.gmra.mxu3 %vm1234_vm12, %v2864_v60  ;;  %v1204_v45 = vsel %vm1187_vm11, %v963_v6, %v1080_v11  ;;  %v926_v11 = vrot.slane %v2780_v18, 7 }
  0xd2   : > { %v1128_v3 = vpop.permute.xlu0 %1127  ;;  %v1062_v56 = vpop.permute.xlu2 %1061 }
  0xd3   : > { %v1209_v9 = vsel %vm1208_vm7, %v1188_v19, %v1128_v3  ;;  %v1195_v27 = vsel %vm1187_vm11, %v930_v59, %v1062_v56  ;;  %v922_v19 = vrot.slane %v2716_v54, 7 }
  0xd4   : > { %v1138_v8 = vpop.permute.xlu1 %1137  ;;  %1751 = vmatmul.msk.f32.vlgmr.msra.gmra.mxu1 %vm1234_vm12, %v1209_v9 }
  0xd5   : > { %v1214_v22 = vsel %vm1208_vm7, %v1193_v24, %v1138_v8  ;;  %v942_v3 = vsel %vm544_vm10, %v922_v19, %v912_v53 }
  0xd6   : > { %1771 = vmatmul.msk.f32.gmra.mxu2 %vm1234_vm12, %v1214_v22  ;;  %v957_v9 = vsel %vm516_vm9, %v942_v3, 0.0 }
  0xda   : > { %v1134_v36 = vpop.permute.xlu0 %1133  ;;  %v1162_v61 = vpop.permute.xlu2 %1161 }
  0xdb   : > { %v1212_v38 = vsel %vm1208_vm7, %v1191_v48, %v1134_v36 }
  0xdc   : > { %v1132_v20 = vpop.permute.xlu1 %1131  ;;  %1752 = vmatmul.msk.f32.gmra.mxu1 %vm1234_vm12, %v1210_v26 }
  0xdd   : > { %v1211_v1 = vsel %vm1208_vm7, %v1190_v35, %v1132_v20 }
  0xde   : > { %1734 = vmatmul.msk.f32.vlgmr.msra.gmra.mxu0 %vm1234_vm12, %v1211_v1 }
  0xe2   : > { %v1140_v58 = vpop.permute.xlu0 %1139  ;;  %v1144_v42 = vpop.permute.xlu2 %1143 }
  0xe4   : > { %v1060_v28 = vpop.permute.xlu1 %1059  ;;  %1753 = vmatmul.msk.f32.gmra.mxu1 %vm1234_vm12, %v1211_v1 }
  0xe5   : > { %v1194_v39 = vsel %vm1187_vm11, %v953_v50, %v1060_v28 }
  0xe6   : > { %1735 = vmatmul.msk.f32.gmra.mxu0 %vm1234_vm12, %v1212_v38  ;;  %v1215_v46 = vsel %vm1208_vm7, %v1194_v39, %v1140_v58 }
  0xe7   : > { %1772 = vmatmul.msk.f32.gmra.mxu2 %vm1234_vm12, %v1215_v46 }
  0xea   : > { %v1082_v7 = vpop.permute.xlu0 %1081  ;;  %v1074_v47 = vpop.permute.xlu2 %1073 }
  0xeb   : > { %v1205_v12 = vsel %vm1187_vm11, %v935_v49, %v1082_v7  ;;  %v1201_v54 = vsel %vm1187_vm11, %v933_v13, %v1074_v47 }
  0xec   : > { %v1160_v44 = vpop.permute.xlu1 %1159  ;;  %1754 = vmatmul.msk.f32.gmra.mxu1 %vm1234_vm12, %v1212_v38  ;;  %v2926_v31 = vsel %vm1208_vm7, %v1205_v12, %v1162_v61 }
  0xed   : > { %v2915_v16 = vsel %vm1208_vm7, %v1204_v45, %v1160_v44 }
  0xee   : > { %1736 = vmatmul.msk.f32.gmra.mxu0 %vm1234_vm12, %v2840_v37  ;;  %1748 = vmatmul.msk.f32.gmra.mxu3 %vm1234_vm12, %v2915_v16 }
  0xf2   : > { %v1064_v29 = vpop.permute.xlu0 %1063  ;;  %v1068_v24 = vpop.permute.xlu2 %1067 }
  0xf3   : > { %v1196_v0 = vsel %vm1187_vm11, %v955_v52, %v1064_v29  ;;  %v1198_v4 = vsel %vm1187_vm11, %v957_v9, %v1068_v24 }
  0xf4   : > { %v1142_v33 = vpop.permute.xlu1 %1141  ;;  %1755 = vmatmul.msk.f32.gmra.mxu1 %vm1234_vm12, %v2840_v37  ;;  %v1217_v37 = vsel %vm1208_vm7, %v1196_v0, %v1144_v42 }
  0xf5   : > { %v1216_v62 = vsel %vm1208_vm7, %v1195_v27, %v1142_v33 }
  0xf6   : > { %1737 = vmatmul.msk.f32.gmra.mxu0 %vm1234_vm12, %v1214_v22  ;;  %1773 = vmatmul.msk.f32.gmra.mxu2 %vm1234_vm12, %v1216_v62 }
  0xf7   : > { %1749 = vmatmul.msk.f32.gmra.mxu3 %vm1234_vm12, %v2926_v31 }
  0xfa   : > { %v1152_v59 = vpop.permute.xlu0 %1151  ;;  %v1150_v18 = vpop.permute.xlu2 %1149 }
  0xfc   : > { %v1072_v51 = vpop.permute.xlu1 %1071  ;;  %1756 = vmatmul.msk.f32.gmra.mxu1 %vm1234_vm12, %v1214_v22  ;;  %v916_v22 = vrot.slane %v2778_v10, 7  ;;  %v932_v10 = vsel %vm544_vm10, %v912_v53, %v922_v19 }
  0xfd   : > { %v1200_v14 = vsel %vm1187_vm11, %v959_v41, %v1072_v51 }
  0xfe   : > { %1738 = vmatmul.msk.f32.gmra.mxu0 %vm1234_vm12, %v1215_v46  ;;  %1774 = vmatmul.msk.f32.gmra.mxu2 %vm1234_vm12, %v1217_v37  ;;  %v1221_v63 = vsel %vm1208_vm7, %v1200_v14, %v1152_v59  ;;  %v946_v43 = vsel %vm544_vm10, %v926_v11, %v916_v22  ;;  %v936_v20 = vsel %vm544_vm10, %v916_v22, %v926_v11 }
  0xff   : > { %1763 = vmatmul.msk.f32.vlgmr.msrb.gmra.mxu3 %vm1234_vm12, %v1221_v63  ;;  %v965_v1 = vsel %vm516_vm9, %v946_v43, 0.0 }
 0x102   : > { %v1146_v34 = vpop.permute.xlu0 %1145  ;;  %v1086_v50 = vpop.permute.xlu2 %1085 }
 0x103   : > { %v1207_v2 = vsel %vm1187_vm11, %v936_v20, %v1086_v50 }
 0x104   : > { %v1066_v17 = vpop.permute.xlu1 %1065  ;;  %1757 = vmatmul.msk.f32.gmra.mxu1 %vm1234_vm12, %v1215_v46  ;;  %v3014_v46 = vld [vmem:[%s3110_s4] ss:$0 sm:$0xff] }
 0x105   : > { %v1197_v57 = vsel %vm1187_vm11, %v931_v21, %v1066_v17 }
 0x106   : > { %1739 = vmatmul.msk.f32.gmra.mxu0 %vm1234_vm12, %v1216_v62  ;;  %v1218_v55 = vsel %vm1208_vm7, %v1197_v57, %v1146_v34 }
 0x107   : > { %1775 = vmatmul.msk.f32.gmra.mxu2 %vm1234_vm12, %v1218_v55 }
 0x10a   : > { %v1148_v8 = vpop.permute.xlu0 %1147 }
 0x10b   : > { %v1219_v23 = vsel %vm1208_vm7, %v1198_v4, %v1148_v8 }
 0x10c   : > { %v1154_v15 = vpop.permute.xlu1 %1153  ;;  %1758 = vmatmul.msk.f32.gmra.mxu1 %vm1234_vm12, %v1216_v62 }
 0x10d   : > { %v1222_v32 = vsel %vm1208_vm7, %v1201_v54, %v1154_v15 }
 0x10e   : > { %1740 = vmatmul.msk.f32.gmra.mxu0 %vm1234_vm12, %v1217_v37  ;;  %1764 = vmatmul.msk.f32.gmra.mxu3 %vm1234_vm12, %v1222_v32 }
 0x10f   : > { %1776 = vmatmul.msk.f32.gmra.mxu2 %vm1234_vm12, %v1219_v23 }
 0x112   : > { %v1084_v21 = vpop.permute.xlu0 %1083 }
 0x113   : > { %v1206_v25 = vsel %vm1187_vm11, %v965_v1, %v1084_v21 }
 0x114   : > { %v1070_v36 = vpop.permute.xlu1 %1069  ;;  %1759 = vmatmul.msk.f32.gmra.mxu1 %vm1234_vm12, %v1217_v37 }
 0x115   : > { %v1199_v26 = vsel %vm1187_vm11, %v932_v10, %v1070_v36 }
 0x116   : > { %1741 = vmatmul.msk.f32.gmra.mxu0 %vm1234_vm12, %v1218_v55  ;;  %1765 = vmatmul.msk.f32.gmra.mxu3 %vm1234_vm12, %v2850_v40  ;;  %v1220_v35 = vsel %vm1208_vm7, %v1199_v26, %v1150_v18 }
 0x117   : > { %1777 = vmatmul.msk.f32.gmra.mxu2 %vm1234_vm12, %v1220_v35 }
 0x11a   : > { %v1166_v58 = vpop.permute.xlu0 %1165 }
 0x11b   : > { %v1228_v48 = vsel %vm1208_vm7, %v1207_v2, %v1166_v58 }
 0x11c   : > { %1760 = vmatmul.msk.f32.gmra.mxu1 %vm1234_vm12, %v1218_v55  ;;  %v1164_v5 = vpop.permute.xlu1 %1163 }
 0x11d   : > { %v1227_v56 = vsel %vm1208_vm7, %v1206_v25, %v1164_v5 }
 0x11e   : > { %1742 = vmatmul.msk.f32.gmra.mxu0 %vm1234_vm12, %v1219_v23  ;;  %1766 = vmatmul.msk.f32.gmra.mxu3 %vm1234_vm12, %v2864_v60 }
 0x11f   : > { %1778 = vmatmul.msk.f32.gmra.mxu2 %vm1234_vm12, %v1221_v63 }
 0x124   : > { %1761 = vmatmul.msk.f32.gmra.mxu1 %vm1234_vm12, %v1219_v23 }
 0x126   : > { %1743 = vmatmul.msk.f32.gmra.mxu0 %vm1234_vm12, %v1220_v35  ;;  %1782 = vmatmul.msk.f32.vlgmr.msra.gmra.mxu3 %vm1234_vm12, %v2915_v16 }
 0x127   : > { %1779 = vmatmul.msk.f32.gmra.mxu2 %vm1234_vm12, %v1222_v32 }
 0x12c   : > { %1762 = vmatmul.msk.f32.gmra.mxu1 %vm1234_vm12, %v1220_v35 }
 0x12e   : > { %1744 = vmatmul.msk.f32.gmra.mxu0 %vm1234_vm12, %v1221_v63  ;;  %1783 = vmatmul.msk.f32.gmra.mxu3 %vm1234_vm12, %v2926_v31 }
 0x12f   : > { %1780 = vmatmul.msk.f32.gmra.mxu2 %vm1234_vm12, %v2850_v40 }
 0x136   : > { %1745 = vmatmul.msk.f32.gmra.mxu0 %vm1234_vm12, %v1222_v32  ;;  %1784 = vmatmul.msk.f32.gmra.mxu3 %vm1234_vm12, %v1227_v56 }
 0x137   : > { %1781 = vmatmul.msk.f32.gmra.mxu2 %vm1234_vm12, %v2864_v60 }
 0x13e   : > { %1785 = vmatmul.msk.f32.gmra.mxu3 %vm1234_vm12, %v1228_v48 }
 0x141   : > { %v1455_v28 = vpop.f32.mrf.mxu2 }
 0x149   : > { %v1340_v44 = vpop.f32.mrf.mxu3 }
 0x151   : > { %v1378_v40 = vpop.f32.mrf.mxu1  ;;  %v3022_v42 = vpop.f32.mrf.mxu3 }
 0x159   : > { %v1381_v30 = vpop.f32.mrf.mxu1  ;;  %v1458_v45 = vpop.f32.mrf.mxu2 }
 0x15b   : > { %v1304_v39 = vpop.f32.mrf.mxu0 }
 0x15c   : > { %v1379_v38 = vadd.f32 %v1378_v40, %v1304_v39 }
 0x15e   : > { %v1503_v60 = vadd.f32 %v1455_v28, %v1379_v38 }
 0x160   : > { %v1523_v13 = vadd.f32 %v3014_v46, %v1503_v60 }
 0x161   : > { %v1384_v6 = vpop.f32.mrf.mxu1 }
 0x162   : > { %1539 = vst [vmem:[%s3017_s30] sm:$0xff] %v1523_v13 }
 0x163   : > { %v1307_v7 = vpop.f32.mrf.mxu0 }
 0x164   : > { %v1382_v61 = vadd.f32 %v1381_v30, %v1307_v7 }
 0x166   : > { %v1504_v16 = vadd.f32 %v1458_v45, %v1382_v61 }
 0x168   : > { %v1524_v49 = vadd.f32 %v3014_v46, %v1504_v16 }
 0x169   : > { %v1387_v12 = vpop.f32.mrf.mxu1 }
 0x16a   : > { %1540 = vst [vmem:[%s3017_s30 + $0x8] sm:$0xff] %v1524_v49  ;;  %v1461_v29 = vpop.f32.mrf.mxu2 }
 0x16b   : > { %v1310_v27 = vpop.f32.mrf.mxu0 }
 0x16c   : > { %v1385_v33 = vadd.f32 %v1384_v6, %v1310_v27 }
 0x16e   : > { %v1505_v31 = vadd.f32 %v1461_v29, %v1385_v33 }
 0x170   : > { %v1525_v62 = vadd.f32 %v3014_v46, %v1505_v31 }
 0x171   : > { %v1390_v52 = vpop.f32.mrf.mxu1  ;;  %v3026_v41 = vpop.f32.mrf.mxu3 }
 0x172   : > { %1541 = vst [vmem:[%s3017_s30 + $0x10] sm:$0xff] %v1525_v62 }
 0x173   : > { %v1313_v0 = vpop.f32.mrf.mxu0 }
 0x174   : > { %v1388_v59 = vadd.f32 %v1387_v12, %v1313_v0 }
 0x179   : > { %v1464_v37 = vpop.f32.mrf.mxu2  ;;  %v1393_v63 = vpop.f32.mrf.mxu1 }
 0x17a   : > { %v1506_v51 = vadd.f32 %v1464_v37, %v1388_v59  ;;  %v3030_v19 = vpop.f32.mrf.mxu3 }
 0x17b   : > { %v1316_v47 = vpop.f32.mrf.mxu0 }
 0x17c   : > { %v1526_v14 = vadd.f32 %v3014_v46, %v1506_v51  ;;  %v1391_v53 = vadd.f32 %v1390_v52, %v1316_v47 }
 0x17e   : > { %1542 = vst [vmem:[%s3017_s30 + $0x18] sm:$0xff] %v1526_v14 }
 0x181   : > { %v1467_v34 = vpop.f32.mrf.mxu2  ;;  %v1396_v55 = vpop.f32.mrf.mxu1 }
 0x182   : > { %v1507_v3 = vadd.f32 %v1467_v34, %v1391_v53  ;;  %v1414_v24 = vpop.f32.mrf.mxu3 }
 0x183   : > { %v1319_v17 = vpop.f32.mrf.mxu0  ;;  %v1415_v30 = vadd.f32 %v1414_v24, %v1340_v44 }
 0x184   : > { %v1527_v57 = vadd.f32 %v3014_v46, %v1507_v3  ;;  %v1394_v9 = vadd.f32 %v1393_v63, %v1319_v17 }
 0x186   : > { %1543 = vst [vmem:[%s3017_s30 + $0x20] sm:$0xff] %v1527_v57 }
 0x189   : > { %v1399_v11 = vpop.f32.mrf.mxu1 }
 0x18a   : > { %v1470_v4 = vpop.f32.mrf.mxu2 }
 0x18b   : > { %v1322_v54 = vpop.f32.mrf.mxu0  ;;  %v1508_v8 = vadd.f32 %v1470_v4, %v1394_v9 }
 0x18c   : > { %v1397_v15 = vadd.f32 %v1396_v55, %v1322_v54 }
 0x18d   : > { %v1528_v22 = vadd.f32 %v3014_v46, %v1508_v8 }
 0x18f   : > { %1544 = vst [vmem:[%s3017_s30 + $0x28] sm:$0xff] %v1528_v22 }
 0x191   : > { %v1417_v23 = vpop.f32.mrf.mxu3  ;;  %v1402_v35 = vpop.f32.mrf.mxu1 }
 0x192   : > { %v1473_v32 = vpop.f32.mrf.mxu2  ;;  %v1418_v16 = vadd.f32 %v1417_v23, %v3022_v42 }
 0x193   : > { %v1325_v43 = vpop.f32.mrf.mxu0  ;;  %v1509_v10 = vadd.f32 %v1473_v32, %v1397_v15 }
 0x194   : > { %v1400_v36 = vadd.f32 %v1399_v11, %v1325_v43 }
 0x195   : > { %v1529_v18 = vadd.f32 %v3014_v46, %v1509_v10 }
 0x197   : > { %1545 = vst [vmem:[%s3017_s30 + $0x30] sm:$0xff] %v1529_v18 }
 0x199   : > { %v1420_v26 = vpop.f32.mrf.mxu3  ;;  %v1405_v48 = vpop.f32.mrf.mxu1 }
 0x19a   : > { %v1476_v20 = vpop.f32.mrf.mxu2  ;;  %v1421_v52 = vadd.f32 %v1420_v26, %v3026_v41 }
 0x19b   : > { %v1328_v1 = vpop.f32.mrf.mxu0  ;;  %v1510_v21 = vadd.f32 %v1476_v20, %v1400_v36 }
 0x19c   : > { %v1403_v5 = vadd.f32 %v1402_v35, %v1328_v1 }
 0x19d   : > { %v1530_v25 = vadd.f32 %v3014_v46, %v1510_v21 }
 0x19f   : > { %1546 = vst [vmem:[%s3017_s30 + $0x38] sm:$0xff] %v1530_v25 }
 0x1a1   : > { %v1423_v56 = vpop.f32.mrf.mxu3  ;;  %v1408_v61 = vpop.f32.mrf.mxu1 }
 0x1a2   : > { %v1479_v50 = vpop.f32.mrf.mxu2  ;;  %v1424_v41 = vadd.f32 %v1423_v56, %v3030_v19 }
 0x1a3   : > { %v1331_v2 = vpop.f32.mrf.mxu0  ;;  %v1511_v58 = vadd.f32 %v1479_v50, %v1403_v5 }
 0x1a4   : > { %v1406_v28 = vadd.f32 %v1405_v48, %v1331_v2 }
 0x1a5   : > { %v1531_v40 = vadd.f32 %v3014_v46, %v1511_v58 }
 0x1a7   : > { %1547 = vst [vmem:[%s3017_s30 + $0x40] sm:$0xff] %v1531_v40 }
 0x1a9   : > { %v1491_v39 = vpop.f32.mrf.mxu3  ;;  %v1411_v42 = vpop.f32.mrf.mxu1 }
 0x1aa   : > { %v1515_v38 = vadd.f32 %v1491_v39, %v1415_v30  ;;  %v1482_v60 = vpop.f32.mrf.mxu2 }
 0x1ab   : > { %v1512_v13 = vadd.f32 %v1482_v60, %v1406_v28  ;;  %v1334_v45 = vpop.f32.mrf.mxu0 }
 0x1ac   : > { %v1535_v6 = vadd.f32 %v3014_v46, %v1515_v38  ;;  %v1409_v44 = vadd.f32 %v1408_v61, %v1334_v45 }
 0x1ad   : > { %v1532_v7 = vadd.f32 %v3014_v46, %v1512_v13 }
 0x1ae   : > { %1551 = vst [vmem:[%s3017_s30 + $0x60] sm:$0xff] %v1535_v6 }
 0x1af   : > { %1548 = vst [vmem:[%s3017_s30 + $0x48] sm:$0xff] %v1532_v7 }
 0x1b1   : > { %v1494_v49 = vpop.f32.mrf.mxu3 }
 0x1b2   : > { %v1516_v12 = vadd.f32 %v1494_v49, %v1418_v16  ;;  %v1485_v27 = vpop.f32.mrf.mxu2 }
 0x1b3   : > { %v1513_v29 = vadd.f32 %v1485_v27, %v1409_v44  ;;  %v1337_v62 = vpop.f32.mrf.mxu0 }
 0x1b4   : > { %v1536_v33 = vadd.f32 %v3014_v46, %v1516_v12  ;;  %v1412_v0 = vadd.f32 %v1411_v42, %v1337_v62 }
 0x1b5   : > { %v1533_v31 = vadd.f32 %v3014_v46, %v1513_v29 }
 0x1b6   : > { %1552 = vst [vmem:[%s3017_s30 + $0x68] sm:$0xff] %v1536_v33 }
 0x1b7   : > { %1549 = vst [vmem:[%s3017_s30 + $0x50] sm:$0xff] %v1533_v31 }
 0x1b9   : > { %v1497_v59 = vpop.f32.mrf.mxu3 }
 0x1ba   : > { %v1517_v37 = vadd.f32 %v1497_v59, %v1421_v52  ;;  %v1488_v51 = vpop.f32.mrf.mxu2 }
 0x1bb   : > { %v1514_v47 = vadd.f32 %v1488_v51, %v1412_v0 }
 0x1bc   : > { %v1537_v14 = vadd.f32 %v3014_v46, %v1517_v37 }
 0x1bd   : > { %v1534_v63 = vadd.f32 %v3014_v46, %v1514_v47 }
 0x1be   : > { %1553 = vst [vmem:[%s3017_s30 + $0x70] sm:$0xff] %v1537_v14 }
 0x1bf   : > { %1550 = vst [vmem:[%s3017_s30 + $0x58] sm:$0xff] %v1534_v63 }
 0x1c1   : > { %v1500_v53 = vpop.f32.mrf.mxu3 }
 0x1c2   : > { %v1518_v34 = vadd.f32 %v1500_v53, %v1424_v41 }
 0x1c4   : > { %v1538_v3 = vadd.f32 %v3014_v46, %v1518_v34 }
 0x1c6   : > { %1554 = vst [vmem:[%s3017_s30 + $0x78] sm:$0xff] %v1538_v3 }
 0x1c7   : > { %1908 = shalt.err (!%p1905_p12)
}
 0x1c8   : > { %s1979_s14 = smov 128  }
 0x1c9   : > { %1806 = dma.vmem_to_hbm [thread:$0]  (%p2061_p3), %s1572_s10, 2048, %s1574_s12, %s1556_s15, %s1979_s14, %s1979_s14, %s1978_s17  }
 0x1ca PF: > { %p1812_p13 = scmp.ge.s32.totalorder %s1975_s25, 2  ;;  %s1588_s30 = sand.u32 1, %s1947_s18  }
 0x1cb   : > { %s1589_s13 = scalar_lea.sflag [#allocation3], %s1588_s30 }
 0x1cc   : > { %p1809_p0 = pnand %p1812_p13, %p2070_p8 }
 0x1ce   : > { %p1810_p1 = pneg %p1809_p0 }
 0x1d0   : > { %1942 = dma.done.wait (%p1810_p1), %s1589_s13, 2048  }
 0x1d1   : > { %1944 = vsyncadd (%p1810_p1), %s1589_s13, 4294965248  ;;  %s18_s25 = sadd.s32 1, %s1975_s25   ;;  %s3134_s18 = smov %s1951_s19 }
 0x1d2   : > { %p15_p2 = scmp.ge.s32.totalorder %s18_s25, 6   ;;  %s3135_s19 = smov %s1955_s20 }
 0x1d3   : > { %s3136_s20 = smov %s2079_s11  ;;  %s3137_s21 = smov %s1967_s23 }
 0x1d4   : > { %s3138_s22 = smov %s1971_s24  ;;  %s3139_s23 = smov %s3142_s28 }
 0x1d5   : > { %s3140_s24 = smov %s3146_s29  ;;  %17 = sbr.rel (!%p15_p2) target bundleno = 5 (0x5), region = 83 }
 0x1da   :  { %1595 = vsyncpa [#allocation3], 1 }
 0x1db   :  { %1597 = vsyncpa [#allocation3 + $0x1], 1 }

// kernel: tpu_custom_call.1
= control target key start
LH: loop header
LB: loop body
LE: loop exit
PB: predicated region body
PF: predicated region fallthrough
CT: control target
= control target key end

     0   :  { %10 = vsyncpa [#allocation3], 0  ;;  %s3200_s0 = inlined_call_operand.vmem [shape: f32[2,16,16,4], index: 0, kind: input, shape index: {}]   ;;  %s3201_s1 = inlined_call_operand.vmem [shape: f32[2,16,16,4], index: 1, kind: input, shape index: {}]   ;;  %s3202_s2 = inlined_call_operand.vmem [shape: f32[2,16,16,4], index: 2, kind: input, shape index: {}]   ;;  %s3203_s3 = inlined_call_operand.vmem [shape: f32[3,12,128], index: 3, kind: input, shape index: {}]   ;;  %s3204_s4 = inlined_call_operand.vmem [shape: f32[1,128], index: 4, kind: input, shape index: {}]   ;;  %s3205_s5 = inlined_call_operand.hbm [shape: f32[2,16,16,128], index: 5, kind: output, shape index: {}]  }
   0x1   :  { %12 = vsyncpa [#allocation3 + $0x1], 0  ;;  %s2166_s18 = smov 0   ;;  %s2168_s19 = smov 0  }
   0x2   :  { %s2170_s20 = smov 0   ;;  %s2172_s21 = smov 0  }
   0x3   :  { %s2174_s22 = smov 0   ;;  %s2176_s23 = smov 0  }
   0x4   :  { %s2178_s24 = smov 0   ;;  %s2180_s25 = smov 0  }
   0x5 LB: > { %s1857_s26 = sadd.s32 4294967295, %s2131_s25   ;;  %s1858_s27 = sadd.s32 4294967294, %s2131_s25   ;;  %s2131_s25 = sphi %s2180_s25, %s18_s25   ;;  %s2127_s24 = sphi %s2178_s24, %s3238_s24   ;;  %s2123_s23 = sphi %s2176_s23, %s3237_s23   ;;  %s2119_s22 = sphi %s2174_s22, %s3236_s22   ;;  %s2115_s21 = sphi %s2172_s21, %s3235_s21   ;;  %s2111_s20 = sphi %s2170_s20, %s3234_s20   ;;  %s2107_s19 = sphi %s2168_s19, %s3233_s19   ;;  %s2103_s18 = sphi %s2166_s18, %s3232_s18  }
   0x6   : > { %s27_s28 = sadd.s32 1, %s2123_s23  ;;  %s30_s29 = sadd.s32 1, %s2127_s24 }
   0x7   : > { %p28_p0 = scmp.ge.s32.totalorder %s27_s28, 2  ;;  %p191_p1 = scmp.ne.s32.totalorder %s2111_s20, %s2107_s19 }
   0x8   : > { %p192_p2 = scmp.eq.s32.totalorder %s1857_s26, 3  ;;  %p197_p5 = scmp.ne.s32.totalorder %s2107_s19, %s2103_s18 }
   0x9   : > { %s3240_s28 = smov (%p28_p0, %s27_s28), 0  ;;  %s3242_s29 = smov (!%p28_p0, %s30_s29), %s2127_s24 }
   0xa   : > { %s177_s30 = ssub.s32 %s2123_s23, %s3240_s28  ;;  %p2217_p3 = por %p192_p2, %p191_p1 }
   0xb   : > { %p32_p4 = scmp.ge.s32.totalorder %s3242_s29, 2  ;;  %p198_p6 = scmp.eq.s32.totalorder %s1858_s27, 3 }
   0xc   : > { %p1867_p7 = scmp.ge.s32.totalorder %s2131_s25, 1  ;;  %p280_p9 = scmp.lt.s32.totalorder %s2131_s25, 5 }
   0xd   : > { %s3244_s29 = smov (%p32_p4, %s3242_s29), 0  ;;  %p2226_p8 = por %p198_p6, %p197_p5 }
   0xe   : > { %s176_s8 = ssub.s32 %s2127_s24, %s3244_s29  ;;  %s181_s9 = sadd.s32 1, %s2111_s20 }
   0xf   : > { %s178_s10 = sor.u32 %s177_s30, %s176_s8  ;;  %p281_p10 = pnand %p1867_p7, %p280_p9 }
  0x10   : > { %p179_p11 = scmp.eq.s32.totalorder %s178_s10, 0  ;;  %s1869_s12 = sshll.u32 (!%p281_p10), %s2115_s21, 3 }
  0x11   : > { %284 = sbr.rel (%p281_p10) target bundleno = 458 (0x1ca), region = 40  ;;  %p342_p12 = scmp.lt.s32.totalorder (!%p281_p10), %s2119_s22, 1 }
  0x12   : > { %s2235_s11 = scalar_select %p179_p11, %s2111_s20, %s181_s9  }
  0x13   : > { %p344_p13 = scmp.lt.s32.totalorder (!%p281_p10), %s1869_s12, 15  ;;  %s1885_s13 = sadd.s32 (!%p281_p10), 4294967294, %s1869_s12 }
  0x14   : > { %s1886_s17 = sadd.s32 (!%p281_p10), 4294967295, %s1869_s12  ;;  %s1873_s8 = sshll.u32 (!%p281_p10), %s2115_s21, 2 }
  0x15   : > { %s2467_s9 = sadd.s32 (!%p281_p10), 4, %s1873_s8 }
  0x16   : > { %v513_v0 = vlaneseq  ;;  %s343_s14 = scalar_select %p342_p12, %s2119_s22, 1  ;;  %v2240_v1 = vstv %s1885_s13  ;;  %v2263_v10 = vstv %s1886_s17  ;;  %vm568_vm8 = vcmask 1040384  }
  0x17   : > { %s345_s15 = scalar_select %p344_p13, %s1869_s12, 15  ;;  %v424_v3 = vadd.s32 7, %v2240_v1  ;;  %v425_v4 = vadd.s32 8, %v2240_v1  ;;  %v426_v5 = vadd.s32 9, %v2240_v1  ;;  %v2253_v7 = vadd.s32 2, %v2240_v1 }
  0x18   : > { %v2242_v2 = vshrl.u32 %v513_v0, 7  ;;  %s2247_s16 = sshll.u32 %s343_s14, 5  ;;  %v2256_v8 = vadd.s32 3, %v2240_v1  ;;  %v2266_v11 = vadd.s32 4, %v2240_v1  ;;  %vm657_vm11 = vcmask 1046528   ;;  %s2296_s13 = sadd.s32 4294967295, %s1873_s8 }
  0x19   : > { %s1870_s26 = sshll.u32 %s345_s15, 1  ;;  %vm436_vm0 = vcmp.ge.s32.totalorder %v424_v3, 0  ;;  %vm437_vm1 = vcmp.ge.s32.totalorder %v425_v4, 0  ;;  %vm438_vm2 = vcmp.ge.s32.totalorder %v426_v5, 0  ;;  %vm448_vm3 = vcmp.lt.s32.totalorder %v424_v3, 16  ;;  %p354_p0 = scmp.gt.s32.totalorder %s2296_s13, 0 }
  0x1a   : > { %v2250_v6 = vadd.s32 8, %v2242_v2  ;;  %s348_s27 = sadd.s32 %s2247_s16, %s1870_s26  ;;  %vm449_vm4 = vcmp.lt.s32.totalorder %v425_v4, 16  ;;  %vm450_vm5 = vcmp.lt.s32.totalorder %v426_v5, 16  ;;  %vm2259_vm6 = vmand %vm436_vm0, %vm448_vm3  ;;  %vm516_vm10 = vcmp.ge.s32.totalorder %v2242_v2, 1  ;;  %s2133_s26 = smov 4  }
  0x1b   : > { %s1872_s30 = sshll.u32 %s348_s27, 3  ;;  %vm2268_vm7 = vmand %vm437_vm1, %vm449_vm4  ;;  %v2284_v14 = vadd.s32 7, %v2263_v10  ;;  %vm431_vm12 = vcmp.ge.s32.totalorder %v2253_v7, 0  ;;  %vm432_vm14 = vcmp.ge.s32.totalorder %v2256_v8, 0  ;;  %vm443_vm15 = vcmp.lt.s32.totalorder %v2253_v7, 16  ;;  %s3246_s13 = smov (!%p354_p0, %s2296_s13), 0 }
  0x1c   : > { %s2276_s12 = scalar_lea.vmem %s3200_s0, %s1872_s30  ;;  %vm2278_vm9 = vmand %vm438_vm2, %vm450_vm5  ;;  %vm519_vm13 = vcmp.le.s32.totalorder %v2250_v6, 14  ;;  %vm444_vm0 = vcmp.lt.s32.totalorder %v2256_v8, 16  ;;  %vm433_vm1 = vcmp.ge.s32.totalorder %v2266_v11, 0  ;;  %vm445_vm2 = vcmp.lt.s32.totalorder %v2266_v11, 16  ;;  %s1875_s14 = sshll.u32 %s3246_s13, 1 }
  0x1d   : > { %v406_v15 = vld [vmem:[%s2276_s12 + $0x50] sm:$0xff]  ;;  %v407_v16 = vld [vmem:[%s2276_s12 + $0x58] sm:$0xff]  ;;  %v408_v17 = vld [vmem:[%s2276_s12 + $0x60] sm:$0xff]  ;;  %vm940_vm3 = vcmp.ge.s32.totalorder %v2284_v14, 0  ;;  %vm950_vm4 = vcmp.lt.s32.totalorder %v2284_v14, 16  ;;  %p2392_p1 = scmp.lt.s32.totalorder %s1875_s14, 15 }
  0x1e   : > { %v409_v18 = vld [vmem:[%s2276_s12 + $0x68] sm:$0xff]  ;;  %v410_v19 = vld [vmem:[%s2276_s12 + $0x70] sm:$0xff]  ;;  %v411_v20 = vld [vmem:[%s2276_s12 + $0x78] sm:$0xff]  ;;  %v503_v21 = vsel %vm2259_vm6, %v406_v15, 0.0  ;;  %v504_v22 = vsel %vm2259_vm6, %v407_v16, 0.0  ;;  %v505_v23 = vsel %vm2268_vm7, %v408_v17, 0.0 }
  0x1f   : > { %v506_v24 = vsel %vm2268_vm7, %v409_v18, 0.0  ;;  %v507_v25 = vsel %vm2278_vm9, %v410_v19, 0.0  ;;  %v508_v26 = vsel %vm2278_vm9, %v411_v20, 0.0  ;;  %v539_v27 = vrot.slane %v504_v22, 7  ;;  %v396_v59 = vld [vmem:[%s2276_s12] sm:$0xff]  ;;  %vm2348_vm5 = vmand %vm431_vm12, %vm443_vm15  ;;  %v397_v3 = vld [vmem:[%s2276_s12 + $0x8] sm:$0xff] }
  0x20   : > { %v540_v28 = vrot.slane %v506_v24, 7  ;;  %v541_v29 = vrot.slane %v508_v26, 7  ;;  %v583_v30 = vrot.slane %v503_v21, 7  ;;  %v585_v31 = vrot.slane %v505_v23, 7  ;;  %v398_v4 = vld [vmem:[%s2276_s12 + $0x10] sm:$0xff]  ;;  %vm2360_vm6 = vmand %vm432_vm14, %vm444_vm0  ;;  %v399_v15 = vld [vmem:[%s2276_s12 + $0x18] sm:$0xff] }
  0x21   : > { %v587_v32 = vrot.slane %v507_v25, 7  ;;  %v679_v33 = vrot.slane %v503_v21, 1  ;;  %v680_v34 = vrot.slane %v504_v22, 1  ;;  %v682_v38 = vrot.slane %v505_v23, 1  ;;  %v400_v16 = vld [vmem:[%s2276_s12 + $0x20] sm:$0xff]  ;;  %vm2373_vm7 = vmand %vm433_vm1, %vm445_vm2  ;;  %v401_v20 = vld [vmem:[%s2276_s12 + $0x28] sm:$0xff] }
  0x22   : > { %v584_v35 = vsel %vm568_vm8, %v583_v30, %v539_v27  ;;  %v624_v36 = vsel %vm568_vm8, %v539_v27, %v583_v30  ;;  %v625_v37 = vsel %vm568_vm8, %v540_v28, %v585_v31  ;;  %v586_v39 = vsel %vm568_vm8, %v585_v31, %v540_v28  ;;  %s3248_s14 = smov (!%p2392_p1, %s1875_s14), 15  ;;  %vm2424_vm9 = vmand %vm940_vm3, %vm950_vm4  ;;  %p373_p2 = scmp.lt.s32.totalorder %s2467_s9, 7 }
  0x23   : > { %v588_v40 = vsel %vm568_vm8, %v587_v32, %v541_v29  ;;  %v626_v41 = vsel %vm568_vm8, %v541_v29, %v587_v32  ;;  %v647_v42 = vsel %vm516_vm10, %v624_v36, 0.0  ;;  %v649_v43 = vsel %vm516_vm10, %v625_v37, 0.0  ;;  %s1876_s17 = sshll.u32 %s3248_s14, 1 }
  0x24   : > { %v651_v44 = vsel %vm516_vm10, %v626_v41, 0.0  ;;  %v683_v45 = vrot.slane %v506_v24, 1  ;;  %v685_v46 = vrot.slane %v507_v25, 1  ;;  %v686_v47 = vrot.slane %v508_v26, 1  ;;  %s363_s27 = sadd.s32 %s1876_s17, %s2247_s16  ;;  %s3250_s9 = smov (!%p373_p2, %s2467_s9), 7 }
  0x25   : > { %v737_v48 = vsel %vm657_vm11, %v680_v34, %v679_v33  ;;  %v784_v49 = vmul.f32 2.0, %v503_v21  ;;  %v785_v50 = vmul.f32 2.0, %v504_v22  ;;  %v681_v51 = vsel %vm657_vm11, %v679_v33, %v680_v34  ;;  %s1878_s30 = sshll.u32 %s363_s27, 3  ;;  %s1880_s8 = sshll.u32 %s3250_s9, 1 }
  0x26   : > { %v684_v52 = vsel %vm657_vm11, %v682_v38, %v683_v45  ;;  %v738_v53 = vsel %vm657_vm11, %v683_v45, %v682_v38  ;;  %v786_v54 = vmul.f32 2.0, %v505_v23  ;;  %v687_v55 = vsel %vm657_vm11, %v685_v46, %v686_v47  ;;  %s365_s14 = scalar_lea.vmem %s3201_s1, %s1878_s30  ;;  %p2533_p4 = scmp.lt.s32.totalorder %s1880_s8, 15 }
  0x27   : > { %v739_v56 = vsel %vm657_vm11, %v686_v47, %v685_v46  ;;  %v761_v57 = vsel %vm519_vm13, %v737_v48, 0.0  ;;  %v787_v58 = vmul.f32 2.0, %v506_v24  ;;  %v763_v61 = vsel %vm519_vm13, %v738_v53, 0.0  ;;  %v394_v45 = vld [vmem:[%s365_s14 + $0x10] sm:$0xff]  ;;  %s2134_s17 = smov 8   ;;  %s1945_s9 = sshll.u32 %s2119_s22, 5 }
  0x28   : > { %v788_v62 = vmul.f32 2.0, %v507_v25  ;;  %v789_v63 = vmul.f32 2.0, %v508_v26  ;;  %v808_v0 = vadd.f32 %v784_v49, %v647_v42  ;;  %v765_v7 = vsel %vm519_vm13, %v739_v56, 0.0  ;;  %s3252_s8 = smov (!%p2533_p4, %s1880_s8), 15 }
  0x29   : > { %v809_v9 = vadd.f32 %v785_v50, %v584_v35  ;;  %v810_v12 = vadd.f32 %v786_v54, %v649_v43  ;;  %v811_v13 = vadd.f32 %v787_v58, %v586_v39  ;;  %v493_v21 = vsel %vm2348_vm5, %v396_v59, 0.0  ;;  %s1881_s27 = sshll.u32 %s3252_s8, 1 }
  0x2a   : > { %v812_v17 = vadd.f32 %v788_v62, %v651_v44  ;;  %v813_v18 = vadd.f32 %v789_v63, %v588_v40  ;;  %v2377_v19 = vadd.f32 %v808_v0, %v681_v51  ;;  %v494_v11 = vsel %vm2348_vm5, %v397_v3, 0.0  ;;  %s2603_s30 = sadd.s32 %s1881_s27, %s2247_s16 }
  0x2b   : > { %v2382_v22 = vadd.f32 %v809_v9, %v761_v57  ;;  %v2384_v23 = vadd.f32 %v810_v12, %v684_v52  ;;  %v2386_v24 = vadd.f32 %v811_v13, %v763_v61  ;;  %v495_v26 = vsel %vm2360_vm6, %v398_v4, 0.0  ;;  %s1883_s16 = sshll.u32 %s2603_s30, 3 }
  0x2c   : > { %v2396_v25 = vadd.f32 %v812_v17, %v687_v55  ;;  %v496_v27 = vsel %vm2360_vm6, %v399_v15, 0.0  ;;  %v497_v28 = vsel %vm2373_vm7, %v400_v16, 0.0  ;;  %v2404_v29 = vadd.f32 %v813_v18, %v765_v7  ;;  %s2635_s13 = scalar_lea.vmem %s3202_s2, %s1883_s16  ;;  %s1955_s16 = sshll.u32 %s2115_s21, 4 }
  0x2d   : > { %v856_v30 = vmul.f32 2.0, %v2384_v23  ;;  %v857_v31 = vmul.f32 2.0, %v2386_v24  ;;  %v498_v32 = vsel %vm2373_vm7, %v401_v20, 0.0  ;;  %v534_v33 = vrot.slane %v494_v11, 7  ;;  %s1724_s10 = sadd.s32 %s1955_s16, %s1945_s9 }
  0x2e   : > { %v535_v34 = vrot.slane %v496_v27, 7  ;;  %v536_v35 = vrot.slane %v498_v32, 7  ;;  %v573_v36 = vrot.slane %v493_v21, 7  ;;  %v575_v39 = vrot.slane %v495_v26, 7 }
  0x2f   : > { %v876_v37 = vadd.f32 %v856_v30, %v2377_v19  ;;  %v877_v38 = vadd.f32 %v857_v31, %v2382_v22  ;;  %v577_v40 = vrot.slane %v497_v28, 7  ;;  %v664_v43 = vrot.slane %v493_v21, 1 }
  0x30   : > { %v665_v44 = vrot.slane %v494_v11, 1  ;;  %v574_v46 = vsel %vm568_vm8, %v573_v36, %v534_v33  ;;  %v576_v47 = vsel %vm568_vm8, %v575_v39, %v535_v34  ;;  %v619_v48 = vsel %vm568_vm8, %v534_v33, %v573_v36 }
  0x31   : > { %v896_v41 = vadd.f32 %v876_v37, %v2396_v25  ;;  %v897_v42 = vadd.f32 %v877_v38, %v2404_v29  ;;  %v620_v51 = vsel %vm568_vm8, %v535_v34, %v575_v39  ;;  %v621_v52 = vsel %vm568_vm8, %v536_v35, %v577_v40 }
  0x32   : > { %v667_v53 = vrot.slane %v495_v26, 1  ;;  %v668_v14 = vrot.slane %v496_v27, 1  ;;  %v670_v54 = vrot.slane %v497_v28, 1  ;;  %v671_v55 = vrot.slane %v498_v32, 1 }
  0x33   : > { %v916_v49 = vmul.f32 0.0625, %v896_v41  ;;  %v917_v50 = vmul.f32 0.0625, %v897_v42  ;;  %v578_v57 = vsel %vm568_vm8, %v577_v40, %v536_v35  ;;  %v637_v58 = vsel %vm516_vm10, %v619_v48, 0.0  ;;  %v392_v41 = vld [vmem:[%s365_s14] sm:$0xff]  ;;  %v393_v42 = vld [vmem:[%s365_s14 + $0x8] sm:$0xff] }
  0x34   : > { %v732_v59 = vsel %vm657_vm11, %v665_v44, %v664_v43  ;;  %v639_v60 = vsel %vm516_vm10, %v620_v51, 0.0  ;;  %v641_v61 = vsel %vm516_vm10, %v621_v52, 0.0  ;;  %v666_v62 = vsel %vm657_vm11, %v664_v43, %v665_v44 }
  0x35   : > { %v2436_v56 = vsel %vm2424_vm9, %v917_v50, 0.0  ;;  %v774_v63 = vmul.f32 2.0, %v493_v21  ;;  %v2452_v0 = vsel %vm2424_vm9, %v916_v49, 0.0  ;;  %v669_v3 = vsel %vm657_vm11, %v667_v53, %v668_v14 }
  0x36   : > { %1233 = vrot.lane.b32.xlu0 %v2436_v56, %s2133_s26  ;;  %v733_v4 = vsel %vm657_vm11, %v668_v14, %v667_v53  ;;  %v734_v5 = vsel %vm657_vm11, %v671_v55, %v670_v54  ;;  %v672_v7 = vsel %vm657_vm11, %v670_v54, %v671_v55  ;;  %v751_v9 = vsel %vm519_vm13, %v732_v59, 0.0 }
  0x37   : > { %v753_v12 = vsel %vm519_vm13, %v733_v4, 0.0  ;;  %v775_v13 = vmul.f32 2.0, %v494_v11  ;;  %v776_v15 = vmul.f32 2.0, %v495_v26  ;;  %v777_v16 = vmul.f32 2.0, %v496_v27 }
  0x38   : > { %v778_v8 = vmul.f32 2.0, %v497_v28  ;;  %v779_v17 = vmul.f32 2.0, %v498_v32  ;;  %v755_v18 = vsel %vm519_vm13, %v734_v5, 0.0  ;;  %v798_v20 = vadd.f32 %v774_v63, %v637_v58 }
  0x39   : > { %v799_v21 = vadd.f32 %v775_v13, %v574_v46  ;;  %v925_v30 = vadd.s32 2, %v2263_v10  ;;  %v800_v31 = vadd.f32 %v776_v15, %v639_v60  ;;  %v801_v33 = vadd.f32 %v777_v16, %v576_v47  ;;  %v395_v46 = vld [vmem:[%s365_s14 + $0x18] sm:$0xff]  ;;  %s338_s14 = sand.u32 1, %s2107_s19  }
  0x3a   : > { %v802_v34 = vadd.f32 %v778_v8, %v641_v61  ;;  %v803_v35 = vadd.f32 %v779_v17, %v578_v57  ;;  %v1134_v11 = vrot.slane %v2452_v0, 1  ;;  %v1135_v26 = vrot.slane %v2436_v56, 1  ;;  %s1868_s8 = sshll.u32 %s338_s14, 7  ;;  %s1712_s15 = scalar_lea.sflag [#allocation3], %s338_s14 }
  0x3b   : > { %v2471_v27 = vadd.f32 %v798_v20, %v666_v62  ;;  %v2473_v28 = vadd.f32 %v799_v21, %v751_v9  ;;  %v2478_v32 = vadd.f32 %v800_v31, %v669_v3  ;;  %v2480_v36 = vadd.f32 %v801_v33, %v753_v12  ;;  %s3111_s30 = scalar_lea.vmem [#allocation2], %s1868_s8 }
  0x3c   : > { %vm935_vm12 = vcmp.ge.s32.totalorder %v925_v30, 0  ;;  %vm945_vm14 = vcmp.lt.s32.totalorder %v925_v30, 16  ;;  %v2482_v37 = vadd.f32 %v802_v34, %v672_v7  ;;  %v2484_v38 = vadd.f32 %v803_v35, %v755_v18 }
  0x3d   : > { %v418_v39 = vadd.s32 1, %v2240_v1  ;;  %v2489_v40 = vadd.s32 1, %v2263_v10  ;;  %v846_v43 = vmul.f32 2.0, %v2478_v32  ;;  %v847_v44 = vmul.f32 2.0, %v2480_v36  ;;  %vm955_vm7 = vmand %vm935_vm12, %vm945_vm14 }
  0x3e   : > { %vm429_vm15 = vcmp.ge.s32.totalorder %v2240_v1, 0  ;;  %vm441_vm0 = vcmp.lt.s32.totalorder %v2240_v1, 16  ;;  %v845_v47 = vmul.f32 2.0, %v2473_v28  ;;  %v844_v48 = vmul.f32 2.0, %v2471_v27 }
  0x3f   : > { %vm430_vm1 = vcmp.ge.s32.totalorder %v418_v39, 0  ;;  %vm442_vm2 = vcmp.lt.s32.totalorder %v418_v39, 16  ;;  %vm453_vm3 = vmand %vm429_vm15, %vm441_vm0  ;;  %v866_v49 = vadd.f32 %v846_v43, %v2471_v27  ;;  %v867_v50 = vadd.f32 %v847_v44, %v2473_v28 }
  0x40   : > { %vm454_vm4 = vmand %vm430_vm1, %vm442_vm2  ;;  %v489_v51 = vsel %vm453_vm3, %v392_v41, 0.0  ;;  %v490_v52 = vsel %vm453_vm3, %v393_v42, 0.0  ;;  %vm934_vm5 = vcmp.ge.s32.totalorder %v2489_v40, 0  ;;  %vm944_vm6 = vcmp.lt.s32.totalorder %v2489_v40, 16 }
  0x41   : > { %v491_v53 = vsel %vm454_vm4, %v394_v45, 0.0  ;;  %v492_v14 = vsel %vm454_vm4, %v395_v46, 0.0  ;;  %v532_v54 = vrot.slane %v490_v52, 7  ;;  %v569_v55 = vrot.slane %v489_v51, 7  ;;  %vm2557_vm9 = vmand %vm934_vm5, %vm944_vm6 }
  0x42   : > { %v886_v57 = vadd.f32 %v866_v49, %v2482_v37  ;;  %v887_v58 = vadd.f32 %v867_v50, %v2484_v38  ;;  %v533_v59 = vrot.slane %v492_v14, 7  ;;  %v571_v60 = vrot.slane %v491_v53, 7 }
  0x43   : > { %v661_v61 = vrot.slane %v491_v53, 1  ;;  %v662_v62 = vrot.slane %v492_v14, 1  ;;  %v773_v63 = vmul.f32 2.0, %v492_v14  ;;  %v772_v3 = vmul.f32 2.0, %v491_v53 }
  0x44   : > { %v906_v4 = vmul.f32 0.0625, %v886_v57  ;;  %v907_v5 = vmul.f32 0.0625, %v887_v58  ;;  %v572_v7 = vsel %vm568_vm8, %v571_v60, %v533_v59  ;;  %v618_v9 = vsel %vm568_vm8, %v533_v59, %v571_v60 }
  0x45   : > { %v731_v12 = vsel %vm657_vm11, %v662_v62, %v661_v61  ;;  %v797_v13 = vadd.f32 %v773_v63, %v572_v7  ;;  %v635_v15 = vsel %vm516_vm10, %v618_v9, 0.0  ;;  %v663_v16 = vsel %vm657_vm11, %v661_v61, %v662_v62  ;;  %v402_v9 = vld [vmem:[%s2276_s12 + $0x30] sm:$0xff] }
  0x46   : > { %v2517_v8 = vsel %vm955_vm7, %v906_v4, 0.0  ;;  %v2519_v17 = vsel %vm955_vm7, %v907_v5, 0.0  ;;  %v749_v18 = vsel %vm519_vm13, %v731_v12, 0.0  ;;  %v796_v20 = vadd.f32 %v772_v3, %v635_v15  ;;  %v403_v12 = vld [vmem:[%s2276_s12 + $0x38] sm:$0xff] }
  0x47   : > { %v1119_v21 = vrot.slane %v2517_v8, 1  ;;  %v1120_v30 = vrot.slane %v2519_v17, 1  ;;  %1211 = vrot.lane.b32.xlu0 %v2517_v8, %s2133_s26  ;;  %1213 = vrot.lane.b32.xlu2 %v2519_v17, %s2133_s26  ;;  %v821_v31 = vadd.f32 %v797_v13, %v749_v18  ;;  %v570_v33 = vsel %vm568_vm8, %v569_v55, %v532_v54 }
  0x48   : > { %v820_v34 = vadd.f32 %v796_v20, %v663_v16  ;;  %v617_v35 = vsel %vm568_vm8, %v532_v54, %v569_v55  ;;  %v658_v39 = vrot.slane %v489_v51, 1  ;;  %v659_v41 = vrot.slane %v490_v52, 1 }
  0x49   : > { %v1121_v42 = vsel %vm657_vm11, %v1119_v21, %v1120_v30  ;;  %v865_v43 = vadd.f32 %v845_v47, %v821_v31  ;;  %v633_v44 = vsel %vm516_vm10, %v617_v35, 0.0  ;;  %v770_v45 = vmul.f32 2.0, %v489_v51 }
  0x4a   : > { %1291 = vrot.lane.b32.xlu1 %v1121_v42, %s2134_s17  ;;  %v864_v46 = vadd.f32 %v844_v48, %v820_v34  ;;  %v660_v49 = vsel %vm657_vm11, %v658_v39, %v659_v41  ;;  %v730_v50 = vsel %vm657_vm11, %v659_v41, %v658_v39  ;;  %v771_v53 = vmul.f32 2.0, %v490_v52 }
  0x4b   : > { %v885_v14 = vadd.f32 %v865_v43, %v2480_v36  ;;  %v747_v47 = vsel %vm519_vm13, %v730_v50, 0.0  ;;  %v794_v54 = vadd.f32 %v770_v45, %v633_v44  ;;  %v842_v55 = vmul.f32 2.0, %v820_v34 }
  0x4c   : > { %v884_v57 = vadd.f32 %v864_v46, %v2478_v32  ;;  %v795_v58 = vadd.f32 %v771_v53, %v570_v33  ;;  %v843_v51 = vmul.f32 2.0, %v821_v31  ;;  %v1136_v59 = vsel %vm657_vm11, %v1134_v11, %v1135_v26 }
  0x4d   : > { %v818_v52 = vadd.f32 %v794_v54, %v660_v49  ;;  %vm933_vm12 = vcmp.ge.s32.totalorder %v2263_v10, 0  ;;  %v905_v40 = vmul.f32 0.0625, %v885_v14  ;;  %vm943_vm14 = vcmp.lt.s32.totalorder %v2263_v10, 16 }
  0x4e   : > { %v904_v60 = vmul.f32 0.0625, %v884_v57  ;;  %v819_v61 = vadd.f32 %v795_v58, %v747_v47  ;;  %v422_v63 = vadd.s32 5, %v2240_v1  ;;  %v1180_v7 = vsel %vm657_vm11, %v1135_v26, %v1134_v11  ;;  %vm2590_vm0 = vmand %vm933_vm12, %vm943_vm14 }
  0x4f   : > { %1231 = vrot.lane.b32.xlu0 %v2452_v0, %s2133_s26  ;;  %v862_v62 = vadd.f32 %v842_v55, %v818_v52  ;;  %v2599_v11 = vsel %vm2557_vm9, %v905_v40, 0.0  ;;  %v1175_v16 = vsel %vm657_vm11, %v1120_v30, %v1119_v21  ;;  %v1198_v18 = vsel %vm519_vm13, %v1180_v7, 0.0 }
  0x50   : > { %v2573_v3 = vsel %vm2557_vm9, %v904_v60, 0.0  ;;  %v863_v4 = vadd.f32 %v843_v51, %v819_v61  ;;  %vm434_vm15 = vcmp.ge.s32.totalorder %v422_v63, 0  ;;  %vm446_vm1 = vcmp.lt.s32.totalorder %v422_v63, 16 }
  0x51   : > { %1207 = vrot.lane.b32.xlu2 %v2573_v3, %s2133_s26  ;;  %v882_v5 = vadd.f32 %v862_v62, %v2471_v27  ;;  %v2595_v27 = vmul.f32 2.0, %v2404_v29  ;;  %vm458_vm2 = vmand %vm434_vm15, %vm446_vm1  ;;  %v848_v41 = vmul.f32 2.0, %v2482_v37  ;;  %v849_v42 = vmul.f32 2.0, %v2484_v38 }
  0x52   : > { %1311 = vrot.lane.b32.xlu1 %v1136_v59, %s2134_s17  ;;  %v883_v13 = vadd.f32 %v863_v4, %v2473_v28  ;;  %v499_v20 = vsel %vm458_vm2, %v402_v9, 0.0  ;;  %v500_v31 = vsel %vm458_vm2, %v403_v12, 0.0  ;;  %v926_v46 = vadd.s32 3, %v2263_v10  ;;  %v412_v4 = vld [vmem:[%s2635_s13] sm:$0xff] }
  0x53   : > { %v902_v26 = vmul.f32 0.0625, %v882_v5  ;;  %v537_v34 = vrot.slane %v500_v31, 7  ;;  %v579_v35 = vrot.slane %v499_v20, 7  ;;  %v673_v39 = vrot.slane %v499_v20, 1  ;;  %v413_v5 = vld [vmem:[%s2635_s13 + $0x8] sm:$0xff] }
  0x54   : > { %v903_v28 = vmul.f32 0.0625, %v883_v13  ;;  %v674_v30 = vrot.slane %v500_v31, 1  ;;  %v780_v14 = vmul.f32 2.0, %v499_v20  ;;  %v1117_v47 = vrot.slane %v2599_v11, 1 }
  0x55   : > { %v2609_v33 = vsel %vm2590_vm0, %v902_v26, 0.0  ;;  %v622_v45 = vsel %vm568_vm8, %v537_v34, %v579_v35  ;;  %v580_v49 = vsel %vm568_vm8, %v579_v35, %v537_v34  ;;  %v1116_v54 = vrot.slane %v2573_v3, 1 }
  0x56   : > { %v2613_v21 = vsel %vm2590_vm0, %v903_v28, 0.0  ;;  %v1113_v43 = vrot.slane %v2609_v33, 1  ;;  %v643_v50 = vsel %vm516_vm10, %v622_v45, 0.0  ;;  %v735_v53 = vsel %vm657_vm11, %v674_v30, %v673_v39  ;;  %v404_v45 = vld [vmem:[%s2276_s12 + $0x40] sm:$0xff] }
  0x57   : > { %1205 = vrot.lane.b32.xlu0 %v2613_v21, %s2133_s26  ;;  %v1114_v44 = vrot.slane %v2613_v21, 1  ;;  %v675_v55 = vsel %vm657_vm11, %v673_v39, %v674_v30  ;;  %v781_v57 = vmul.f32 2.0, %v500_v31  ;;  %v1188_v58 = vsel %vm519_vm13, %v1175_v16, 0.0 }
  0x58   : > { %v757_v51 = vsel %vm519_vm13, %v735_v53, 0.0  ;;  %v804_v48 = vadd.f32 %v780_v14, %v643_v50  ;;  %v868_v52 = vadd.f32 %v848_v41, %v2478_v32  ;;  %v1174_v59 = vsel %vm657_vm11, %v1117_v47, %v1116_v54  ;;  %v405_v14 = vld [vmem:[%s2276_s12 + $0x48] sm:$0xff]  ;;  %s1727_s12 = sshll.u32 %s3111_s30, 4  ;;  %s1728_s12 = int_to_ptr.vmem [resolvable:$true] %s1727_s12 }
  0x59   : > { %1313 = vrot.lane.b32.xlu2 %v1198_v18, %s2134_s17  ;;  %v805_v60 = vadd.f32 %v781_v57, %v580_v49  ;;  %v869_v61 = vadd.f32 %v849_v42, %v2480_v36  ;;  %v427_v40 = vadd.s32 10, %v2240_v1  ;;  %v1115_v62 = vsel %vm657_vm11, %v1113_v43, %v1114_v44 }
  0x5a   : > { %1209 = vrot.lane.b32.xlu1 %v2599_v11, %s2133_s26  ;;  %v2652_v63 = vadd.f32 %v804_v48, %v675_v55  ;;  %vm936_vm3 = vcmp.ge.s32.totalorder %v926_v46, 0  ;;  %v423_v32 = vadd.s32 6, %v2240_v1  ;;  %vm946_vm4 = vcmp.lt.s32.totalorder %v926_v46, 16 }
  0x5b   : > { %v2657_v7 = vadd.f32 %v805_v60, %v757_v51  ;;  %vm439_vm5 = vcmp.ge.s32.totalorder %v427_v40, 0  ;;  %vm451_vm6 = vcmp.lt.s32.totalorder %v427_v40, 16  ;;  %v1186_v9 = vsel %vm519_vm13, %v1174_v59, 0.0  ;;  %vm2667_vm12 = vmand %vm936_vm3, %vm946_vm4 }
  0x5c   : > { %v888_v36 = vadd.f32 %v868_v52, %v2652_v63  ;;  %vm463_vm7 = vmand %vm439_vm5, %vm451_vm6  ;;  %v858_v12 = vmul.f32 2.0, %v2396_v25  ;;  %v1173_v13 = vsel %vm657_vm11, %v1114_v44, %v1113_v43  ;;  %vm435_vm9 = vcmp.ge.s32.totalorder %v423_v32, 0 }
  0x5d   : > { %v889_v15 = vadd.f32 %v869_v61, %v2657_v7  ;;  %v509_v26 = vsel %vm463_vm7, %v412_v4, 0.0  ;;  %v510_v16 = vsel %vm463_vm7, %v413_v5, 0.0  ;;  %v879_v44 = vadd.f32 %v2595_v27, %v2386_v24 }
  0x5e   : > { %v908_v28 = vmul.f32 0.0625, %v888_v36  ;;  %v542_v20 = vrot.slane %v510_v16, 7  ;;  %v589_v31 = vrot.slane %v509_v26, 7  ;;  %v688_v34 = vrot.slane %v509_v26, 1 }
  0x5f   : > { %1283 = vrot.lane.b32.xlu0 %v1115_v62, %s2134_s17  ;;  %v909_v35 = vmul.f32 0.0625, %v889_v15  ;;  %v689_v39 = vrot.slane %v510_v16, 1  ;;  %v790_v30 = vmul.f32 2.0, %v509_v26  ;;  %v791_v41 = vmul.f32 2.0, %v510_v16 }
  0x60   : > { %v590_v42 = vsel %vm568_vm8, %v589_v31, %v542_v20  ;;  %v627_v43 = vsel %vm568_vm8, %v542_v20, %v589_v31  ;;  %vm447_vm14 = vcmp.lt.s32.totalorder %v423_v32, 16  ;;  %v2681_v46 = vsel %vm2667_vm12, %v908_v28, 0.0 }
  0x61   : > { %1203 = vrot.lane.b32.xlu2 %v2609_v33, %s2133_s26  ;;  %v2685_v49 = vsel %vm2667_vm12, %v909_v35, 0.0  ;;  %v653_v50 = vsel %vm516_vm10, %v627_v43, 0.0  ;;  %v931_v53 = vadd.s32 8, %v2263_v10  ;;  %vm459_vm15 = vmand %vm435_vm9, %vm447_vm14  ;;  %v690_v27 = vsel %vm657_vm11, %v688_v34, %v689_v39 }
  0x62   : > { %1293 = vrot.lane.b32.xlu1 %v1188_v58, %s2134_s17  ;;  %v740_v55 = vsel %vm657_vm11, %v689_v39, %v688_v34  ;;  %v878_v57 = vadd.f32 %v858_v12, %v2384_v23  ;;  %v1184_v58 = vsel %vm519_vm13, %v1173_v13, 0.0  ;;  %v814_v48 = vadd.f32 %v790_v30, %v653_v50 }
  0x63   : > { %v767_v51 = vsel %vm519_vm13, %v740_v55, 0.0  ;;  %v815_v52 = vadd.f32 %v791_v41, %v590_v42  ;;  %v501_v59 = vsel %vm459_vm15, %v404_v45, 0.0  ;;  %v1122_v60 = vrot.slane %v2681_v46, 1 }
  0x64   : > { %v1123_v61 = vrot.slane %v2685_v49, 1  ;;  %v502_v40 = vsel %vm459_vm15, %v405_v14, 0.0  ;;  %v581_v62 = vrot.slane %v501_v59, 7  ;;  %v1118_v4 = vsel %vm657_vm11, %v1116_v54, %v1117_v47 }
  0x65   : > { %v2707_v5 = vadd.f32 %v814_v48, %v690_v27  ;;  %v2709_v32 = vadd.f32 %v815_v52, %v767_v51  ;;  %v538_v36 = vrot.slane %v502_v40, 7  ;;  %v676_v12 = vrot.slane %v501_v59, 1 }
  0x66   : > { %v677_v13 = vrot.slane %v502_v40, 1  ;;  %v782_v15 = vmul.f32 2.0, %v501_v59  ;;  %v1124_v47 = vsel %vm657_vm11, %v1122_v60, %v1123_v61  ;;  %vm941_vm0 = vcmp.ge.s32.totalorder %v931_v53, 0 }
  0x67   : > { %1289 = vrot.lane.b32.xlu0 %v1186_v9, %s2134_s17  ;;  %v898_v26 = vadd.f32 %v878_v57, %v2707_v5  ;;  %v899_v16 = vadd.f32 %v879_v44, %v2709_v32  ;;  %v623_v28 = vsel %vm568_vm8, %v538_v36, %v581_v62  ;;  %vm951_vm1 = vcmp.lt.s32.totalorder %v931_v53, 16 }
  0x68   : > { %v645_v54 = vsel %vm516_vm10, %v623_v28, 0.0  ;;  %v678_v9 = vsel %vm657_vm11, %v676_v12, %v677_v13  ;;  %v850_v20 = vmul.f32 2.0, %v2652_v63  ;;  %v582_v31 = vsel %vm568_vm8, %v581_v62, %v538_v36  ;;  %vm961_vm2 = vmand %vm941_vm0, %vm951_vm1 }
  0x69   : > { %1285 = vrot.lane.b32.xlu2 %v1184_v58, %s2134_s17  ;;  %v806_v18 = vadd.f32 %v782_v15, %v645_v54  ;;  %v918_v34 = vmul.f32 0.0625, %v898_v26  ;;  %v919_v35 = vmul.f32 0.0625, %v899_v16  ;;  %v736_v39 = vsel %vm657_vm11, %v677_v13, %v676_v12  ;;  %v414_v13 = vld [vmem:[%s2635_s13 + $0x10] sm:$0xff] }
  0x6a   : > { %1287 = vrot.lane.b32.xlu1 %v1118_v4, %s2134_s17  ;;  %v783_v30 = vmul.f32 2.0, %v502_v40  ;;  %v759_v41 = vsel %vm519_vm13, %v736_v39, 0.0  ;;  %v854_v42 = vmul.f32 2.0, %v2377_v19  ;;  %v855_v44 = vmul.f32 2.0, %v2382_v22 }
  0x6b   : > { %v830_v45 = vadd.f32 %v806_v18, %v678_v9  ;;  %v2732_v50 = vsel %vm961_vm2, %v918_v34, 0.0  ;;  %v2734_v53 = vsel %vm961_vm2, %v919_v35, 0.0  ;;  %v870_v14 = vadd.f32 %v850_v20, %v2482_v37 }
  0x6c   : > { %v807_v43 = vadd.f32 %v783_v30, %v582_v31  ;;  %v851_v57 = vmul.f32 2.0, %v2657_v7  ;;  %v927_v58 = vadd.s32 4, %v2263_v10  ;;  %v1137_v48 = vrot.slane %v2732_v50, 1 }
  0x6d   : > { %v874_v55 = vadd.f32 %v854_v42, %v830_v45  ;;  %v1138_v52 = vrot.slane %v2734_v53, 1  ;;  %v929_v59 = vadd.s32 6, %v2263_v10  ;;  %v890_v37 = vadd.f32 %v870_v14, %v830_v45 }
  0x6e   : > { %v831_v27 = vadd.f32 %v807_v43, %v759_v41  ;;  %v871_v4 = vadd.f32 %v851_v57, %v2484_v38  ;;  %vm937_vm3 = vcmp.ge.s32.totalorder %v927_v58, 0  ;;  %vm947_vm4 = vcmp.lt.s32.totalorder %v927_v58, 16 }
  0x6f   : > { %1295 = vrot.lane.b32.xlu0 %v1124_v47, %s2134_s17  ;;  %v894_v40 = vadd.f32 %v874_v55, %v2384_v23  ;;  %v1139_v36 = vsel %vm657_vm11, %v1137_v48, %v1138_v52  ;;  %vm939_vm5 = vcmp.ge.s32.totalorder %v929_v59, 0  ;;  %vm949_vm6 = vcmp.lt.s32.totalorder %v929_v59, 16  ;;  %vm2752_vm7 = vmand %vm937_vm3, %vm947_vm4 }
  0x70   : > { %v875_v51 = vadd.f32 %v855_v44, %v831_v27  ;;  %v910_v12 = vmul.f32 0.0625, %v890_v37  ;;  %vm959_vm9 = vmand %vm939_vm5, %vm949_vm6  ;;  %v852_v38 = vmul.f32 2.0, %v830_v45  ;;  %v1181_v26 = vsel %vm657_vm11, %v1138_v52, %v1137_v48 }
  0x71   : > { %1235 = vrot.lane.b32.xlu2 %v2732_v50, %s2133_s26  ;;  %v914_v15 = vmul.f32 0.0625, %v894_v40  ;;  %v1176_v16 = vsel %vm657_vm11, %v1123_v61, %v1122_v60  ;;  %v853_v47 = vmul.f32 2.0, %v831_v27  ;;  %v1200_v20 = vsel %vm519_vm13, %v1181_v26, 0.0 }
  0x72   : > { %1215 = vrot.lane.b32.xlu1 %v2681_v46, %s2133_s26  ;;  %v895_v62 = vadd.f32 %v875_v51, %v2386_v24  ;;  %v891_v24 = vadd.f32 %v871_v4, %v831_v27  ;;  %v2767_v28 = vsel %vm2752_vm7, %v910_v12, 0.0  ;;  %v1190_v31 = vsel %vm519_vm13, %v1176_v16, 0.0 }
  0x73   : > { %v2769_v54 = vsel %vm959_vm9, %v914_v15, 0.0  ;;  %v872_v60 = vadd.f32 %v852_v38, %v2652_v63  ;;  %v873_v35 = vadd.f32 %v853_v47, %v2657_v7  ;;  %v928_v30 = vadd.s32 5, %v2263_v10  ;;  %v415_v15 = vld [vmem:[%s2635_s13 + $0x18] sm:$0xff]  ;;  %s1946_s13 = sshll.u32 %s1724_s10, 3 }
  0x74   : > { %v915_v23 = vmul.f32 0.0625, %v895_v62  ;;  %v911_v18 = vmul.f32 0.0625, %v891_v24  ;;  %v1131_v61 = vrot.slane %v2769_v54, 1  ;;  %v1047_v41 = vrot.slane %v2517_v8, 7 }
  0x75   : > { %v1015_v63 = vrot.slane %v2519_v17, 7  ;;  %v1125_v42 = vrot.slane %v2767_v28, 1  ;;  %v892_v43 = vadd.f32 %v872_v60, %v2377_v19  ;;  %v893_v45 = vadd.f32 %v873_v35, %v2382_v22 }
  0x76   : > { %v2771_v9 = vsel %vm959_vm9, %v915_v23, 0.0  ;;  %v2785_v39 = vsel %vm2752_vm7, %v911_v18, 0.0  ;;  %vm938_vm12 = vcmp.ge.s32.totalorder %v928_v30, 0  ;;  %vm948_vm14 = vcmp.lt.s32.totalorder %v928_v30, 16 }
  0x77   : > { %1237 = vrot.lane.b32.xlu0 %v2734_v53, %s2133_s26  ;;  %v1132_v34 = vrot.slane %v2771_v9, 1  ;;  %v1126_v44 = vrot.slane %v2785_v39, 1  ;;  %v2802_v14 = vsel %vm568_vm8, %v1047_v41, %v1015_v63  ;;  %v1014_v55 = vrot.slane %v2599_v11, 7  ;;  %vm958_vm15 = vmand %vm938_vm12, %vm948_vm14 }
  0x78   : > { %v1045_v19 = vrot.slane %v2573_v3, 7  ;;  %v1057_v57 = vrot.slane %v2452_v0, 7  ;;  %v1020_v22 = vrot.slane %v2436_v56, 7  ;;  %v912_v58 = vmul.f32 0.0625, %v892_v43 }
  0x79   : > { %1217 = vrot.lane.b32.xlu2 %v2685_v49, %s2133_s26  ;;  %v1133_v7 = vsel %vm657_vm11, %v1131_v61, %v1132_v34  ;;  %v1127_v27 = vsel %vm657_vm11, %v1125_v42, %v1126_v44  ;;  %v913_v51 = vmul.f32 0.0625, %v893_v45  ;;  %v1177_v48 = vsel %vm657_vm11, %v1126_v44, %v1125_v42 }
  0x7a   : > { %1315 = vrot.lane.b32.xlu1 %v1139_v36, %s2134_s17  ;;  %v2819_v52 = vsel %vm568_vm8, %v1014_v55, %v1045_v19  ;;  %v1192_v59 = vsel %vm519_vm13, %v1177_v48, 0.0  ;;  %v2823_v37 = vsel %vm958_vm15, %v912_v58, 0.0  ;;  %v2832_v62 = vsel %vm568_vm8, %v1057_v57, %v1020_v22 }
  0x7b   : > { %v2825_v40 = vsel %vm958_vm15, %v913_v51, 0.0  ;;  %v428_v4 = vadd.s32 11, %v2240_v1  ;;  %v1128_v36 = vrot.slane %v2823_v37, 1  ;;  %v1179_v26 = vsel %vm657_vm11, %v1132_v34, %v1131_v61 }
  0x7c   : > { %v1129_v12 = vrot.slane %v2825_v40, 1  ;;  %v861_v61 = vmul.f32 2.0, %v2709_v32  ;;  %v1196_v34 = vsel %vm519_vm13, %v1179_v26, 0.0  ;;  %vm1439_vm3 = vcmask 1043456  }
  0x7d   : > { %vm440_vm0 = vcmp.ge.s32.totalorder %v428_v4, 0  ;;  %vm452_vm1 = vcmp.lt.s32.totalorder %v428_v4, 16  ;;  %v1043_v0 = vrot.slane %v2609_v33, 7  ;;  %v2925_v6 = vsel %vm568_vm8, %v1045_v19, %v1014_v55 }
  0x7e   : > { %vm464_vm2 = vmand %vm440_vm0, %vm452_vm1  ;;  %v1130_v16 = vsel %vm657_vm11, %v1128_v36, %v1129_v12  ;;  %v881_v48 = vadd.f32 %v861_v61, %v2404_v29  ;;  %v1016_v55 = vrot.slane %v2685_v49, 7  ;;  %v1049_v19 = vrot.slane %v2681_v46, 7 }
  0x7f   : > { %1219 = vrot.lane.b32.xlu0 %v2767_v28, %s2133_s26  ;;  %v511_v23 = vsel %vm464_vm2, %v414_v13, 0.0  ;;  %v512_v24 = vsel %vm464_vm2, %v415_v15, 0.0  ;;  %v1178_v13 = vsel %vm657_vm11, %v1129_v12, %v1128_v36  ;;  %v2869_v15 = vld [vmem:[%s3203_s3 + $0x28] sm:$0xf]  ;;  %vm1364_vm7 = vcmask 64512  }
  0x80   : > { %v543_v1 = vrot.slane %v512_v24, 7  ;;  %v591_v38 = vrot.slane %v511_v23, 7  ;;  %v691_v18 = vrot.slane %v511_v23, 1  ;;  %v793_v30 = vmul.f32 2.0, %v512_v24  ;;  %1925 = vmatpush.msk.msra.mxu2 %vm1439_vm3, %v2869_v15 }
  0x81   : > { %1317 = vrot.lane.b32.xlu2 %v1200_v20, %s2134_s17  ;;  %v692_v20 = vrot.slane %v512_v24, 1  ;;  %v1194_v12 = vsel %vm519_vm13, %v1178_v13, 0.0  ;;  %v1090_v24 = vsel %vm568_vm8, %v1020_v22, %v1057_v57  ;;  %v1013_v57 = vrot.slane %v2613_v21, 7 }
  0x82   : > { %1297 = vrot.lane.b32.xlu1 %v1190_v31, %s2134_s17  ;;  %v628_v47 = vsel %vm568_vm8, %v543_v1, %v591_v38  ;;  %v792_v31 = vmul.f32 2.0, %v511_v23  ;;  %v592_v60 = vsel %vm568_vm8, %v591_v38, %v543_v1  ;;  %v1888_v23 = vld [vmem:[%s3203_s3 + $0x18] sm:$0xf]  ;;  %v1887_v1 = vld [vmem:[%s3203_s3 + $0x10] sm:$0xff]  ;;  %v1051_v13 = vrot.slane %v2767_v28, 7 }
  0x83   : > { %v655_v35 = vsel %vm516_vm10, %v628_v47, 0.0  ;;  %v741_v42 = vsel %vm657_vm11, %v692_v20, %v691_v18  ;;  %v693_v44 = vsel %vm657_vm11, %v691_v18, %v692_v20  ;;  %1956 = vmatpush.msk.msra.mxu3 %vm1439_vm3, %v1888_v23  ;;  %1889 = vmatpush.msk.msra.mxu0 %vm1439_vm3, %v1888_v23  ;;  %v1083_v22 = vsel %vm568_vm8, %v1013_v57, %v1043_v0  ;;  %v1386_v18 = vld [vmem:[%s3203_s3 + $0x8] sm:$0xf]  ;;  %v1385_v20 = vld [vmem:[%s3203_s3] sm:$0xff] }
  0x84   : > { %v816_v43 = vadd.f32 %v792_v31, %v655_v35  ;;  %v769_v45 = vsel %vm519_vm13, %v741_v42, 0.0  ;;  %v1044_v33 = vsel %vm568_vm8, %v1043_v0, %v1013_v57  ;;  %1906 = vmatpush.msk.msra.mxu1 %vm1439_vm3, %v1386_v18  ;;  %v1086_v42 = vsel %vm568_vm8, %v1016_v55, %v1049_v19 }
  0x85   : > { %1957 = vmatpush.msra.mxu3 %v1887_v1  ;;  %1458 = vmatpush.msra.mxu0 %v1887_v1 }
  0x86   : > { %v840_v58 = vadd.f32 %v816_v43, %v693_v44  ;;  %1532 = vmatpush.msra.mxu1 %v1385_v20  ;;  %v1107_v43 = vsel %vm516_vm10, %v1090_v24, 0.0  ;;  %v2957_v44 = vsel %vm568_vm8, %v1049_v19, %v1016_v55 }
  0x87   : > { %1307 = vrot.lane.b32.xlu0 %v1133_v7, %s2134_s17  ;;  %v860_v7 = vmul.f32 2.0, %v2707_v5  ;;  %1958 = vmatpush.msk.msrb.mxu3 %vm1439_vm3, %v1386_v18 }
  0x89   : > { %1299 = vrot.lane.b32.xlu2 %v1127_v27, %s2134_s17  ;;  %v817_v27 = vadd.f32 %v793_v30, %v592_v60  ;;  %v880_v51 = vadd.f32 %v860_v7, %v2396_v25  ;;  %v1085_v25 = vsel %vm568_vm8, %v1015_v63, %v1047_v41  ;;  %1959 = vmatpush.msrb.mxu3 %v1385_v20 }
  0x8a   : > { %1227 = vrot.lane.b32.xlu1 %v2769_v54, %s2133_s26  ;;  %v1097_v3 = vsel %vm516_vm10, %v1085_v25, 0.0  ;;  %v1017_v25 = vrot.slane %v2785_v39, 7 }
  0x8b   : > { %v841_v5 = vadd.f32 %v817_v27, %v769_v45  ;;  %v900_v32 = vadd.f32 %v880_v51, %v840_v58  ;;  %v1093_v51 = vsel %vm516_vm10, %v1083_v22, 0.0 }
  0x8c   : > { %v1087_v28 = vsel %vm568_vm8, %v1017_v25, %v1051_v13  ;;  %v1052_v1 = vsel %vm568_vm8, %v1051_v13, %v1017_v25 }
  0x8d   : > { %v901_v4 = vadd.f32 %v881_v48, %v841_v5  ;;  %v920_v29 = vmul.f32 0.0625, %v900_v32 }
  0x8f   : > { %1301 = vrot.lane.b32.xlu0 %v1192_v59, %s2134_s17  ;;  %v932_v59 = vadd.s32 9, %v2263_v10  ;;  %v2879_v10 = vld [vmem:[%s3203_s3 + $0x20] sm:$0xff]  ;;  %v921_v36 = vmul.f32 0.0625, %v901_v4 }
  0x90   : > { %1609 = vmatpush.msra.mxu2 %v2879_v10 }
  0x91   : > { %1229 = vrot.lane.b32.xlu2 %v2771_v9, %s2133_s26  ;;  %vm942_vm4 = vcmp.ge.s32.totalorder %v932_v59, 0  ;;  %vm952_vm5 = vcmp.lt.s32.totalorder %v932_v59, 16 }
  0x92   : > { %1221 = vrot.lane.b32.xlu1 %v2785_v39, %s2133_s26  ;;  %vm962_vm6 = vmand %vm942_vm4, %vm952_vm5 }
  0x93   : > { %v2886_v8 = vsel %vm962_vm6, %v920_v29, 0.0  ;;  %v2888_v17 = vsel %vm962_vm6, %v921_v36, 0.0 }
  0x94   : > { %v1140_v41 = vrot.slane %v2886_v8, 1  ;;  %v1141_v63 = vrot.slane %v2888_v17, 1 }
  0x96   : > { %v1182_v38 = vsel %vm657_vm11, %v1141_v63, %v1140_v41 }
  0x97   : > { %1303 = vrot.lane.b32.xlu0 %v1130_v16, %s2134_s17  ;;  %v1202_v26 = vsel %vm519_vm13, %v1182_v38, 0.0  ;;  %v1142_v16 = vsel %vm657_vm11, %v1140_v41, %v1141_v63  ;;  %vm1343_vm11 = vcmask 31744   ;;  %vm1390_vm13 = vcmask 97280  }
  0x98   : > { %v1021_v38 = vrot.slane %v2734_v53, 7 }
  0x99   : > { %1223 = vrot.lane.b32.xlu2 %v2823_v37, %s2133_s26 }
  0x9a   : > { %1309 = vrot.lane.b32.xlu1 %v1196_v34, %s2134_s17 }
  0x9f   : > { %1239 = vrot.lane.b32.xlu0 %v2886_v8, %s2133_s26 }
  0xa1   : > { %1305 = vrot.lane.b32.xlu2 %v1194_v12, %s2134_s17  ;;  %v1214_v56 = vpop.permute.xlu2 %1213 }
  0xa2   : > { %1225 = vrot.lane.b32.xlu1 %v2825_v40, %s2133_s26  ;;  %v1349_v29 = vsel %vm1343_vm11, %v2802_v14, %v1214_v56  ;;  %v1099_v56 = vsel %vm516_vm10, %v1086_v42, 0.0 }
  0xa7   : > { %1321 = vrot.lane.b32.xlu0 %v1202_v26, %s2134_s17  ;;  %v1059_v26 = vrot.slane %v2732_v50, 7 }
  0xa8   : > { %v1234_v47 = vpop.permute.xlu0 %1233 }
  0xa9   : > { %1241 = vrot.lane.b32.xlu2 %v2888_v17, %s2133_s26  ;;  %v1359_v27 = vsel %vm1343_vm11, %v2832_v62, %v1234_v47  ;;  %v1019_v62 = vrot.slane %v2771_v9, 7  ;;  %v1091_v57 = vsel %vm568_vm8, %v1021_v38, %v1059_v26  ;;  %v1060_v55 = vsel %vm568_vm8, %v1059_v26, %v1021_v38  ;;  %s1726_s26 = scalar_lea.hbm %s3205_s5, %s1946_s13  ;;  %s2057_s13 = scalar_lea.hbm %s3205_s5, 512 }
  0xaa   : > { %1319 = vrot.lane.b32.xlu1 %v1142_v16, %s2134_s17  ;;  %s1729_s8 = sshll.u32 %s1726_s26, 4  ;;  %s1730_s8 = int_to_ptr.hbm [resolvable:$true] %s1729_s8 }
  0xab   : > { %v1208_v21 = vpop.permute.xlu2 %1207  ;;  %s2051_s27 = sshra.s32 %s1730_s8, 4  ;;  %s2052_s27 = int_to_ptr.hbm [resolvable:$true] %s2051_s27 }
  0xac   : > { %s2053_s16 = scalar_lea.hbm %s2052_s27, 128  ;;  %p2058_p9 = scmp.lt.s32.totalorder %s2052_s27, %s3205_s5 }
  0xad   : > { %p2054_p5 = scmp.ne.s32.totalorder %s2052_s27, %s2053_s16  ;;  %p2059_p10 = scmp.lt.s32.totalorder %s2057_s13, %s2053_s16 }
  0xaf   : > { %p2055_p6 = pnand %p2054_p5, %p2217_p3  ;;  %p2060_p11 = por %p2059_p10, %p2058_p9 }
  0xb1   : > { %p2056_p7 = pneg %p2055_p6 }
  0xb3   : > { %v1314_v35 = vpop.permute.xlu2 %1313  ;;  %p2061_p12 = pnand %p2060_p11, %p2056_p7 }
  0xb4   : > { %v2967_v48 = vsel %vm1364_vm7, %v1359_v27, %v1314_v35 }
  0xb9   : > { %v1212_v11 = vpop.permute.xlu0 %1211 }
  0xba   : > { %v1348_v31 = vsel %vm1343_vm11, %v1097_v3, %v1212_v11 }
  0xbb   : > { %v1204_v61 = vpop.permute.xlu2 %1203 }
  0xbc   : > { %v1292_v60 = vpop.permute.xlu1 %1291  ;;  %v1344_v32 = vsel %vm1343_vm11, %v1093_v51, %v1204_v61 }
  0xbd   : > { %v2943_v30 = vsel %vm1364_vm7, %v1348_v31, %v1292_v60 }
  0xbe   : > { %1926 = vmatmul.msk.f32.vlgmr.msra.gmra.mxu2 %vm1390_vm13, %v2943_v30 }
  0xc1   : > { %v1232_v49 = vpop.permute.xlu0 %1231 }
  0xc2   : > { %v1358_v46 = vsel %vm1343_vm11, %v1107_v43, %v1232_v49 }
  0xc3   : > { %v1286_v5 = vpop.permute.xlu2 %1285 }
  0xc4   : > { %v1312_v7 = vpop.permute.xlu1 %1311 }
  0xc5   : > { %v2952_v34 = vsel %vm1364_vm7, %v1358_v46, %v1312_v7  ;;  %v1101_v46 = vsel %vm516_vm10, %v1087_v28, 0.0 }
  0xc6   : > { %1902 = vmatmul.msk.f32.vlgmr.msra.gmra.mxu3 %vm1390_vm13, %v2952_v34 }
  0xc7   : > { %1960 = vmatpush.msk.msra.mxu3 %vm1439_vm3, %v2869_v15  ;;  %v1055_v15 = vrot.slane %v2769_v54, 7  ;;  %v1095_v54 = vsel %vm516_vm10, %v2819_v52, 0.0 }
  0xc8   : > { %v1346_v14 = vsel %vm1343_vm11, %v1095_v54, %v1208_v21  ;;  %v1109_v21 = vsel %vm516_vm10, %v1091_v57, 0.0 }
  0xc9   : > { %v1206_v45 = vpop.permute.xlu0 %1205  ;;  %1961 = vmatpush.msra.mxu3 %v2879_v10  ;;  %v1089_v9 = vsel %vm568_vm8, %v1019_v62, %v1055_v15  ;;  %v1056_v53 = vsel %vm568_vm8, %v1055_v15, %v1019_v62 }
  0xca   : > { %v1345_v41 = vsel %vm1343_vm11, %v1044_v33, %v1206_v45  ;;  %v1105_v61 = vsel %vm516_vm10, %v1089_v9, 0.0 }
  0xcb   : > { %v1236_v12 = vpop.permute.xlu2 %1235  ;;  %v1366_v63 = vsel %vm1364_vm7, %v1345_v41, %v1286_v5  ;;  %v1018_v5 = vrot.slane %v2825_v40, 7 }
  0xcc   : > { %v1210_v58 = vpop.permute.xlu1 %1209 }
  0xcd   : > { %v1347_v0 = vsel %vm1343_vm11, %v2925_v6, %v1210_v58  ;;  %v1360_v6 = vsel %vm1343_vm11, %v1109_v21, %v1236_v12  ;;  %v1061_v12 = vrot.slane %v2886_v8, 7 }
  0xce   : > { %1903 = vmatmul.msk.f32.gmra.mxu3 %vm1390_vm13, %v2967_v48 }
  0xd1   : > { %v1284_v59 = vpop.permute.xlu0 %1283 }
  0xd2   : > { %v1365_v4 = vsel %vm1364_vm7, %v1344_v32, %v1284_v59  ;;  %v1053_v32 = vrot.slane %v2823_v37, 7 }
  0xd3   : > { %1907 = vmatmul.msk.f32.vlgmr.msra.gmra.mxu1 %vm1390_vm13, %v1365_v4  ;;  %v1218_v16 = vpop.permute.xlu2 %1217 }
  0xd4   : > { %v1294_v10 = vpop.permute.xlu1 %1293  ;;  %v1351_v60 = vsel %vm1343_vm11, %v2957_v44, %v1218_v16  ;;  %v1088_v4 = vsel %vm568_vm8, %v1018_v5, %v1053_v32 }
  0xd5   : > { %v1370_v36 = vsel %vm1364_vm7, %v1349_v29, %v1294_v10  ;;  %v1103_v25 = vsel %vm516_vm10, %v1088_v4, 0.0 }
  0xd6   : > { %1927 = vmatmul.msk.f32.gmra.mxu2 %vm1390_vm13, %v1370_v36 }
  0xd9   : > { %v1290_v39 = vpop.permute.xlu0 %1289 }
  0xda   : > { %v1368_v47 = vsel %vm1364_vm7, %v1347_v0, %v1290_v39  ;;  %v1054_v39 = vsel %vm568_vm8, %v1053_v32, %v1018_v5 }
  0xdb   : > { %1908 = vmatmul.msk.f32.gmra.mxu1 %vm1390_vm13, %v1366_v63  ;;  %v1318_v20 = vpop.permute.xlu2 %1317 }
  0xdc   : > { %v1288_v23 = vpop.permute.xlu1 %1287 }
  0xdd   : > { %v1367_v24 = vsel %vm1364_vm7, %v1346_v14, %v1288_v23 }
  0xde   : > { %1890 = vmatmul.msk.f32.vlgmr.msra.gmra.mxu0 %vm1390_vm13, %v1367_v24 }
  0xe1   : > { %v1296_v52 = vpop.permute.xlu0 %1295 }
  0xe3   : > { %1909 = vmatmul.msk.f32.gmra.mxu1 %vm1390_vm13, %v1367_v24  ;;  %v1300_v43 = vpop.permute.xlu2 %1299 }
  0xe4   : > { %v1216_v22 = vpop.permute.xlu1 %1215 }
  0xe5   : > { %v1350_v33 = vsel %vm1343_vm11, %v1099_v56, %v1216_v22 }
  0xe6   : > { %1891 = vmatmul.msk.f32.gmra.mxu0 %vm1390_vm13, %v1368_v47  ;;  %v1371_v50 = vsel %vm1364_vm7, %v1350_v33, %v1296_v52 }
  0xe7   : > { %1928 = vmatmul.msk.f32.gmra.mxu2 %vm1390_vm13, %v1371_v50 }
  0xe9   : > { %v1238_v18 = vpop.permute.xlu0 %1237 }
  0xea   : > { %v1361_v19 = vsel %vm1343_vm11, %v1060_v55, %v1238_v18 }
  0xeb   : > { %1910 = vmatmul.msk.f32.gmra.mxu1 %vm1390_vm13, %v1368_v47  ;;  %v3026_v42 = vsel %vm1364_vm7, %v1361_v19, %v1318_v20  ;;  %v1230_v27 = vpop.permute.xlu2 %1229 }
  0xec   : > { %v1316_v3 = vpop.permute.xlu1 %1315  ;;  %v1357_v10 = vsel %vm1343_vm11, %v1056_v53, %v1230_v27 }
  0xed   : > { %v3013_v11 = vsel %vm1364_vm7, %v1360_v6, %v1316_v3 }
  0xee   : > { %1892 = vmatmul.msk.f32.gmra.mxu0 %vm1390_vm13, %v2943_v30  ;;  %1904 = vmatmul.msk.f32.gmra.mxu3 %vm1390_vm13, %v3013_v11 }
  0xf1   : > { %v1220_v31 = vpop.permute.xlu0 %1219 }
  0xf2   : > { %v1352_v7 = vsel %vm1343_vm11, %v1101_v46, %v1220_v31 }
  0xf3   : > { %1911 = vmatmul.msk.f32.gmra.mxu1 %vm1390_vm13, %v2943_v30  ;;  %v1373_v44 = vsel %vm1364_vm7, %v1352_v7, %v1300_v43  ;;  %v1224_v29 = vpop.permute.xlu2 %1223 }
  0xf4   : > { %v1298_v35 = vpop.permute.xlu1 %1297  ;;  %v1354_v37 = vsel %vm1343_vm11, %v1103_v25, %v1224_v29 }
  0xf5   : > { %v1372_v49 = vsel %vm1364_vm7, %v1351_v60, %v1298_v35 }
  0xf6   : > { %1893 = vmatmul.msk.f32.gmra.mxu0 %vm1390_vm13, %v1370_v36  ;;  %1929 = vmatmul.msk.f32.gmra.mxu2 %vm1390_vm13, %v1372_v49 }
  0xf7   : > { %1905 = vmatmul.msk.f32.gmra.mxu3 %vm1390_vm13, %v3026_v42 }
  0xf9   : > { %v1308_v30 = vpop.permute.xlu0 %1307 }
  0xfb   : > { %1912 = vmatmul.msk.f32.gmra.mxu1 %vm1390_vm13, %v1370_v36  ;;  %v1022_v36 = vrot.slane %v2888_v17, 7  ;;  %v1306_v17 = vpop.permute.xlu2 %1305 }
  0xfc   : > { %v1228_v45 = vpop.permute.xlu1 %1227 }
  0xfd   : > { %v1356_v58 = vsel %vm1343_vm11, %v1105_v61, %v1228_v45  ;;  %v1092_v54 = vsel %vm568_vm8, %v1022_v36, %v1061_v12  ;;  %v1062_v23 = vsel %vm568_vm8, %v1061_v12, %v1022_v36 }
  0xfe   : > { %1894 = vmatmul.msk.f32.gmra.mxu0 %vm1390_vm13, %v1371_v50  ;;  %1930 = vmatmul.msk.f32.gmra.mxu2 %vm1390_vm13, %v1373_v44  ;;  %v1377_v51 = vsel %vm1364_vm7, %v1356_v58, %v1308_v30  ;;  %v1111_v24 = vsel %vm516_vm10, %v1092_v54, 0.0 }
  0xff   : > { %1919 = vmatmul.msk.f32.vlgmr.msrb.gmra.mxu3 %vm1390_vm13, %v1377_v51 }
 0x101   : > { %v1302_v59 = vpop.permute.xlu0 %1301 }
 0x103   : > { %1913 = vmatmul.msk.f32.gmra.mxu1 %vm1390_vm13, %v1371_v50  ;;  %v1242_v52 = vpop.permute.xlu2 %1241  ;;  %v3108_v50 = vld [vmem:[%s3204_s4] ss:$0 sm:$0xff] }
 0x104   : > { %v1222_v13 = vpop.permute.xlu1 %1221  ;;  %v1363_v2 = vsel %vm1343_vm11, %v1062_v23, %v1242_v52 }
 0x105   : > { %v1353_v62 = vsel %vm1343_vm11, %v1052_v1, %v1222_v13 }
 0x106   : > { %1895 = vmatmul.msk.f32.gmra.mxu0 %vm1390_vm13, %v1372_v49  ;;  %v1374_v15 = vsel %vm1364_vm7, %v1353_v62, %v1302_v59 }
 0x107   : > { %1931 = vmatmul.msk.f32.gmra.mxu2 %vm1390_vm13, %v1374_v15 }
 0x109   : > { %v1304_v40 = vpop.permute.xlu0 %1303 }
 0x10a   : > { %v1375_v28 = vsel %vm1364_vm7, %v1354_v37, %v1304_v40 }
 0x10b   : > { %1914 = vmatmul.msk.f32.gmra.mxu1 %vm1390_vm13, %v1372_v49 }
 0x10c   : > { %v1310_v41 = vpop.permute.xlu1 %1309 }
 0x10d   : > { %v1378_v9 = vsel %vm1364_vm7, %v1357_v10, %v1310_v41 }
 0x10e   : > { %1896 = vmatmul.msk.f32.gmra.mxu0 %vm1390_vm13, %v1373_v44  ;;  %1920 = vmatmul.msk.f32.gmra.mxu3 %vm1390_vm13, %v1378_v9 }
 0x10f   : > { %1932 = vmatmul.msk.f32.gmra.mxu2 %vm1390_vm13, %v1375_v28 }
 0x111   : > { %v1240_v1 = vpop.permute.xlu0 %1239 }
 0x112   : > { %v1362_v38 = vsel %vm1343_vm11, %v1111_v24, %v1240_v1 }
 0x113   : > { %1915 = vmatmul.msk.f32.gmra.mxu1 %vm1390_vm13, %v1373_v44 }
 0x114   : > { %v1226_v8 = vpop.permute.xlu1 %1225 }
 0x115   : > { %v1355_v63 = vsel %vm1343_vm11, %v1054_v39, %v1226_v8 }
 0x116   : > { %1897 = vmatmul.msk.f32.gmra.mxu0 %vm1390_vm13, %v1374_v15  ;;  %1921 = vmatmul.msk.f32.gmra.mxu3 %vm1390_vm13, %v2952_v34  ;;  %v1376_v14 = vsel %vm1364_vm7, %v1355_v63, %v1306_v17 }
 0x117   : > { %1933 = vmatmul.msk.f32.gmra.mxu2 %vm1390_vm13, %v1376_v14 }
 0x119   : > { %v1322_v56 = vpop.permute.xlu0 %1321 }
 0x11a   : > { %v1384_v0 = vsel %vm1364_vm7, %v1363_v2, %v1322_v56 }
 0x11b   : > { %1916 = vmatmul.msk.f32.gmra.mxu1 %vm1390_vm13, %v1374_v15 }
 0x11c   : > { %v1320_v26 = vpop.permute.xlu1 %1319 }
 0x11d   : > { %v1383_v16 = vsel %vm1364_vm7, %v1362_v38, %v1320_v26 }
 0x11e   : > { %1898 = vmatmul.msk.f32.gmra.mxu0 %vm1390_vm13, %v1375_v28  ;;  %1922 = vmatmul.msk.f32.gmra.mxu3 %vm1390_vm13, %v2967_v48 }
 0x11f   : > { %1934 = vmatmul.msk.f32.gmra.mxu2 %vm1390_vm13, %v1377_v51 }
 0x123   : > { %1917 = vmatmul.msk.f32.gmra.mxu1 %vm1390_vm13, %v1375_v28 }
 0x126   : > { %1899 = vmatmul.msk.f32.gmra.mxu0 %vm1390_vm13, %v1376_v14  ;;  %1938 = vmatmul.msk.f32.vlgmr.msra.gmra.mxu3 %vm1390_vm13, %v3013_v11 }
 0x127   : > { %1935 = vmatmul.msk.f32.gmra.mxu2 %vm1390_vm13, %v1378_v9 }
 0x12b   : > { %1918 = vmatmul.msk.f32.gmra.mxu1 %vm1390_vm13, %v1376_v14 }
 0x12e   : > { %1900 = vmatmul.msk.f32.gmra.mxu0 %vm1390_vm13, %v1377_v51  ;;  %1939 = vmatmul.msk.f32.gmra.mxu3 %vm1390_vm13, %v3026_v42 }
 0x12f   : > { %1936 = vmatmul.msk.f32.gmra.mxu2 %vm1390_vm13, %v2952_v34 }
 0x136   : > { %1901 = vmatmul.msk.f32.gmra.mxu0 %vm1390_vm13, %v1378_v9  ;;  %1940 = vmatmul.msk.f32.gmra.mxu3 %vm1390_vm13, %v1383_v16 }
 0x137   : > { %1937 = vmatmul.msk.f32.gmra.mxu2 %vm1390_vm13, %v2967_v48 }
 0x13e   : > { %1941 = vmatmul.msk.f32.gmra.mxu3 %vm1390_vm13, %v1384_v0 }
 0x141   : > { %v1611_v22 = vpop.f32.mrf.mxu2 }
 0x149   : > { %v1496_v3 = vpop.f32.mrf.mxu3 }
 0x150   : > { %v1534_v34 = vpop.f32.mrf.mxu1 }
 0x151   : > { %v3116_v43 = vpop.f32.mrf.mxu3 }
 0x158   : > { %v1537_v57 = vpop.f32.mrf.mxu1 }
 0x159   : > { %v1614_v18 = vpop.f32.mrf.mxu2 }
 0x15b   : > { %v1460_v33 = vpop.f32.mrf.mxu0 }
 0x15c   : > { %v1535_v47 = vadd.f32 %v1534_v34, %v1460_v33 }
 0x15e   : > { %v1659_v48 = vadd.f32 %v1611_v22, %v1535_v47 }
 0x160   : > { %v1679_v53 = vadd.f32 %v3108_v50, %v1659_v48  ;;  %v1540_v21 = vpop.f32.mrf.mxu1 }
 0x162   : > { %1695 = vst [vmem:[%s3111_s30] sm:$0xff] %v1679_v53 }
 0x163   : > { %v1463_v6 = vpop.f32.mrf.mxu0 }
 0x164   : > { %v1538_v20 = vadd.f32 %v1537_v57, %v1463_v6 }
 0x166   : > { %v1660_v11 = vadd.f32 %v1614_v18, %v1538_v20 }
 0x168   : > { %v1680_v55 = vadd.f32 %v3108_v50, %v1660_v11  ;;  %v1543_v19 = vpop.f32.mrf.mxu1 }
 0x16a   : > { %1696 = vst [vmem:[%s3111_s30 + $0x8] sm:$0xff] %v1680_v55  ;;  %v1617_v60 = vpop.f32.mrf.mxu2 }
 0x16b   : > { %v1466_v31 = vpop.f32.mrf.mxu0 }
 0x16c   : > { %v1541_v35 = vadd.f32 %v1540_v21, %v1466_v31 }
 0x16e   : > { %v1661_v42 = vadd.f32 %v1617_v60, %v1541_v35 }
 0x170   : > { %v1681_v49 = vadd.f32 %v3108_v50, %v1661_v42  ;;  %v1546_v46 = vpop.f32.mrf.mxu1 }
 0x171   : > { %v3120_v30 = vpop.f32.mrf.mxu3 }
 0x172   : > { %1697 = vst [vmem:[%s3111_s30 + $0x10] sm:$0xff] %v1681_v49 }
 0x173   : > { %v1469_v7 = vpop.f32.mrf.mxu0 }
 0x174   : > { %v1544_v61 = vadd.f32 %v1543_v19, %v1469_v7 }
 0x178   : > { %v1549_v51 = vpop.f32.mrf.mxu1 }
 0x179   : > { %v1620_v44 = vpop.f32.mrf.mxu2 }
 0x17a   : > { %v1662_v45 = vadd.f32 %v1620_v44, %v1544_v61  ;;  %v3124_v32 = vpop.f32.mrf.mxu3 }
 0x17b   : > { %v1472_v27 = vpop.f32.mrf.mxu0 }
 0x17c   : > { %v1682_v58 = vadd.f32 %v3108_v50, %v1662_v45  ;;  %v1547_v5 = vadd.f32 %v1546_v46, %v1472_v27 }
 0x17e   : > { %1698 = vst [vmem:[%s3111_s30 + $0x18] sm:$0xff] %v1682_v58 }
 0x180   : > { %v1552_v15 = vpop.f32.mrf.mxu1 }
 0x181   : > { %v1623_v59 = vpop.f32.mrf.mxu2 }
 0x182   : > { %v1663_v4 = vadd.f32 %v1623_v59, %v1547_v5  ;;  %v1570_v29 = vpop.f32.mrf.mxu3 }
 0x183   : > { %v1475_v13 = vpop.f32.mrf.mxu0  ;;  %v1571_v57 = vadd.f32 %v1570_v29, %v1496_v3 }
 0x184   : > { %v1683_v62 = vadd.f32 %v3108_v50, %v1663_v4  ;;  %v1550_v25 = vadd.f32 %v1549_v51, %v1475_v13 }
 0x186   : > { %1699 = vst [vmem:[%s3111_s30 + $0x20] sm:$0xff] %v1683_v62 }
 0x188   : > { %v1555_v12 = vpop.f32.mrf.mxu1 }
 0x18a   : > { %v1626_v37 = vpop.f32.mrf.mxu2 }
 0x18b   : > { %v1478_v40 = vpop.f32.mrf.mxu0  ;;  %v1664_v10 = vadd.f32 %v1626_v37, %v1550_v25 }
 0x18c   : > { %v1553_v41 = vadd.f32 %v1552_v15, %v1478_v40 }
 0x18d   : > { %v1684_v36 = vadd.f32 %v3108_v50, %v1664_v10 }
 0x18f   : > { %1700 = vst [vmem:[%s3111_s30 + $0x28] sm:$0xff] %v1684_v36 }
 0x190   : > { %v1558_v14 = vpop.f32.mrf.mxu1 }
 0x191   : > { %v1573_v28 = vpop.f32.mrf.mxu3 }
 0x192   : > { %v1629_v9 = vpop.f32.mrf.mxu2  ;;  %v1574_v11 = vadd.f32 %v1573_v28, %v3116_v43 }
 0x193   : > { %v1481_v54 = vpop.f32.mrf.mxu0  ;;  %v1665_v39 = vadd.f32 %v1629_v9, %v1553_v41 }
 0x194   : > { %v1556_v8 = vadd.f32 %v1555_v12, %v1481_v54 }
 0x195   : > { %v1685_v17 = vadd.f32 %v3108_v50, %v1665_v39 }
 0x197   : > { %1701 = vst [vmem:[%s3111_s30 + $0x30] sm:$0xff] %v1685_v17 }
 0x198   : > { %v1561_v0 = vpop.f32.mrf.mxu1 }
 0x199   : > { %v1576_v63 = vpop.f32.mrf.mxu3 }
 0x19a   : > { %v1632_v23 = vpop.f32.mrf.mxu2  ;;  %v1577_v46 = vadd.f32 %v1576_v63, %v3120_v30 }
 0x19b   : > { %v1484_v24 = vpop.f32.mrf.mxu0  ;;  %v1666_v1 = vadd.f32 %v1632_v23, %v1556_v8 }
 0x19c   : > { %v1559_v26 = vadd.f32 %v1558_v14, %v1484_v24 }
 0x19d   : > { %v1686_v38 = vadd.f32 %v3108_v50, %v1666_v1 }
 0x19f   : > { %1702 = vst [vmem:[%s3111_s30 + $0x38] sm:$0xff] %v1686_v38 }
 0x1a0   : > { %v1564_v20 = vpop.f32.mrf.mxu1 }
 0x1a1   : > { %v1579_v16 = vpop.f32.mrf.mxu3 }
 0x1a2   : > { %v1635_v52 = vpop.f32.mrf.mxu2  ;;  %v1580_v30 = vadd.f32 %v1579_v16, %v3124_v32 }
 0x1a3   : > { %v1487_v2 = vpop.f32.mrf.mxu0  ;;  %v1667_v56 = vadd.f32 %v1635_v52, %v1559_v26 }
 0x1a4   : > { %v1562_v22 = vadd.f32 %v1561_v0, %v1487_v2 }
 0x1a5   : > { %v1687_v34 = vadd.f32 %v3108_v50, %v1667_v56 }
 0x1a7   : > { %1703 = vst [vmem:[%s3111_s30 + $0x40] sm:$0xff] %v1687_v34 }
 0x1a8   : > { %v1567_v43 = vpop.f32.mrf.mxu1 }
 0x1a9   : > { %v1647_v33 = vpop.f32.mrf.mxu3 }
 0x1aa   : > { %v1671_v47 = vadd.f32 %v1647_v33, %v1571_v57  ;;  %v1638_v48 = vpop.f32.mrf.mxu2 }
 0x1ab   : > { %v1668_v53 = vadd.f32 %v1638_v48, %v1562_v22  ;;  %v1490_v18 = vpop.f32.mrf.mxu0 }
 0x1ac   : > { %v1691_v21 = vadd.f32 %v3108_v50, %v1671_v47  ;;  %v1565_v3 = vadd.f32 %v1564_v20, %v1490_v18 }
 0x1ad   : > { %v1688_v6 = vadd.f32 %v3108_v50, %v1668_v53 }
 0x1ae   : > { %1707 = vst [vmem:[%s3111_s30 + $0x60] sm:$0xff] %v1691_v21 }
 0x1af   : > { %1704 = vst [vmem:[%s3111_s30 + $0x48] sm:$0xff] %v1688_v6 }
 0x1b1   : > { %v1650_v55 = vpop.f32.mrf.mxu3 }
 0x1b2   : > { %v1672_v19 = vadd.f32 %v1650_v55, %v1574_v11  ;;  %v1641_v31 = vpop.f32.mrf.mxu2 }
 0x1b3   : > { %v1669_v60 = vadd.f32 %v1641_v31, %v1565_v3  ;;  %v1493_v49 = vpop.f32.mrf.mxu0 }
 0x1b4   : > { %v1692_v35 = vadd.f32 %v3108_v50, %v1672_v19  ;;  %v1568_v7 = vadd.f32 %v1567_v43, %v1493_v49 }
 0x1b5   : > { %v1689_v42 = vadd.f32 %v3108_v50, %v1669_v60 }
 0x1b6   : > { %1708 = vst [vmem:[%s3111_s30 + $0x68] sm:$0xff] %v1692_v35 }
 0x1b7   : > { %1705 = vst [vmem:[%s3111_s30 + $0x50] sm:$0xff] %v1689_v42 }
 0x1b9   : > { %v1653_v61 = vpop.f32.mrf.mxu3 }
 0x1ba   : > { %v1673_v44 = vadd.f32 %v1653_v61, %v1577_v46  ;;  %v1644_v45 = vpop.f32.mrf.mxu2 }
 0x1bb   : > { %v1670_v27 = vadd.f32 %v1644_v45, %v1568_v7 }
 0x1bc   : > { %v1693_v58 = vadd.f32 %v3108_v50, %v1673_v44 }
 0x1bd   : > { %v1690_v51 = vadd.f32 %v3108_v50, %v1670_v27 }
 0x1be   : > { %1709 = vst [vmem:[%s3111_s30 + $0x70] sm:$0xff] %v1693_v58 }
 0x1bf   : > { %1706 = vst [vmem:[%s3111_s30 + $0x58] sm:$0xff] %v1690_v51 }
 0x1c1   : > { %v1656_v5 = vpop.f32.mrf.mxu3 }
 0x1c2   : > { %v1674_v59 = vadd.f32 %v1656_v5, %v1580_v30 }
 0x1c4   : > { %v1694_v4 = vadd.f32 %v3108_v50, %v1674_v59 }
 0x1c6   : > { %1710 = vst [vmem:[%s3111_s30 + $0x78] sm:$0xff] %v1694_v4 }
 0x1c7   : > { %2064 = shalt.err (!%p2061_p12)
}
 0x1c8   : > { %s2135_s14 = smov 128  }
 0x1c9   : > { %1962 = dma.vmem_to_hbm [thread:$0]  (%p2217_p3), %s1728_s12, 2048, %s1730_s8, %s1712_s15, %s2135_s14, %s2135_s14, %s2134_s17  }
 0x1ca PF: > { %p1968_p13 = scmp.ge.s32.totalorder %s2131_s25, 2  ;;  %s1744_s30 = sand.u32 1, %s2103_s18  }
 0x1cb   : > { %s1745_s26 = scalar_lea.sflag [#allocation3], %s1744_s30 }
 0x1cc   : > { %p1965_p0 = pnand %p1968_p13, %p2226_p8 }
 0x1ce   : > { %p1966_p1 = pneg %p1965_p0 }
 0x1d0   : > { %2098 = dma.done.wait (%p1966_p1), %s1745_s26, 2048  }
 0x1d1   : > { %2100 = vsyncadd (%p1966_p1), %s1745_s26, 4294965248  ;;  %s18_s25 = sadd.s32 1, %s2131_s25   ;;  %s3232_s18 = smov %s2107_s19 }
 0x1d2   : > { %p15_p2 = scmp.ge.s32.totalorder %s18_s25, 6   ;;  %s3233_s19 = smov %s2111_s20 }
 0x1d3   : > { %s3234_s20 = smov %s2235_s11  ;;  %s3235_s21 = smov %s2123_s23 }
 0x1d4   : > { %s3236_s22 = smov %s2127_s24  ;;  %s3237_s23 = smov %s3240_s28 }
 0x1d5   : > { %s3238_s24 = smov %s3244_s29  ;;  %17 = sbr.rel (!%p15_p2) target bundleno = 5 (0x5), region = 83 }
 0x1da   :  { %1751 = vsyncpa [#allocation3], 1 }
 0x1db   :  { %1753 = vsyncpa [#allocation3 + $0x1], 1 }

</bundles_post_ra>
